<compile_context>
chip_gen: v6e
topology: v6e:2x2x1
jax: 0.10.0
libtpu: 0.0.40
codegen_flags: <defaults>
</compile_context>

<pallas_src>
import jax
import jax.numpy as jnp
import numpy as np
from jax import lax
from jax.experimental import pallas as pl
from jax.experimental.pallas import tpu as pltpu

EPS = 1e-5


# ----------------------------- fused Pallas kernel ---------------------------

def _net_fused_kernel(x_ref,
                      b1, s1, b2, s2, b3, s3,
                      b5, s5, b6, s6, b8, s8, b9, s9,
                      w10, sel, o_ref):
    f32 = jnp.float32

    def conv3x3(x2d, b_ref, s_ref):
        # Row-Toeplitz conv: X[h, w*Cin+ci] -> relu(conv+BN)[oh, ow*Cout+co].
        ho = x2d.shape[0] - 2
        acc = jnp.dot(x2d[0:ho, :], b_ref[0], preferred_element_type=f32)
        acc = acc + jnp.dot(x2d[1:ho + 1, :], b_ref[1], preferred_element_type=f32)
        acc = acc + jnp.dot(x2d[2:ho + 2, :], b_ref[2], preferred_element_type=f32)
        return jnp.maximum(acc + s_ref[...], 0.0)

    x = x_ref[0]                                       # (28, 28)   (Cin = 1)
    y1 = conv3x3(x, b1, s1)                            # (26, 260)
    y2 = conv3x3(y1, b2, s2)                           # (24, 240)
    # conv3 output columns are pre-permuted to [even ow | odd ow] halves.
    y3 = conv3x3(y2, b3, s3)                           # (22, 352)

    # Fused 2x2 max-pool, fully vectorized (relu commutes with max):
    vw = jnp.maximum(y3[:, 0:176], y3[:, 176:352])     # width pool   (22, 176)
    vr = jnp.maximum(vw[0:21, :], vw[1:22, :])         # adjacent-row max (21, 176)
    # Even-row decimation via a constant 0/1 selection matmul (MXU, no strides).
    pooled = jnp.dot(sel[...], vr, preferred_element_type=f32)   # (11, 176)

    # conv4 (1x1, linear) has been folded into b5/s5 on the host.
    y5 = conv3x3(pooled, b5, s5)                       # (9, 90)
    y6 = conv3x3(y5, b6, s6)                           # (7, 112)
    y8 = conv3x3(y6, b8, s8)                           # (5, 80)
    y9 = conv3x3(y8, b9, s9)                           # (3, 48)

    # GAP(3x3) + 1x1 conv head + log_softmax.
    rs = y9[0:1, :] + y9[1:2, :] + y9[2:3, :]          # (1, 48)
    g = (rs[:, 0:16] + rs[:, 16:32] + rs[:, 32:48]) * (1.0 / 9.0)   # (1, 16)
    logits = jnp.dot(g, w10[...], preferred_element_type=f32)       # (1, 10)
    m = jnp.max(logits, axis=-1, keepdims=True)
    z = logits - m
    lse = jnp.log(jnp.sum(jnp.exp(z), axis=-1, keepdims=True))
    o_ref[0] = z - lse


# ----------------------------- pallas_call wrapper ---------------------------

_WEIGHT_NAMES = ["b1", "s1", "b2", "s2", "b3", "s3",
                 "b5", "s5", "b6", "s6", "b8", "s8", "b9", "s9",
                 "w10", "sel"]


def _const_spec(shape):
    nd = len(shape)
    return pl.BlockSpec(shape, lambda n, nd=nd: (0,) * nd)


def net_forward(x_nchw, FP):
    N = x_nchw.shape[0]
    x = x_nchw.reshape(N, 28, 28).astype(jnp.float32)   # drop the Cin=1 axis

    weights = [FP[k] for k in _WEIGHT_NAMES]

    in_specs = [pl.BlockSpec((1, 28, 28), lambda n: (n, 0, 0))]
    in_specs += [_const_spec(w.shape) for w in weights]

    out = pl.pallas_call(
        _net_fused_kernel,
        grid=(N,),
        in_specs=in_specs,
        out_specs=pl.BlockSpec((1, 1, 10), lambda n: (n, 0, 0)),
        out_shape=jax.ShapeDtypeStruct((N, 1, 10), jnp.float32),
        compiler_params=pltpu.CompilerParams(
            dimension_semantics=("parallel",)),
    )(x, *weights)
    return out.reshape(N, 10)


# ------------------- host-side weight folding (done once) --------------------

def _fold_bn(bn):
    gamma, beta, mean, var = (np.asarray(t, np.float32) for t in bn)
    scale = gamma / np.sqrt(var + EPS)
    shift = beta - mean * scale
    return scale, shift


def _toeplitz_conv3x3(w_oihw, scale, shift, w_in, col_perm=None):
    w = np.asarray(w_oihw, np.float32)
    cout, cin, kh, kw = w.shape
    wo = w_in - kw + 1
    B = np.zeros((kh, w_in * cin, wo * cout), np.float32)
    for i in range(kh):
        for j in range(kw):
            blk = w[:, :, i, j].T * scale[None, :]       # (cin, cout), BN folded
            for ow in range(wo):
                wi = ow + j
                B[i, wi * cin:(wi + 1) * cin, ow * cout:(ow + 1) * cout] = blk
    sh = np.tile(shift, wo)                              # layout: ow*cout + co
    if col_perm is not None:
        B = B[:, :, col_perm]
        sh = sh[col_perm]
    return jnp.asarray(B), jnp.asarray(sh.reshape(1, -1))


def prepare_params(P):
    FP = {}

    def add3x3(name, w, bn_key, w_in, col_perm=None):
        scale, shift = _fold_bn(P[bn_key])
        FP["b" + name], FP["s" + name] = _toeplitz_conv3x3(
            w, scale, shift, w_in, col_perm)

    # conv3 output column permutation: [even ow | odd ow], 16 channels each.
    perm = np.asarray(
        [ow * 16 + c for ow in range(0, 22, 2) for c in range(16)]
        + [ow * 16 + c for ow in range(1, 22, 2) for c in range(16)])

    add3x3("1", P["w1"], "bn1", 28)
    add3x3("2", P["w2"], "bn2", 26)
    add3x3("3", P["w3"], "bn3", 24, col_perm=perm)

    # Fold the linear 1x1 conv4 (16->10, no BN/ReLU) into conv5's 3x3 weights.
    w4 = np.asarray(P["w4"], np.float32)[:, :, 0, 0]          # (10, 16)
    w5 = np.asarray(P["w5"], np.float32)                      # (10, 10, 3, 3)
    w5_eff = np.einsum("omij,mc->ocij", w5, w4)               # (10, 16, 3, 3)
    add3x3("5", w5_eff, "bn5", 11)

    add3x3("6", P["w6"], "bn6", 9)
    add3x3("8", P["w8"], "bn8", 7)
    add3x3("9", P["w9"], "bn9", 5)

    FP["w10"] = jnp.asarray(np.asarray(P["w10"], np.float32)[:, :, 0, 0].T)

    # Even-row selection matrix for the height pool (11 x 21, 0/1).
    sel = np.zeros((11, 21), np.float32)
    sel[np.arange(11), 2 * np.arange(11)] = 1.0
    FP["sel"] = jnp.asarray(sel)
    return FP


# ----------------------------- reference (plain JAX) -------------------------

def ref_forward(x, P):
    def conv(x, w):
        return lax.conv_general_dilated(
            x, w, (1, 1), "VALID",
            dimension_numbers=("NCHW", "OIHW", "NCHW"),
            precision=lax.Precision.HIGHEST)

    def bn_relu(x, bn):
        gamma, beta, mean, var = bn
        s = gamma / jnp.sqrt(var + EPS)
        y = x * s[None, :, None, None] + (beta - mean * s)[None, :, None, None]
        return jnp.maximum(y, 0.0)

    x = bn_relu(conv(x, P["w1"]), P["bn1"])
    x = bn_relu(conv(x, P["w2"]), P["bn2"])
    x = bn_relu(conv(x, P["w3"]), P["bn3"])
    x = lax.reduce_window(x, -jnp.inf, lax.max, (1, 1, 2, 2), (1, 1, 2, 2), "VALID")
    x = conv(x, P["w4"])
    x = bn_relu(conv(x, P["w5"]), P["bn5"])
    x = bn_relu(conv(x, P["w6"]), P["bn6"])
    x = bn_relu(conv(x, P["w8"]), P["bn8"])
    x = bn_relu(conv(x, P["w9"]), P["bn9"])
    x = jnp.mean(x, axis=(2, 3), keepdims=True)
    x = conv(x, P["w10"])
    return jax.nn.log_softmax(x.reshape(-1, 10), axis=-1)


# ----------------------------- params ----------------------------------------

def init_params(key):
    def conv_w(k, cout, cin, ks):
        return 0.1 * jax.random.normal(k, (cout, cin, ks, ks), jnp.float32)

    def bn_p(k, c):
        k1, k2, k3, k4 = jax.random.split(k, 4)
        gamma = 1.0 + 0.1 * jax.random.normal(k1, (c,), jnp.float32)
        beta = 0.1 * jax.random.normal(k2, (c,), jnp.float32)
        mean = 0.1 * jax.random.normal(k3, (c,), jnp.float32)
        var = 1.0 + 0.2 * jax.random.uniform(k4, (c,), jnp.float32)
        return (gamma, beta, mean, var)

    ks = jax.random.split(key, 16)
    P = {}
    P["w1"], P["bn1"] = conv_w(ks[0], 10, 1, 3), bn_p(ks[1], 10)
    P["w2"], P["bn2"] = conv_w(ks[2], 10, 10, 3), bn_p(ks[3], 10)
    P["w3"], P["bn3"] = conv_w(ks[4], 16, 10, 3), bn_p(ks[5], 16)
    P["w4"] = conv_w(ks[6], 10, 16, 1)
    P["w5"], P["bn5"] = conv_w(ks[7], 10, 10, 3), bn_p(ks[8], 10)
    P["w6"], P["bn6"] = conv_w(ks[9], 16, 10, 3), bn_p(ks[10], 16)
    P["w8"], P["bn8"] = conv_w(ks[11], 16, 16, 3), bn_p(ks[12], 16)
    P["w9"], P["bn9"] = conv_w(ks[13], 16, 16, 3), bn_p(ks[14], 16)
    P["w10"] = conv_w(ks[15], 10, 16, 1)
    return P


if __name__ == "__main__":
    key = jax.random.PRNGKey(0)
    params = init_params(key)
    folded = prepare_params(params)      # BN fold / conv4 fold / Toeplitz: once, host-side
    # The architecture requires 28x28 single-channel input (MNIST-like).
    x = jax.random.normal(jax.random.fold_in(key, 999), (2, 1, 28, 28), jnp.float32)

    fwd = jax.jit(net_forward)
    out = jax.block_until_ready(fwd(x, folded))
    assert out.shape == (2, 10)

    ref = jax.block_until_ready(ref_forward(x, params))
    np.testing.assert_allclose(np.asarray(out), np.asarray(ref), rtol=2e-3, atol=2e-3)

    print("KERNEL_OK")
</pallas_src>

<mosaic_0001>
module attributes {stable_mosaic.version = 11 : i64} {
  func.func @_net_fused_kernel(%arg0: i32, %arg1: memref<1x28x28xf32, #tpu.memory_space<vmem>>, %arg2: memref<3x28x260xf32, #tpu.memory_space<vmem>>, %arg3: memref<1x260xf32, #tpu.memory_space<vmem>>, %arg4: memref<3x260x240xf32, #tpu.memory_space<vmem>>, %arg5: memref<1x240xf32, #tpu.memory_space<vmem>>, %arg6: memref<3x240x352xf32, #tpu.memory_space<vmem>>, %arg7: memref<1x352xf32, #tpu.memory_space<vmem>>, %arg8: memref<3x176x90xf32, #tpu.memory_space<vmem>>, %arg9: memref<1x90xf32, #tpu.memory_space<vmem>>, %arg10: memref<3x90x112xf32, #tpu.memory_space<vmem>>, %arg11: memref<1x112xf32, #tpu.memory_space<vmem>>, %arg12: memref<3x112x80xf32, #tpu.memory_space<vmem>>, %arg13: memref<1x80xf32, #tpu.memory_space<vmem>>, %arg14: memref<3x80x48xf32, #tpu.memory_space<vmem>>, %arg15: memref<1x48xf32, #tpu.memory_space<vmem>>, %arg16: memref<16x10xf32, #tpu.memory_space<vmem>>, %arg17: memref<11x21xf32, #tpu.memory_space<vmem>>, %arg18: memref<1x1x10xf32, #tpu.memory_space<vmem>>) attributes {dimension_semantics = [#tpu.dimension_semantics<parallel>], iteration_bounds = array<i64: 2>, scalar_prefetch = 0 : i64, scratch_operands = 0 : i64, tpu.core_type = #tpu.core_type<tc>, window_params = [{transform_indices = @transform_0, window_bounds = array<i64: 1, 28, 28>}, {pipeline_mode = #tpu.pipeline_mode<synchronous>, transform_indices = @transform_1, window_bounds = array<i64: 3, 28, 260>}, {pipeline_mode = #tpu.pipeline_mode<synchronous>, transform_indices = @transform_2, window_bounds = array<i64: 1, 260>}, {pipeline_mode = #tpu.pipeline_mode<synchronous>, transform_indices = @transform_3, window_bounds = array<i64: 3, 260, 240>}, {pipeline_mode = #tpu.pipeline_mode<synchronous>, transform_indices = @transform_4, window_bounds = array<i64: 1, 240>}, {pipeline_mode = #tpu.pipeline_mode<synchronous>, transform_indices = @transform_5, window_bounds = array<i64: 3, 240, 352>}, {pipeline_mode = #tpu.pipeline_mode<synchronous>, transform_indices = @transform_6, window_bounds = array<i64: 1, 352>}, {pipeline_mode = #tpu.pipeline_mode<synchronous>, transform_indices = @transform_7, window_bounds = array<i64: 3, 176, 90>}, {pipeline_mode = #tpu.pipeline_mode<synchronous>, transform_indices = @transform_8, window_bounds = array<i64: 1, 90>}, {pipeline_mode = #tpu.pipeline_mode<synchronous>, transform_indices = @transform_9, window_bounds = array<i64: 3, 90, 112>}, {pipeline_mode = #tpu.pipeline_mode<synchronous>, transform_indices = @transform_10, window_bounds = array<i64: 1, 112>}, {pipeline_mode = #tpu.pipeline_mode<synchronous>, transform_indices = @transform_11, window_bounds = array<i64: 3, 112, 80>}, {pipeline_mode = #tpu.pipeline_mode<synchronous>, transform_indices = @transform_12, window_bounds = array<i64: 1, 80>}, {pipeline_mode = #tpu.pipeline_mode<synchronous>, transform_indices = @transform_13, window_bounds = array<i64: 3, 80, 48>}, {pipeline_mode = #tpu.pipeline_mode<synchronous>, transform_indices = @transform_14, window_bounds = array<i64: 1, 48>}, {pipeline_mode = #tpu.pipeline_mode<synchronous>, transform_indices = @transform_15, window_bounds = array<i64: 16, 10>}, {pipeline_mode = #tpu.pipeline_mode<synchronous>, transform_indices = @transform_16, window_bounds = array<i64: 11, 21>}, {transform_indices = @transform_17, window_bounds = array<i64: 1, 1, 10>}]} {
    %c0 = arith.constant 0 : index
    %c0_0 = arith.constant 0 : index
    %c0_1 = arith.constant 0 : index
    %0 = vector.load %arg1[%c0, %c0_0, %c0_1] : memref<1x28x28xf32, #tpu.memory_space<vmem>>, vector<1x28x28xf32>
    %1 = vector.shape_cast %0 : vector<1x28x28xf32> to vector<28x28xf32>
    %2 = vector.extract_strided_slice %1 {offsets = [0, 0], sizes = [26, 28], strides = [1, 1]} : vector<28x28xf32> to vector<26x28xf32>
    %c0_2 = arith.constant 0 : index
    %c0_3 = arith.constant 0 : index
    %c0_4 = arith.constant 0 : index
    %3 = vector.load %arg2[%c0_2, %c0_3, %c0_4] : memref<3x28x260xf32, #tpu.memory_space<vmem>>, vector<1x28x260xf32>
    %4 = vector.shape_cast %3 : vector<1x28x260xf32> to vector<28x260xf32>
    %cst = arith.constant dense<0.000000e+00> : vector<26x260xf32>
    %5 = tpu.matmul %2, %4, %cst {dimension_numbers = #tpu.dot_dimension_numbers<[1], [0], [0], [1], [0, 0, 1, 1], [], []>} : vector<26x28xf32>, vector<28x260xf32>, vector<26x260xf32> -> vector<26x260xf32>
    %6 = vector.extract_strided_slice %1 {offsets = [1, 0], sizes = [26, 28], strides = [1, 1]} : vector<28x28xf32> to vector<26x28xf32>
    %c1 = arith.constant 1 : index
    %c0_5 = arith.constant 0 : index
    %c0_6 = arith.constant 0 : index
    %7 = vector.load %arg2[%c1, %c0_5, %c0_6] : memref<3x28x260xf32, #tpu.memory_space<vmem>>, vector<1x28x260xf32>
    %8 = vector.shape_cast %7 : vector<1x28x260xf32> to vector<28x260xf32>
    %cst_7 = arith.constant dense<0.000000e+00> : vector<26x260xf32>
    %9 = tpu.matmul %6, %8, %cst_7 {dimension_numbers = #tpu.dot_dimension_numbers<[1], [0], [0], [1], [0, 0, 1, 1], [], []>} : vector<26x28xf32>, vector<28x260xf32>, vector<26x260xf32> -> vector<26x260xf32>
    %10 = arith.addf %5, %9 : vector<26x260xf32>
    %11 = vector.extract_strided_slice %1 {offsets = [2, 0], sizes = [26, 28], strides = [1, 1]} : vector<28x28xf32> to vector<26x28xf32>
    %c2 = arith.constant 2 : index
    %c0_8 = arith.constant 0 : index
    %c0_9 = arith.constant 0 : index
    %12 = vector.load %arg2[%c2, %c0_8, %c0_9] : memref<3x28x260xf32, #tpu.memory_space<vmem>>, vector<1x28x260xf32>
    %13 = vector.shape_cast %12 : vector<1x28x260xf32> to vector<28x260xf32>
    %cst_10 = arith.constant dense<0.000000e+00> : vector<26x260xf32>
    %14 = tpu.matmul %11, %13, %cst_10 {dimension_numbers = #tpu.dot_dimension_numbers<[1], [0], [0], [1], [0, 0, 1, 1], [], []>} : vector<26x28xf32>, vector<28x260xf32>, vector<26x260xf32> -> vector<26x260xf32>
    %15 = arith.addf %10, %14 : vector<26x260xf32>
    %c0_11 = arith.constant 0 : index
    %c0_12 = arith.constant 0 : index
    %16 = vector.load %arg3[%c0_11, %c0_12] : memref<1x260xf32, #tpu.memory_space<vmem>>, vector<1x260xf32>
    %17 = vector.broadcast %16 : vector<1x260xf32> to vector<26x260xf32>
    %18 = arith.addf %15, %17 : vector<26x260xf32>
    %cst_13 = arith.constant 0.000000e+00 : f32
    %19 = vector.broadcast %cst_13 : f32 to vector<26x260xf32>
    %20 = arith.maximumf %18, %19 : vector<26x260xf32>
    %21 = vector.extract_strided_slice %20 {offsets = [0, 0], sizes = [24, 260], strides = [1, 1]} : vector<26x260xf32> to vector<24x260xf32>
    %c0_14 = arith.constant 0 : index
    %c0_15 = arith.constant 0 : index
    %c0_16 = arith.constant 0 : index
    %22 = vector.load %arg4[%c0_14, %c0_15, %c0_16] : memref<3x260x240xf32, #tpu.memory_space<vmem>>, vector<1x260x240xf32>
    %23 = vector.shape_cast %22 : vector<1x260x240xf32> to vector<260x240xf32>
    %cst_17 = arith.constant dense<0.000000e+00> : vector<24x240xf32>
    %24 = tpu.matmul %21, %23, %cst_17 {dimension_numbers = #tpu.dot_dimension_numbers<[1], [0], [0], [1], [0, 0, 1, 1], [], []>} : vector<24x260xf32>, vector<260x240xf32>, vector<24x240xf32> -> vector<24x240xf32>
    %25 = vector.extract_strided_slice %20 {offsets = [1, 0], sizes = [24, 260], strides = [1, 1]} : vector<26x260xf32> to vector<24x260xf32>
    %c1_18 = arith.constant 1 : index
    %c0_19 = arith.constant 0 : index
    %c0_20 = arith.constant 0 : index
    %26 = vector.load %arg4[%c1_18, %c0_19, %c0_20] : memref<3x260x240xf32, #tpu.memory_space<vmem>>, vector<1x260x240xf32>
    %27 = vector.shape_cast %26 : vector<1x260x240xf32> to vector<260x240xf32>
    %cst_21 = arith.constant dense<0.000000e+00> : vector<24x240xf32>
    %28 = tpu.matmul %25, %27, %cst_21 {dimension_numbers = #tpu.dot_dimension_numbers<[1], [0], [0], [1], [0, 0, 1, 1], [], []>} : vector<24x260xf32>, vector<260x240xf32>, vector<24x240xf32> -> vector<24x240xf32>
    %29 = arith.addf %24, %28 : vector<24x240xf32>
    %30 = vector.extract_strided_slice %20 {offsets = [2, 0], sizes = [24, 260], strides = [1, 1]} : vector<26x260xf32> to vector<24x260xf32>
    %c2_22 = arith.constant 2 : index
    %c0_23 = arith.constant 0 : index
    %c0_24 = arith.constant 0 : index
    %31 = vector.load %arg4[%c2_22, %c0_23, %c0_24] : memref<3x260x240xf32, #tpu.memory_space<vmem>>, vector<1x260x240xf32>
    %32 = vector.shape_cast %31 : vector<1x260x240xf32> to vector<260x240xf32>
    %cst_25 = arith.constant dense<0.000000e+00> : vector<24x240xf32>
    %33 = tpu.matmul %30, %32, %cst_25 {dimension_numbers = #tpu.dot_dimension_numbers<[1], [0], [0], [1], [0, 0, 1, 1], [], []>} : vector<24x260xf32>, vector<260x240xf32>, vector<24x240xf32> -> vector<24x240xf32>
    %34 = arith.addf %29, %33 : vector<24x240xf32>
    %c0_26 = arith.constant 0 : index
    %c0_27 = arith.constant 0 : index
    %35 = vector.load %arg5[%c0_26, %c0_27] : memref<1x240xf32, #tpu.memory_space<vmem>>, vector<1x240xf32>
    %36 = vector.broadcast %35 : vector<1x240xf32> to vector<24x240xf32>
    %37 = arith.addf %34, %36 : vector<24x240xf32>
    %cst_28 = arith.constant 0.000000e+00 : f32
    %38 = vector.broadcast %cst_28 : f32 to vector<24x240xf32>
    %39 = arith.maximumf %37, %38 : vector<24x240xf32>
    %40 = vector.extract_strided_slice %39 {offsets = [0, 0], sizes = [22, 240], strides = [1, 1]} : vector<24x240xf32> to vector<22x240xf32>
    %c0_29 = arith.constant 0 : index
    %c0_30 = arith.constant 0 : index
    %c0_31 = arith.constant 0 : index
    %41 = vector.load %arg6[%c0_29, %c0_30, %c0_31] : memref<3x240x352xf32, #tpu.memory_space<vmem>>, vector<1x240x352xf32>
    %42 = vector.shape_cast %41 : vector<1x240x352xf32> to vector<240x352xf32>
    %cst_32 = arith.constant dense<0.000000e+00> : vector<22x352xf32>
    %43 = tpu.matmul %40, %42, %cst_32 {dimension_numbers = #tpu.dot_dimension_numbers<[1], [0], [0], [1], [0, 0, 1, 1], [], []>} : vector<22x240xf32>, vector<240x352xf32>, vector<22x352xf32> -> vector<22x352xf32>
    %44 = vector.extract_strided_slice %39 {offsets = [1, 0], sizes = [22, 240], strides = [1, 1]} : vector<24x240xf32> to vector<22x240xf32>
    %c1_33 = arith.constant 1 : index
    %c0_34 = arith.constant 0 : index
    %c0_35 = arith.constant 0 : index
    %45 = vector.load %arg6[%c1_33, %c0_34, %c0_35] : memref<3x240x352xf32, #tpu.memory_space<vmem>>, vector<1x240x352xf32>
    %46 = vector.shape_cast %45 : vector<1x240x352xf32> to vector<240x352xf32>
    %cst_36 = arith.constant dense<0.000000e+00> : vector<22x352xf32>
    %47 = tpu.matmul %44, %46, %cst_36 {dimension_numbers = #tpu.dot_dimension_numbers<[1], [0], [0], [1], [0, 0, 1, 1], [], []>} : vector<22x240xf32>, vector<240x352xf32>, vector<22x352xf32> -> vector<22x352xf32>
    %48 = arith.addf %43, %47 : vector<22x352xf32>
    %49 = vector.extract_strided_slice %39 {offsets = [2, 0], sizes = [22, 240], strides = [1, 1]} : vector<24x240xf32> to vector<22x240xf32>
    %c2_37 = arith.constant 2 : index
    %c0_38 = arith.constant 0 : index
    %c0_39 = arith.constant 0 : index
    %50 = vector.load %arg6[%c2_37, %c0_38, %c0_39] : memref<3x240x352xf32, #tpu.memory_space<vmem>>, vector<1x240x352xf32>
    %51 = vector.shape_cast %50 : vector<1x240x352xf32> to vector<240x352xf32>
    %cst_40 = arith.constant dense<0.000000e+00> : vector<22x352xf32>
    %52 = tpu.matmul %49, %51, %cst_40 {dimension_numbers = #tpu.dot_dimension_numbers<[1], [0], [0], [1], [0, 0, 1, 1], [], []>} : vector<22x240xf32>, vector<240x352xf32>, vector<22x352xf32> -> vector<22x352xf32>
    %53 = arith.addf %48, %52 : vector<22x352xf32>
    %c0_41 = arith.constant 0 : index
    %c0_42 = arith.constant 0 : index
    %54 = vector.load %arg7[%c0_41, %c0_42] : memref<1x352xf32, #tpu.memory_space<vmem>>, vector<1x352xf32>
    %55 = vector.broadcast %54 : vector<1x352xf32> to vector<22x352xf32>
    %56 = arith.addf %53, %55 : vector<22x352xf32>
    %cst_43 = arith.constant 0.000000e+00 : f32
    %57 = vector.broadcast %cst_43 : f32 to vector<22x352xf32>
    %58 = arith.maximumf %56, %57 : vector<22x352xf32>
    %59 = vector.extract_strided_slice %58 {offsets = [0, 0], sizes = [22, 176], strides = [1, 1]} : vector<22x352xf32> to vector<22x176xf32>
    %60 = vector.extract_strided_slice %58 {offsets = [0, 176], sizes = [22, 176], strides = [1, 1]} : vector<22x352xf32> to vector<22x176xf32>
    %61 = arith.maximumf %59, %60 : vector<22x176xf32>
    %62 = vector.extract_strided_slice %61 {offsets = [0, 0], sizes = [21, 176], strides = [1, 1]} : vector<22x176xf32> to vector<21x176xf32>
    %63 = vector.extract_strided_slice %61 {offsets = [1, 0], sizes = [21, 176], strides = [1, 1]} : vector<22x176xf32> to vector<21x176xf32>
    %64 = arith.maximumf %62, %63 : vector<21x176xf32>
    %c0_44 = arith.constant 0 : index
    %c0_45 = arith.constant 0 : index
    %65 = vector.load %arg17[%c0_44, %c0_45] : memref<11x21xf32, #tpu.memory_space<vmem>>, vector<11x21xf32>
    %cst_46 = arith.constant dense<0.000000e+00> : vector<11x176xf32>
    %66 = tpu.matmul %65, %64, %cst_46 {dimension_numbers = #tpu.dot_dimension_numbers<[1], [0], [0], [1], [0, 0, 1, 1], [], []>} : vector<11x21xf32>, vector<21x176xf32>, vector<11x176xf32> -> vector<11x176xf32>
    %67 = vector.extract_strided_slice %66 {offsets = [0, 0], sizes = [9, 176], strides = [1, 1]} : vector<11x176xf32> to vector<9x176xf32>
    %c0_47 = arith.constant 0 : index
    %c0_48 = arith.constant 0 : index
    %c0_49 = arith.constant 0 : index
    %68 = vector.load %arg8[%c0_47, %c0_48, %c0_49] : memref<3x176x90xf32, #tpu.memory_space<vmem>>, vector<1x176x90xf32>
    %69 = vector.shape_cast %68 : vector<1x176x90xf32> to vector<176x90xf32>
    %cst_50 = arith.constant dense<0.000000e+00> : vector<9x90xf32>
    %70 = tpu.matmul %67, %69, %cst_50 {dimension_numbers = #tpu.dot_dimension_numbers<[1], [0], [0], [1], [0, 0, 1, 1], [], []>} : vector<9x176xf32>, vector<176x90xf32>, vector<9x90xf32> -> vector<9x90xf32>
    %71 = vector.extract_strided_slice %66 {offsets = [1, 0], sizes = [9, 176], strides = [1, 1]} : vector<11x176xf32> to vector<9x176xf32>
    %c1_51 = arith.constant 1 : index
    %c0_52 = arith.constant 0 : index
    %c0_53 = arith.constant 0 : index
    %72 = vector.load %arg8[%c1_51, %c0_52, %c0_53] : memref<3x176x90xf32, #tpu.memory_space<vmem>>, vector<1x176x90xf32>
    %73 = vector.shape_cast %72 : vector<1x176x90xf32> to vector<176x90xf32>
    %cst_54 = arith.constant dense<0.000000e+00> : vector<9x90xf32>
    %74 = tpu.matmul %71, %73, %cst_54 {dimension_numbers = #tpu.dot_dimension_numbers<[1], [0], [0], [1], [0, 0, 1, 1], [], []>} : vector<9x176xf32>, vector<176x90xf32>, vector<9x90xf32> -> vector<9x90xf32>
    %75 = arith.addf %70, %74 : vector<9x90xf32>
    %76 = vector.extract_strided_slice %66 {offsets = [2, 0], sizes = [9, 176], strides = [1, 1]} : vector<11x176xf32> to vector<9x176xf32>
    %c2_55 = arith.constant 2 : index
    %c0_56 = arith.constant 0 : index
    %c0_57 = arith.constant 0 : index
    %77 = vector.load %arg8[%c2_55, %c0_56, %c0_57] : memref<3x176x90xf32, #tpu.memory_space<vmem>>, vector<1x176x90xf32>
    %78 = vector.shape_cast %77 : vector<1x176x90xf32> to vector<176x90xf32>
    %cst_58 = arith.constant dense<0.000000e+00> : vector<9x90xf32>
    %79 = tpu.matmul %76, %78, %cst_58 {dimension_numbers = #tpu.dot_dimension_numbers<[1], [0], [0], [1], [0, 0, 1, 1], [], []>} : vector<9x176xf32>, vector<176x90xf32>, vector<9x90xf32> -> vector<9x90xf32>
    %80 = arith.addf %75, %79 : vector<9x90xf32>
    %c0_59 = arith.constant 0 : index
    %c0_60 = arith.constant 0 : index
    %81 = vector.load %arg9[%c0_59, %c0_60] : memref<1x90xf32, #tpu.memory_space<vmem>>, vector<1x90xf32>
    %82 = vector.broadcast %81 : vector<1x90xf32> to vector<9x90xf32>
    %83 = arith.addf %80, %82 : vector<9x90xf32>
    %cst_61 = arith.constant 0.000000e+00 : f32
    %84 = vector.broadcast %cst_61 : f32 to vector<9x90xf32>
    %85 = arith.maximumf %83, %84 : vector<9x90xf32>
    %86 = vector.extract_strided_slice %85 {offsets = [0, 0], sizes = [7, 90], strides = [1, 1]} : vector<9x90xf32> to vector<7x90xf32>
    %c0_62 = arith.constant 0 : index
    %c0_63 = arith.constant 0 : index
    %c0_64 = arith.constant 0 : index
    %87 = vector.load %arg10[%c0_62, %c0_63, %c0_64] : memref<3x90x112xf32, #tpu.memory_space<vmem>>, vector<1x90x112xf32>
    %88 = vector.shape_cast %87 : vector<1x90x112xf32> to vector<90x112xf32>
    %cst_65 = arith.constant dense<0.000000e+00> : vector<7x112xf32>
    %89 = tpu.matmul %86, %88, %cst_65 {dimension_numbers = #tpu.dot_dimension_numbers<[1], [0], [0], [1], [0, 0, 1, 1], [], []>} : vector<7x90xf32>, vector<90x112xf32>, vector<7x112xf32> -> vector<7x112xf32>
    %90 = vector.extract_strided_slice %85 {offsets = [1, 0], sizes = [7, 90], strides = [1, 1]} : vector<9x90xf32> to vector<7x90xf32>
    %c1_66 = arith.constant 1 : index
    %c0_67 = arith.constant 0 : index
    %c0_68 = arith.constant 0 : index
    %91 = vector.load %arg10[%c1_66, %c0_67, %c0_68] : memref<3x90x112xf32, #tpu.memory_space<vmem>>, vector<1x90x112xf32>
    %92 = vector.shape_cast %91 : vector<1x90x112xf32> to vector<90x112xf32>
    %cst_69 = arith.constant dense<0.000000e+00> : vector<7x112xf32>
    %93 = tpu.matmul %90, %92, %cst_69 {dimension_numbers = #tpu.dot_dimension_numbers<[1], [0], [0], [1], [0, 0, 1, 1], [], []>} : vector<7x90xf32>, vector<90x112xf32>, vector<7x112xf32> -> vector<7x112xf32>
    %94 = arith.addf %89, %93 : vector<7x112xf32>
    %95 = vector.extract_strided_slice %85 {offsets = [2, 0], sizes = [7, 90], strides = [1, 1]} : vector<9x90xf32> to vector<7x90xf32>
    %c2_70 = arith.constant 2 : index
    %c0_71 = arith.constant 0 : index
    %c0_72 = arith.constant 0 : index
    %96 = vector.load %arg10[%c2_70, %c0_71, %c0_72] : memref<3x90x112xf32, #tpu.memory_space<vmem>>, vector<1x90x112xf32>
    %97 = vector.shape_cast %96 : vector<1x90x112xf32> to vector<90x112xf32>
    %cst_73 = arith.constant dense<0.000000e+00> : vector<7x112xf32>
    %98 = tpu.matmul %95, %97, %cst_73 {dimension_numbers = #tpu.dot_dimension_numbers<[1], [0], [0], [1], [0, 0, 1, 1], [], []>} : vector<7x90xf32>, vector<90x112xf32>, vector<7x112xf32> -> vector<7x112xf32>
    %99 = arith.addf %94, %98 : vector<7x112xf32>
    %c0_74 = arith.constant 0 : index
    %c0_75 = arith.constant 0 : index
    %100 = vector.load %arg11[%c0_74, %c0_75] : memref<1x112xf32, #tpu.memory_space<vmem>>, vector<1x112xf32>
    %101 = vector.broadcast %100 : vector<1x112xf32> to vector<7x112xf32>
    %102 = arith.addf %99, %101 : vector<7x112xf32>
    %cst_76 = arith.constant 0.000000e+00 : f32
    %103 = vector.broadcast %cst_76 : f32 to vector<7x112xf32>
    %104 = arith.maximumf %102, %103 : vector<7x112xf32>
    %105 = vector.extract_strided_slice %104 {offsets = [0, 0], sizes = [5, 112], strides = [1, 1]} : vector<7x112xf32> to vector<5x112xf32>
    %c0_77 = arith.constant 0 : index
    %c0_78 = arith.constant 0 : index
    %c0_79 = arith.constant 0 : index
    %106 = vector.load %arg12[%c0_77, %c0_78, %c0_79] : memref<3x112x80xf32, #tpu.memory_space<vmem>>, vector<1x112x80xf32>
    %107 = vector.shape_cast %106 : vector<1x112x80xf32> to vector<112x80xf32>
    %cst_80 = arith.constant dense<0.000000e+00> : vector<5x80xf32>
    %108 = tpu.matmul %105, %107, %cst_80 {dimension_numbers = #tpu.dot_dimension_numbers<[1], [0], [0], [1], [0, 0, 1, 1], [], []>} : vector<5x112xf32>, vector<112x80xf32>, vector<5x80xf32> -> vector<5x80xf32>
    %109 = vector.extract_strided_slice %104 {offsets = [1, 0], sizes = [5, 112], strides = [1, 1]} : vector<7x112xf32> to vector<5x112xf32>
    %c1_81 = arith.constant 1 : index
    %c0_82 = arith.constant 0 : index
    %c0_83 = arith.constant 0 : index
    %110 = vector.load %arg12[%c1_81, %c0_82, %c0_83] : memref<3x112x80xf32, #tpu.memory_space<vmem>>, vector<1x112x80xf32>
    %111 = vector.shape_cast %110 : vector<1x112x80xf32> to vector<112x80xf32>
    %cst_84 = arith.constant dense<0.000000e+00> : vector<5x80xf32>
    %112 = tpu.matmul %109, %111, %cst_84 {dimension_numbers = #tpu.dot_dimension_numbers<[1], [0], [0], [1], [0, 0, 1, 1], [], []>} : vector<5x112xf32>, vector<112x80xf32>, vector<5x80xf32> -> vector<5x80xf32>
    %113 = arith.addf %108, %112 : vector<5x80xf32>
    %114 = vector.extract_strided_slice %104 {offsets = [2, 0], sizes = [5, 112], strides = [1, 1]} : vector<7x112xf32> to vector<5x112xf32>
    %c2_85 = arith.constant 2 : index
    %c0_86 = arith.constant 0 : index
    %c0_87 = arith.constant 0 : index
    %115 = vector.load %arg12[%c2_85, %c0_86, %c0_87] : memref<3x112x80xf32, #tpu.memory_space<vmem>>, vector<1x112x80xf32>
    %116 = vector.shape_cast %115 : vector<1x112x80xf32> to vector<112x80xf32>
    %cst_88 = arith.constant dense<0.000000e+00> : vector<5x80xf32>
    %117 = tpu.matmul %114, %116, %cst_88 {dimension_numbers = #tpu.dot_dimension_numbers<[1], [0], [0], [1], [0, 0, 1, 1], [], []>} : vector<5x112xf32>, vector<112x80xf32>, vector<5x80xf32> -> vector<5x80xf32>
    %118 = arith.addf %113, %117 : vector<5x80xf32>
    %c0_89 = arith.constant 0 : index
    %c0_90 = arith.constant 0 : index
    %119 = vector.load %arg13[%c0_89, %c0_90] : memref<1x80xf32, #tpu.memory_space<vmem>>, vector<1x80xf32>
    %120 = vector.broadcast %119 : vector<1x80xf32> to vector<5x80xf32>
    %121 = arith.addf %118, %120 : vector<5x80xf32>
    %cst_91 = arith.constant 0.000000e+00 : f32
    %122 = vector.broadcast %cst_91 : f32 to vector<5x80xf32>
    %123 = arith.maximumf %121, %122 : vector<5x80xf32>
    %124 = vector.extract_strided_slice %123 {offsets = [0, 0], sizes = [3, 80], strides = [1, 1]} : vector<5x80xf32> to vector<3x80xf32>
    %c0_92 = arith.constant 0 : index
    %c0_93 = arith.constant 0 : index
    %c0_94 = arith.constant 0 : index
    %125 = vector.load %arg14[%c0_92, %c0_93, %c0_94] : memref<3x80x48xf32, #tpu.memory_space<vmem>>, vector<1x80x48xf32>
    %126 = vector.shape_cast %125 : vector<1x80x48xf32> to vector<80x48xf32>
    %cst_95 = arith.constant dense<0.000000e+00> : vector<3x48xf32>
    %127 = tpu.matmul %124, %126, %cst_95 {dimension_numbers = #tpu.dot_dimension_numbers<[1], [0], [0], [1], [0, 0, 1, 1], [], []>} : vector<3x80xf32>, vector<80x48xf32>, vector<3x48xf32> -> vector<3x48xf32>
    %128 = vector.extract_strided_slice %123 {offsets = [1, 0], sizes = [3, 80], strides = [1, 1]} : vector<5x80xf32> to vector<3x80xf32>
    %c1_96 = arith.constant 1 : index
    %c0_97 = arith.constant 0 : index
    %c0_98 = arith.constant 0 : index
    %129 = vector.load %arg14[%c1_96, %c0_97, %c0_98] : memref<3x80x48xf32, #tpu.memory_space<vmem>>, vector<1x80x48xf32>
    %130 = vector.shape_cast %129 : vector<1x80x48xf32> to vector<80x48xf32>
    %cst_99 = arith.constant dense<0.000000e+00> : vector<3x48xf32>
    %131 = tpu.matmul %128, %130, %cst_99 {dimension_numbers = #tpu.dot_dimension_numbers<[1], [0], [0], [1], [0, 0, 1, 1], [], []>} : vector<3x80xf32>, vector<80x48xf32>, vector<3x48xf32> -> vector<3x48xf32>
    %132 = arith.addf %127, %131 : vector<3x48xf32>
    %133 = vector.extract_strided_slice %123 {offsets = [2, 0], sizes = [3, 80], strides = [1, 1]} : vector<5x80xf32> to vector<3x80xf32>
    %c2_100 = arith.constant 2 : index
    %c0_101 = arith.constant 0 : index
    %c0_102 = arith.constant 0 : index
    %134 = vector.load %arg14[%c2_100, %c0_101, %c0_102] : memref<3x80x48xf32, #tpu.memory_space<vmem>>, vector<1x80x48xf32>
    %135 = vector.shape_cast %134 : vector<1x80x48xf32> to vector<80x48xf32>
    %cst_103 = arith.constant dense<0.000000e+00> : vector<3x48xf32>
    %136 = tpu.matmul %133, %135, %cst_103 {dimension_numbers = #tpu.dot_dimension_numbers<[1], [0], [0], [1], [0, 0, 1, 1], [], []>} : vector<3x80xf32>, vector<80x48xf32>, vector<3x48xf32> -> vector<3x48xf32>
    %137 = arith.addf %132, %136 : vector<3x48xf32>
    %c0_104 = arith.constant 0 : index
    %c0_105 = arith.constant 0 : index
    %138 = vector.load %arg15[%c0_104, %c0_105] : memref<1x48xf32, #tpu.memory_space<vmem>>, vector<1x48xf32>
    %139 = vector.broadcast %138 : vector<1x48xf32> to vector<3x48xf32>
    %140 = arith.addf %137, %139 : vector<3x48xf32>
    %cst_106 = arith.constant 0.000000e+00 : f32
    %141 = vector.broadcast %cst_106 : f32 to vector<3x48xf32>
    %142 = arith.maximumf %140, %141 : vector<3x48xf32>
    %143 = vector.extract_strided_slice %142 {offsets = [0, 0], sizes = [1, 48], strides = [1, 1]} : vector<3x48xf32> to vector<1x48xf32>
    %144 = vector.extract_strided_slice %142 {offsets = [1, 0], sizes = [1, 48], strides = [1, 1]} : vector<3x48xf32> to vector<1x48xf32>
    %145 = arith.addf %143, %144 : vector<1x48xf32>
    %146 = vector.extract_strided_slice %142 {offsets = [2, 0], sizes = [1, 48], strides = [1, 1]} : vector<3x48xf32> to vector<1x48xf32>
    %147 = arith.addf %145, %146 : vector<1x48xf32>
    %148 = vector.extract_strided_slice %147 {offsets = [0, 0], sizes = [1, 16], strides = [1, 1]} : vector<1x48xf32> to vector<1x16xf32>
    %149 = vector.extract_strided_slice %147 {offsets = [0, 16], sizes = [1, 16], strides = [1, 1]} : vector<1x48xf32> to vector<1x16xf32>
    %150 = arith.addf %148, %149 : vector<1x16xf32>
    %151 = vector.extract_strided_slice %147 {offsets = [0, 32], sizes = [1, 16], strides = [1, 1]} : vector<1x48xf32> to vector<1x16xf32>
    %152 = arith.addf %150, %151 : vector<1x16xf32>
    %cst_107 = arith.constant 0.111111112 : f32
    %153 = vector.broadcast %cst_107 : f32 to vector<1x16xf32>
    %154 = arith.mulf %152, %153 : vector<1x16xf32>
    %c0_108 = arith.constant 0 : index
    %c0_109 = arith.constant 0 : index
    %155 = vector.load %arg16[%c0_108, %c0_109] : memref<16x10xf32, #tpu.memory_space<vmem>>, vector<16x10xf32>
    %cst_110 = arith.constant dense<0.000000e+00> : vector<1x10xf32>
    %156 = tpu.matmul %154, %155, %cst_110 {dimension_numbers = #tpu.dot_dimension_numbers<[1], [0], [0], [1], [0, 0, 1, 1], [], []>} : vector<1x16xf32>, vector<16x10xf32>, vector<1x10xf32> -> vector<1x10xf32>
    %cst_111 = arith.constant dense<0xFF800000> : vector<1xf32>
    %157 = vector.multi_reduction <maximumf>, %156, %cst_111 [1] : vector<1x10xf32> to vector<1xf32>
    %158 = vector.shape_cast %157 : vector<1xf32> to vector<1x1xf32>
    %159 = vector.broadcast %158 : vector<1x1xf32> to vector<1x10xf32>
    %160 = arith.subf %156, %159 : vector<1x10xf32>
    %161 = math.exp %160 : vector<1x10xf32>
    %cst_112 = arith.constant dense<0.000000e+00> : vector<1xf32>
    %162 = vector.multi_reduction <add>, %161, %cst_112 [1] : vector<1x10xf32> to vector<1xf32>
    %163 = vector.shape_cast %162 : vector<1xf32> to vector<1x1xf32>
    %164 = math.log %163 : vector<1x1xf32>
    %165 = vector.broadcast %164 : vector<1x1xf32> to vector<1x10xf32>
    %166 = arith.subf %160, %165 : vector<1x10xf32>
    %c0_113 = arith.constant 0 : index
    %c0_114 = arith.constant 0 : index
    %c0_115 = arith.constant 0 : index
    %167 = vector.load %arg18[%c0_113, %c0_114, %c0_115] : memref<1x1x10xf32, #tpu.memory_space<vmem>>, vector<1x1x10xf32>
    %168 = vector.shape_cast %167 : vector<1x1x10xf32> to vector<1x10xf32>
    %169 = vector.shape_cast %166 : vector<1x10xf32> to vector<1x1x10xf32>
    tpu.vector_store %arg18[%c0_113, %c0_114, %c0_115], %169 {strides = array<i32>} : memref<1x1x10xf32, #tpu.memory_space<vmem>>, vector<1x1x10xf32>,
    return
  }
  func.func @transform_0(%arg0: i32) -> (i32, i32, i32) {
    %c0_i32 = arith.constant 0 : i32
    %c0_i32_0 = arith.constant 0 : i32
    %c0_i32_1 = arith.constant 0 : i32
    return %arg0, %c0_i32, %c0_i32_0 : i32, i32, i32
  }
  func.func @transform_1(%arg0: i32) -> (i32, i32, i32) {
    %c0_i32 = arith.constant 0 : i32
    %c0_i32_0 = arith.constant 0 : i32
    %c0_i32_1 = arith.constant 0 : i32
    %c0_i32_2 = arith.constant 0 : i32
    return %c0_i32, %c0_i32_0, %c0_i32_1 : i32, i32, i32
  }
  func.func @transform_2(%arg0: i32) -> (i32, i32) {
    %c0_i32 = arith.constant 0 : i32
    %c0_i32_0 = arith.constant 0 : i32
    %c0_i32_1 = arith.constant 0 : i32
    return %c0_i32, %c0_i32_0 : i32, i32
  }
  func.func @transform_3(%arg0: i32) -> (i32, i32, i32) {
    %c0_i32 = arith.constant 0 : i32
    %c0_i32_0 = arith.constant 0 : i32
    %c0_i32_1 = arith.constant 0 : i32
    %c0_i32_2 = arith.constant 0 : i32
    return %c0_i32, %c0_i32_0, %c0_i32_1 : i32, i32, i32
  }
  func.func @transform_4(%arg0: i32) -> (i32, i32) {
    %c0_i32 = arith.constant 0 : i32
    %c0_i32_0 = arith.constant 0 : i32
    %c0_i32_1 = arith.constant 0 : i32
    return %c0_i32, %c0_i32_0 : i32, i32
  }
  func.func @transform_5(%arg0: i32) -> (i32, i32, i32) {
    %c0_i32 = arith.constant 0 : i32
    %c0_i32_0 = arith.constant 0 : i32
    %c0_i32_1 = arith.constant 0 : i32
    %c0_i32_2 = arith.constant 0 : i32
    return %c0_i32, %c0_i32_0, %c0_i32_1 : i32, i32, i32
  }
  func.func @transform_6(%arg0: i32) -> (i32, i32) {
    %c0_i32 = arith.constant 0 : i32
    %c0_i32_0 = arith.constant 0 : i32
    %c0_i32_1 = arith.constant 0 : i32
    return %c0_i32, %c0_i32_0 : i32, i32
  }
  func.func @transform_7(%arg0: i32) -> (i32, i32, i32) {
    %c0_i32 = arith.constant 0 : i32
    %c0_i32_0 = arith.constant 0 : i32
    %c0_i32_1 = arith.constant 0 : i32
    %c0_i32_2 = arith.constant 0 : i32
    return %c0_i32, %c0_i32_0, %c0_i32_1 : i32, i32, i32
  }
  func.func @transform_8(%arg0: i32) -> (i32, i32) {
    %c0_i32 = arith.constant 0 : i32
    %c0_i32_0 = arith.constant 0 : i32
    %c0_i32_1 = arith.constant 0 : i32
    return %c0_i32, %c0_i32_0 : i32, i32
  }
  func.func @transform_9(%arg0: i32) -> (i32, i32, i32) {
    %c0_i32 = arith.constant 0 : i32
    %c0_i32_0 = arith.constant 0 : i32
    %c0_i32_1 = arith.constant 0 : i32
    %c0_i32_2 = arith.constant 0 : i32
    return %c0_i32, %c0_i32_0, %c0_i32_1 : i32, i32, i32
  }
  func.func @transform_10(%arg0: i32) -> (i32, i32) {
    %c0_i32 = arith.constant 0 : i32
    %c0_i32_0 = arith.constant 0 : i32
    %c0_i32_1 = arith.constant 0 : i32
    return %c0_i32, %c0_i32_0 : i32, i32
  }
  func.func @transform_11(%arg0: i32) -> (i32, i32, i32) {
    %c0_i32 = arith.constant 0 : i32
    %c0_i32_0 = arith.constant 0 : i32
    %c0_i32_1 = arith.constant 0 : i32
    %c0_i32_2 = arith.constant 0 : i32
    return %c0_i32, %c0_i32_0, %c0_i32_1 : i32, i32, i32
  }
  func.func @transform_12(%arg0: i32) -> (i32, i32) {
    %c0_i32 = arith.constant 0 : i32
    %c0_i32_0 = arith.constant 0 : i32
    %c0_i32_1 = arith.constant 0 : i32
    return %c0_i32, %c0_i32_0 : i32, i32
  }
  func.func @transform_13(%arg0: i32) -> (i32, i32, i32) {
    %c0_i32 = arith.constant 0 : i32
    %c0_i32_0 = arith.constant 0 : i32
    %c0_i32_1 = arith.constant 0 : i32
    %c0_i32_2 = arith.constant 0 : i32
    return %c0_i32, %c0_i32_0, %c0_i32_1 : i32, i32, i32
  }
  func.func @transform_14(%arg0: i32) -> (i32, i32) {
    %c0_i32 = arith.constant 0 : i32
    %c0_i32_0 = arith.constant 0 : i32
    %c0_i32_1 = arith.constant 0 : i32
    return %c0_i32, %c0_i32_0 : i32, i32
  }
  func.func @transform_15(%arg0: i32) -> (i32, i32) {
    %c0_i32 = arith.constant 0 : i32
    %c0_i32_0 = arith.constant 0 : i32
    %c0_i32_1 = arith.constant 0 : i32
    return %c0_i32, %c0_i32_0 : i32, i32
  }
  func.func @transform_16(%arg0: i32) -> (i32, i32) {
    %c0_i32 = arith.constant 0 : i32
    %c0_i32_0 = arith.constant 0 : i32
    %c0_i32_1 = arith.constant 0 : i32
    return %c0_i32, %c0_i32_0 : i32, i32
  }
  func.func @transform_17(%arg0: i32) -> (i32, i32, i32) {
    %c0_i32 = arith.constant 0 : i32
    %c0_i32_0 = arith.constant 0 : i32
    %c0_i32_1 = arith.constant 0 : i32
    return %arg0, %c0_i32, %c0_i32_0 : i32, i32, i32
  }
}

</mosaic_0001>

<bundles_post_ra>
// kernel: net_forward.1
= control target key start
LH: loop header
LB: loop body
LE: loop exit
PB: predicated region body
PF: predicated region fallthrough
CT: control target
= control target key end

     0   :  { %s8417_s0 = inlined_call_operand.vmem [shape: f32[2,28,28], index: 0, kind: input, shape index: {}]   ;;  %s8418_s1 = inlined_call_operand.vmem [shape: f32[3,28,260], index: 1, kind: input, shape index: {}]   ;;  %s8419_s2 = inlined_call_operand.vmem [shape: f32[1,260], index: 2, kind: input, shape index: {}]   ;;  %s8420_s3 = inlined_call_operand.vmem [shape: f32[3,260,240], index: 3, kind: input, shape index: {}]   ;;  %s8421_s4 = inlined_call_operand.vmem [shape: f32[1,240], index: 4, kind: input, shape index: {}]   ;;  %s8422_s5 = inlined_call_operand.vmem [shape: f32[3,240,352], index: 5, kind: input, shape index: {}]   ;;  %s8423_s6 = inlined_call_operand.vmem [shape: f32[1,352], index: 6, kind: input, shape index: {}]   ;;  %s8424_s7 = inlined_call_operand.vmem [shape: f32[3,176,90], index: 7, kind: input, shape index: {}]   ;;  %s8425_s8 = inlined_call_operand.vmem [shape: f32[1,90], index: 8, kind: input, shape index: {}]   ;;  %s8426_s9 = inlined_call_operand.vmem [shape: f32[3,90,112], index: 9, kind: input, shape index: {}]   ;;  %s8427_s10 = inlined_call_operand.vmem [shape: f32[1,112], index: 10, kind: input, shape index: {}]   ;;  %s8428_s11 = inlined_call_operand.vmem [shape: f32[3,112,80], index: 11, kind: input, shape index: {}]   ;;  %s8429_s12 = inlined_call_operand.vmem [shape: f32[1,80], index: 12, kind: input, shape index: {}]   ;;  %s8430_s13 = inlined_call_operand.vmem [shape: f32[3,80,48], index: 13, kind: input, shape index: {}]   ;;  %s8431_s14 = inlined_call_operand.vmem [shape: f32[1,48], index: 14, kind: input, shape index: {}]   ;;  %s8432_s15 = inlined_call_operand.vmem [shape: f32[16,10], index: 15, kind: input, shape index: {}]   ;;  %s8433_s16 = inlined_call_operand.vmem [shape: f32[11,21], index: 16, kind: input, shape index: {}]   ;;  %s8434_s17 = inlined_call_operand.hbm [shape: f32[2,1,10], index: 17, kind: output, shape index: {}]  }
   0x1   :  { %8445 = sst [smem:[#allocation12_spill]] %s8417_s0 }
   0x2   :  { %8446 = sst [smem:[#allocation13_spill]] %s8418_s1 }
   0x3   :  { %8447 = sst [smem:[#allocation14_spill]] %s8419_s2 }
   0x4   :  { %8448 = sst [smem:[#allocation15_spill]] %s8434_s17 }
   0x5   :  { %22 = vsyncpa [#allocation3], 0 }
   0x6   :  { %24 = vsyncpa [#allocation3 + $0x1], 0  ;;  %s5604_s24 = smov 0   ;;  %s5606_s25 = smov 0  }
   0x7   :  { %s5608_s26 = smov 0   ;;  %s5610_s27 = smov 0  }
   0x8 LB: > { %8449 = sst [smem:[#allocation5_spill]] %s5494_s24  ;;  %s5625_s28 = sadd.s32 4294967295, %s5506_s27   ;;  %s5506_s27 = sphi %s5610_s27, %s8466_s27   ;;  %s5502_s26 = sphi %s5608_s26, %s8468_s26   ;;  %s5498_s25 = sphi %s5606_s25, %s8470_s25   ;;  %s5494_s24 = sphi %s5604_s24, %s8469_s24  }
   0x9   : > { %8450 = sst [smem:[#allocation6_spill]] %s5502_s26  ;;  %s4407_s29 = sadd.s32 4294967294, %s5506_s27  }
   0xa   : > { %8451 = sst [smem:[#allocation7_spill]] %s5506_s27  ;;  %s5629_s0 = sadd.s32 1, %s5506_s27  }
   0xb   : > { %8452 = sst [smem:[#allocation8_spill]] %s5629_s0  ;;  %s399_s30 = sadd.s32 1, %s5502_s26 }
   0xc   : > { %s396_s18 = ssub.s32 %s5506_s27, %s5629_s0  ;;  %p409_p0 = scmp.ne.s32.totalorder %s5502_s26, %s5498_s25 }
   0xd   : > { %p397_p1 = scmp.eq.s32.totalorder %s396_s18, 0  ;;  %p410_p2 = scmp.eq.s32.totalorder %s5625_s28, 1 }
   0xe   : > { %p415_p3 = scmp.ne.s32.totalorder %s5498_s25, %s5494_s24  ;;  %p416_p4 = scmp.eq.s32.totalorder %s4407_s29, 1 }
   0xf   : > { %s5640_s19 = scalar_select %p397_p1, %s5502_s26, %s399_s30  }
  0x10   : > { %p5642_p5 = por %p410_p2, %p409_p0  ;;  %p5646_p6 = por %p416_p4, %p415_p3 }
  0x11   : > { %8453 = sst [smem:[#allocation9_spill]] %s5640_s19  ;;  %p4410_p7 = scmp.ge.s32.totalorder %s5506_s27, 1 }
  0x12   : > { %s8454_s1 = scalar_select %p5642_p5, 1, 0 }
  0x13   : > { %s8456_s20 = scalar_select %p5646_p6, 1, 0 }
  0x14   : > { %8455 = sst [smem:[#allocation10_spill]] %s8454_s1  ;;  %p490_p8 = scmp.lt.s32.totalorder %s5506_s27, 3 }
  0x15   : > { %8457 = sst [smem:[#allocation11_spill]] %s8456_s20 }
  0x16   : > { %p491_p9 = pnand %p4410_p7, %p490_p8 }
  0x17   : > { %s8458_s23 = sld [smem:[#allocation13_spill]] (!%p491_p9)  ;;  %p541_p10 = scmp.lt.s32.totalorder (!%p491_p9), %s5625_s28, 1 }
  0x18   : > { %494 = sbr.rel (%p491_p9) target bundleno = 2851 (0xb23), region = 88  ;;  %s8459_s27 = sld [smem:[#allocation12_spill]] (!%p491_p9) }
  0x19   : > { %s8460_s2 = sld [smem:[#allocation14_spill]] (!%p491_p9)  ;;  %s5511_s1 = smov (!%p491_p9), 96  }
  0x1a   : > { %s4958_s22 = sshll.u32 (!%p491_p9), %s5625_s28, 4  ;;  %s8462_s20 = sld [smem:[#allocation15_spill]] (!%p491_p9) }
  0x1d   : > { %v4423_v0 = vld [vmem:[%s8458_s23 + $0xb0] sm:$0xf]  ;;  %vm596_vm0 = vcmask 1043456   ;;  %v4422_v1 = vld [vmem:[%s8458_s23 + $0xa8] sm:$0xf]  ;;  %v4420_v2 = vld [vmem:[%s8458_s23 + $0x98] sm:$0xff] }
  0x1e   : > { %4425 = vmatprep.subr.msk.mxu0 %vm596_vm0, %v4423_v0  ;;  %v4424_v3 = vld [vmem:[%s8458_s23 + $0xb8] sm:$0xf]  ;;  %v4419_v4 = vld [vmem:[%s8458_s23 + $0x90] sm:$0xff]  ;;  %v4421_v5 = vld [vmem:[%s8458_s23 + $0xa0] sm:$0xff]  ;;  %s542_s24 = scalar_select %p541_p10, %s5625_s28, 1  ;;  %vm579_vm1 = vcmask 1046528  }
  0x1f   : > { %4426 = vmatpush1.msk.msra.mxu0 %vm596_vm0, %v4422_v1  ;;  %5106 = vmatprep.subr.msk.mxu1 %vm596_vm0, %v4424_v3  ;;  %v4417_v6 = vld [vmem:[%s8458_s23 + $0x80] sm:$0xff]  ;;  %v4416_v7 = vld [vmem:[%s8458_s23 + $0x78] sm:$0xff]  ;;  %v4418_v8 = vld [vmem:[%s8458_s23 + $0x88] sm:$0xff]  ;;  %v5508_v16 = vmov 0.0   ;;  %vm587_vm2 = vcmask 228352   ;;  %vm984_vm3 = vcmask 1045504  }
  0x20   : > { %632 = vmatprep.subr.mxu0 %v4420_v2  ;;  %5107 = vmatpush3.msk.msra.mxu1 %vm596_vm0, %v4424_v3  ;;  %v4414_v9 = vld [vmem:[%s8458_s23 + $0x68] sm:$0xff]  ;;  %v4413_v10 = vld [vmem:[%s8458_s23 + $0x60] sm:$0xff]  ;;  %s4961_s29 = sshll.u32 %s542_s24, 5  ;;  %v4415_v11 = vld [vmem:[%s8458_s23 + $0x70] sm:$0xff]  ;;  %vm1408_vm4 = vcmask 31744   ;;  %vm2267_vm5 = vcmask 916480   ;;  %s4350_s30 = scalar_lea.hbm %s8462_s20, %s4958_s22 }
  0x21   : > { %633 = vmatpush1.msra.mxu0 %v4419_v4  ;;  %5108 = vmatprep.subr.mxu1 %v4421_v5  ;;  %s545_s17 = scalar_lea.vmem %s8459_s27, %s4961_s29  ;;  %v561_v12 = vld [vmem:[%s8458_s23 + $0x58] sm:$0xf]  ;;  %v560_v21 = vld [vmem:[%s8458_s23 + $0x50] sm:$0xf]  ;;  %v559_v25 = vld [vmem:[%s8458_s23 + $0x48] sm:$0xf] }
  0x22   : > { %634 = vmatprep.subr.mxu0 %v4417_v6  ;;  %5109 = vmatpush3.msra.mxu1 %v4421_v5  ;;  %v5700_v13 = vld [vmem:[%s545_s17] sm:$0xff]  ;;  %v5702_v14 = vld [vmem:[%s545_s17 + $0x8] sm:$0xff]  ;;  %v5704_v15 = vld [vmem:[%s545_s17 + $0x10] sm:$0xff]  ;;  %s5509_s27 = smov 80   ;;  %vm2941_vm6 = vcmask 654336   ;;  %vm2994_vm7 = vcmask 1044480  }
  0x23   : > { %635 = vmatpush1.msra.mxu0 %v4416_v7  ;;  %5110 = vmatprep.subr.mxu1 %v4418_v8  ;;  %v580_v17 = vrot.slane %v5700_v13, 1  ;;  %v581_v18 = vrot.slane %v5702_v14, 1  ;;  %v583_v19 = vrot.slane %v5704_v15, 1  ;;  %v5710_v20 = vld [vmem:[%s545_s17 + $0x18] sm:$0xf]  ;;  %v556_v28 = vld [vmem:[%s8458_s23 + $0x30] sm:$0xff] }
  0x24   : > { %636 = vmatprep.subr.mxu0 %v4414_v9  ;;  %5111 = vmatpush3.msra.mxu1 %v4418_v8  ;;  %v585_v22 = vrot.slane %v5710_v20, 1  ;;  %v557_v26 = vld [vmem:[%s8458_s23 + $0x38] sm:$0xff]  ;;  %v554_v29 = vld [vmem:[%s8458_s23 + $0x20] sm:$0xff]  ;;  %v551_v31 = vld [vmem:[%s8458_s23 + $0x8] sm:$0xff]  ;;  %v985_v44 = vrot.slane %v5700_v13, 2  ;;  %v986_v45 = vrot.slane %v5702_v14, 2 }
  0x25   : > { %637 = vmatpush1.msra.mxu0 %v4413_v10  ;;  %670 = vmatprep.mubr.f32.mxu0 %v5508_v16  ;;  %v582_v23 = vsel %vm579_vm1, %v580_v17, %v581_v18  ;;  %v584_v24 = vsel %vm579_vm1, %v581_v18, %v583_v19  ;;  %v553_v30 = vld [vmem:[%s8458_s23 + $0x18] sm:$0xff]  ;;  %v550_v32 = vld [vmem:[%s8458_s23] sm:$0xff]  ;;  %v555_v34 = vld [vmem:[%s8458_s23 + $0x28] sm:$0xff]  ;;  %v988_v49 = vrot.slane %v5704_v15, 2  ;;  %v990_v51 = vrot.slane %v5710_v20, 2  ;;  %s5512_s24 = smov 112  }
  0x26   : > { %5112 = vmatprep.subr.mxu1 %v4415_v11  ;;  %5120 = vmatprep.subr.msk.mxu0 %vm596_vm0, %v561_v12  ;;  %v586_v27 = vsel %vm579_vm1, %v583_v19, %v585_v22  ;;  %v558_v33 = vld [vmem:[%s8458_s23 + $0x40] sm:$0xff]  ;;  %v552_v35 = vld [vmem:[%s8458_s23 + $0x10] sm:$0xff]  ;;  %v4458_v36 = vld [vmem:[%s8458_s23 + $0x118] sm:$0xf]  ;;  %v987_v52 = vsel %vm984_vm3, %v985_v44, %v986_v45  ;;  %vm2987_vm8 = vcmask 171008   ;;  %vm3135_vm9 = vcmask 392192  }
  0x27   : > { %5113 = vmatpush3.msra.mxu1 %v4415_v11  ;;  %4427 = vmatmul.mubr.msk.f32.vlgmr.msra.gmra.mxu0 %vm587_vm2, %v582_v23  ;;  %v4457_v37 = vld [vmem:[%s8458_s23 + $0x110] sm:$0xf]  ;;  %v4456_v38 = vld [vmem:[%s8458_s23 + $0x108] sm:$0xf]  ;;  %v4454_v39 = vld [vmem:[%s8458_s23 + $0xf8] sm:$0xff]  ;;  %v989_v53 = vsel %vm984_vm3, %v986_v45, %v988_v49  ;;  %v991_v55 = vsel %vm984_vm3, %v988_v49, %v990_v51  ;;  %vm3447_vm10 = vcmask 1041408  }
  0x28   : > { %5114 = vmatprep.mubr.msk.f32.mxu1 %vm587_vm2, %v582_v23  ;;  %4436 = vmatprep.subr.msk.mxu1 %vm596_vm0, %v560_v21  ;;  %v4455_v40 = vld [vmem:[%s8458_s23 + $0x100] sm:$0xff]  ;;  %v4453_v41 = vld [vmem:[%s8458_s23 + $0xf0] sm:$0xff]  ;;  %v4450_v43 = vld [vmem:[%s8458_s23 + $0xd8] sm:$0xff]  ;;  %vm5510_vm11 = vmmov 0   ;;  %vm3444_vm12 = vcmask 736256   ;;  %vm4251_vm13 = vcmask 130048  }
  0x29   : > { %5115 = vmatmul.mubr.msk.f32.vlgmr.msra.gmra.mxu1 %vm587_vm2, %v584_v24  ;;  %676 = vmatprep.mubr.f32.mxu0 %v5508_v16  ;;  %v4451_v42 = vld [vmem:[%s8458_s23 + $0xe0] sm:$0xff]  ;;  %v4452_v46 = vld [vmem:[%s8458_s23 + $0xe8] sm:$0xff]  ;;  %v4449_v50 = vld [vmem:[%s8458_s23 + $0xd0] sm:$0xff]  ;;  %vm4325_vm14 = vcmask 73728   ;;  %s539_s17 = sand.u32 1, %s5498_s25  }
  0x2a   : > { %4437 = vmatpush1.msk.msra.mxu1 %vm596_vm0, %v559_v25  ;;  %5117 = vmatprep.mubr.msk.f32.mxu1 %vm587_vm2, %v586_v27  ;;  %v4448_v47 = vld [vmem:[%s8458_s23 + $0xc8] sm:$0xff]  ;;  %v4447_v48 = vld [vmem:[%s8458_s23 + $0xc0] sm:$0xff]  ;;  %v4499_v57 = vld [vmem:[%s8420_s3 + $0x2f8] sm:$0xff]  ;;  %s540_s19 = scalar_lea.vmem [#allocation2], %s539_s17  ;;  %s4340_s18 = scalar_lea.sflag [#allocation3], %s539_s17 }
  0x2b   : > { %823 = vmatprep.subr.mxu1 %v557_v26  ;;  %4428 = vmatmul.mubr.msk.f32.gmra.mxu0 %vm587_vm2, %v584_v24  ;;  %v4501_v54 = vld [vmem:[%s8420_s3 + $0x308] sm:$0xff]  ;;  %v4500_v56 = vld [vmem:[%s8420_s3 + $0x300] sm:$0xff]  ;;  %v4498_v58 = vld [vmem:[%s8420_s3 + $0x2f0] sm:$0xff]  ;;  %s4352_s29 = sshll.u32 %s540_s19, 4  ;;  %s4353_s29 = int_to_ptr.vmem [resolvable:$true] %s4352_s29 }
  0x2c   : > { %824 = vmatpush1.msra.mxu1 %v556_v28  ;;  %682 = vmatprep.mubr.f32.mxu0 %v5508_v16  ;;  %v4497_v59 = vld [vmem:[%s8420_s3 + $0x2e8] sm:$0xff]  ;;  %v4496_v60 = vld [vmem:[%s8420_s3 + $0x2e0] sm:$0xff]  ;;  %v4495_v61 = vld [vmem:[%s8420_s3 + $0x2d8] sm:$0xff] }
  0x2d   : > { %5118 = vmatmul.mubr.msk.f32.gmra.mxu1 %vm587_vm2, %v585_v22  ;;  %825 = vmatprep.subr.mxu1 %v554_v29  ;;  %v4494_v62 = vld [vmem:[%s8420_s3 + $0x2d0] sm:$0xff]  ;;  %v4493_v63 = vld [vmem:[%s8420_s3 + $0x2c8] sm:$0xff]  ;;  %v4492_v0 = vld [vmem:[%s8420_s3 + $0x2c0] sm:$0xff] }
  0x2e   : > { %826 = vmatpush1.msra.mxu1 %v553_v30  ;;  %861 = vmatprep.mubr.f32.mxu1 %v5508_v16  ;;  %v4491_v1 = vld [vmem:[%s8420_s3 + $0x2b8] sm:$0xff]  ;;  %v4490_v2 = vld [vmem:[%s8420_s3 + $0x2b0] sm:$0xff]  ;;  %v4489_v3 = vld [vmem:[%s8420_s3 + $0x2a8] sm:$0xff] }
  0x2f   : > { %827 = vmatprep.subr.mxu1 %v551_v31  ;;  %4429 = vmatmul.mubr.msk.f32.gmra.mxu0 %vm587_vm2, %v586_v27  ;;  %v4488_v4 = vld [vmem:[%s8420_s3 + $0x2a0] sm:$0xff]  ;;  %v4487_v5 = vld [vmem:[%s8420_s3 + $0x298] sm:$0xff]  ;;  %v4486_v6 = vld [vmem:[%s8420_s3 + $0x290] sm:$0xff] }
  0x30   : > { %828 = vmatpush1.msra.mxu1 %v550_v32  ;;  %5121 = vmatpush3.msk.msra.mxu0 %vm596_vm0, %v561_v12  ;;  %v4485_v7 = vld [vmem:[%s8420_s3 + $0x288] sm:$0xff]  ;;  %v4484_v8 = vld [vmem:[%s8420_s3 + $0x280] sm:$0xff]  ;;  %v4483_v9 = vld [vmem:[%s8420_s3 + $0x278] sm:$0xff] }
  0x31   : > { %4438 = vmatmul.mubr.msk.f32.vlgmr.msra.gmra.mxu1 %vm587_vm2, %v5700_v13  ;;  %5122 = vmatprep.subr.mxu0 %v558_v33  ;;  %v4482_v10 = vld [vmem:[%s8420_s3 + $0x270] sm:$0xff]  ;;  %v4481_v11 = vld [vmem:[%s8420_s3 + $0x268] sm:$0xff]  ;;  %v4480_v12 = vld [vmem:[%s8420_s3 + $0x260] sm:$0xff] }
  0x32   : > { %688 = vmatprep.mubr.f32.mxu0 %v5508_v16  ;;  %5123 = vmatpush3.msra.mxu0 %v558_v33  ;;  %v4476_v17 = vld [vmem:[%s8420_s3 + $0x240] sm:$0xff]  ;;  %v4475_v18 = vld [vmem:[%s8420_s3 + $0x238] sm:$0xff]  ;;  %v4474_v19 = vld [vmem:[%s8420_s3 + $0x230] sm:$0xff] }
  0x33   : > { %867 = vmatprep.mubr.f32.mxu1 %v5508_v16  ;;  %4430 = vmatmul.mubr.msk.f32.gmra.mxu0 %vm587_vm2, %v585_v22  ;;  %v4472_v21 = vld [vmem:[%s8420_s3 + $0x220] sm:$0xff]  ;;  %v4471_v22 = vld [vmem:[%s8420_s3 + $0x218] sm:$0xff]  ;;  %v4470_v23 = vld [vmem:[%s8420_s3 + $0x210] sm:$0xff] }
  0x34   : > { %5124 = vmatprep.subr.mxu0 %v555_v34  ;;  %5134 = vmatprep.subr.msk.mxu1 %vm596_vm0, %v4458_v36  ;;  %v4533_v24 = vld [vmem:[%s8420_s3 + $0x408] sm:$0xff]  ;;  %v4532_v25 = vld [vmem:[%s8420_s3 + $0x400] sm:$0xff]  ;;  %v4531_v26 = vld [vmem:[%s8420_s3 + $0x3f8] sm:$0xff] }
  0x35   : > { %4439 = vmatmul.mubr.msk.f32.gmra.mxu1 %vm587_vm2, %v5702_v14  ;;  %5125 = vmatpush3.msra.mxu0 %v555_v34  ;;  %v4530_v27 = vld [vmem:[%s8420_s3 + $0x3f0] sm:$0xff]  ;;  %v4529_v28 = vld [vmem:[%s8420_s3 + $0x3e8] sm:$0xff]  ;;  %v4528_v29 = vld [vmem:[%s8420_s3 + $0x3e0] sm:$0xff] }
  0x36   : > { %5126 = vmatprep.subr.mxu0 %v552_v35  ;;  %5128 = vmatprep.mubr.msk.f32.mxu0 %vm587_vm2, %v5700_v13  ;;  %v4479_v13 = vld [vmem:[%s8420_s3 + $0x258] sm:$0xff]  ;;  %v4526_v31 = vld [vmem:[%s8420_s3 + $0x3d0] sm:$0xff]  ;;  %v4525_v32 = vld [vmem:[%s8420_s3 + $0x3c8] sm:$0xff] }
  0x37   : > { %5127 = vmatpush3.msra.mxu0 %v552_v35  ;;  %5135 = vmatpush3.msk.msra.mxu1 %vm596_vm0, %v4458_v36  ;;  %v4527_v30 = vld [vmem:[%s8420_s3 + $0x3d8] sm:$0xff]  ;;  %v4524_v33 = vld [vmem:[%s8420_s3 + $0x3c0] sm:$0xff]  ;;  %v4522_v35 = vld [vmem:[%s8420_s3 + $0x3b0] sm:$0xff] }
  0x38   : > { %873 = vmatprep.mubr.f32.mxu1 %v5508_v16  ;;  %5129 = vmatmul.mubr.msk.f32.vlgmr.msra.gmra.mxu0 %vm587_vm2, %v5702_v14  ;;  %v4478_v14 = vld [vmem:[%s8420_s3 + $0x250] sm:$0xff]  ;;  %v4523_v34 = vld [vmem:[%s8420_s3 + $0x3b8] sm:$0xff]  ;;  %v4521_v36 = vld [vmem:[%s8420_s3 + $0x3a8] sm:$0xff] }
  0x39   : > { %4459 = vmatprep.subr.msk.mxu0 %vm596_vm0, %v4457_v37  ;;  %4440 = vmatmul.mubr.msk.f32.gmra.mxu1 %vm587_vm2, %v5704_v15  ;;  %v4520_v37 = vld [vmem:[%s8420_s3 + $0x3a0] sm:$0xff]  ;;  %v4513_v44 = vld [vmem:[%s8420_s3 + $0x368] sm:$0xff] }
  0x3a   : > { %4460 = vmatpush1.msk.msra.mxu0 %vm596_vm0, %v4456_v38  ;;  %5136 = vmatprep.subr.mxu1 %v4455_v40  ;;  %v4519_v38 = vld [vmem:[%s8420_s3 + $0x398] sm:$0xff]  ;;  %v4512_v45 = vld [vmem:[%s8420_s3 + $0x360] sm:$0xff] }
  0x3b   : > { %1035 = vmatprep.subr.mxu0 %v4454_v39  ;;  %5131 = vmatprep.mubr.msk.f32.mxu0 %vm587_vm2, %v5704_v15  ;;  %v4477_v15 = vld [vmem:[%s8420_s3 + $0x248] sm:$0xff]  ;;  %v4518_v39 = vld [vmem:[%s8420_s3 + $0x390] sm:$0xff]  ;;  %v4508_v49 = vld [vmem:[%s8420_s3 + $0x340] sm:$0xff] }
  0x3c   : > { %1036 = vmatpush1.msra.mxu0 %v4453_v41  ;;  %5137 = vmatpush3.msra.mxu1 %v4455_v40  ;;  %v4517_v40 = vld [vmem:[%s8420_s3 + $0x388] sm:$0xff]  ;;  %v4516_v41 = vld [vmem:[%s8420_s3 + $0x380] sm:$0xff] }
  0x3d   : > { %879 = vmatprep.mubr.f32.mxu1 %v5508_v16  ;;  %5132 = vmatmul.mubr.msk.f32.gmra.mxu0 %vm587_vm2, %v5710_v20 }
  0x3e   : > { %1037 = vmatprep.subr.mxu0 %v4451_v42  ;;  %4441 = vmatmul.mubr.msk.f32.gmra.mxu1 %vm587_vm2, %v5710_v20  ;;  %v4473_v20 = vld [vmem:[%s8420_s3 + $0x228] sm:$0xff]  ;;  %v4515_v42 = vld [vmem:[%s8420_s3 + $0x378] sm:$0xff] }
  0x3f   : > { %1038 = vmatpush1.msra.mxu0 %v4450_v43  ;;  %5138 = vmatprep.subr.mxu1 %v4452_v46  ;;  %v4514_v43 = vld [vmem:[%s8420_s3 + $0x370] sm:$0xff] }
  0x40   : > { %1039 = vmatprep.subr.mxu0 %v4448_v47  ;;  %5139 = vmatpush3.msra.mxu1 %v4452_v46  ;;  %v4511_v46 = vld [vmem:[%s8420_s3 + $0x358] sm:$0xff]  ;;  %v4510_v47 = vld [vmem:[%s8420_s3 + $0x350] sm:$0xff] }
  0x41   : > { %1040 = vmatpush1.msra.mxu0 %v4447_v48  ;;  %1073 = vmatprep.mubr.f32.mxu0 %v5508_v16  ;;  %v4509_v48 = vld [vmem:[%s8420_s3 + $0x348] sm:$0xff] }
  0x42   : > { %5140 = vmatprep.subr.mxu1 %v4449_v50  ;;  %4461 = vmatmul.mubr.msk.f32.vlgmr.msra.gmra.mxu0 %vm587_vm2, %v987_v52 }
  0x43   : > { %5141 = vmatpush3.msra.mxu1 %v4449_v50  ;;  %5142 = vmatprep.mubr.msk.f32.mxu1 %vm587_vm2, %v987_v52  ;;  %v4535_v50 = vld [vmem:[%s8420_s3 + $0x418] sm:$0xf]  ;;  %v4534_v52 = vld [vmem:[%s8420_s3 + $0x410] sm:$0xf] }
  0x44   : > { %1079 = vmatprep.mubr.f32.mxu0 %v5508_v16  ;;  %5143 = vmatmul.mubr.msk.f32.vlgmr.msra.gmra.mxu1 %vm587_vm2, %v989_v53 }
  0x45   : > { %1421 = vmatprep.subr.mxu0 %v4501_v54  ;;  %5145 = vmatprep.mubr.msk.f32.mxu1 %vm587_vm2, %v991_v55  ;;  %v1267_v54 = vld [vmem:[%s8420_s3 + $0xf8] sm:$0xff] }
  0x46   : > { %1422 = vmatpush1.msra.mxu0 %v4500_v56  ;;  %4536 = vmatprep.subr.msk.mxu1 %vm596_vm0, %v4535_v50  ;;  %v4504_v56 = vld [vmem:[%s8420_s3 + $0x320] sm:$0xff] }
  0x47   : > { %4462 = vmatmul.mubr.msk.f32.gmra.mxu0 %vm587_vm2, %v989_v53  ;;  %1423 = vmatprep.subr.mxu0 %v4499_v57  ;;  %v4506_v53 = vld [vmem:[%s8420_s3 + $0x330] sm:$0xff]  ;;  %v4503_v57 = vld [vmem:[%s8420_s3 + $0x318] sm:$0xff] }
  0x48   : > { %1085 = vmatprep.mubr.f32.mxu0 %v5508_v16  ;;  %1424 = vmatpush1.msra.mxu0 %v4498_v58  ;;  %v4502_v58 = vld [vmem:[%s8420_s3 + $0x310] sm:$0xff] }
  0x49   : > { %5146 = vmatmul.mubr.msk.f32.gmra.mxu1 %vm587_vm2, %v990_v51  ;;  %1425 = vmatprep.subr.mxu0 %v4497_v59  ;;  %v1301_v59 = vld [vmem:[%s8420_s3 + $0x208] sm:$0xf] }
  0x4a   : > { %1426 = vmatpush1.msra.mxu0 %v4496_v60  ;;  %1568 = vmatprep.mubr.f32.mxu1 %v5508_v16 }
  0x4b   : > { %4463 = vmatmul.mubr.msk.f32.gmra.mxu0 %vm587_vm2, %v991_v55  ;;  %1427 = vmatprep.subr.mxu0 %v4495_v61  ;;  %v4505_v55 = vld [vmem:[%s8420_s3 + $0x328] sm:$0xff] }
  0x4c   : > { %1091 = vmatprep.mubr.f32.mxu0 %v5508_v16  ;;  %1428 = vmatpush1.msra.mxu0 %v4494_v62 }
  0x4d   : > { %1429 = vmatprep.subr.mxu0 %v4493_v63  ;;  %4537 = vmatpush1.msk.msra.mxu1 %vm596_vm0, %v4534_v52 }
  0x4e   : > { %1430 = vmatpush1.msra.mxu0 %v4492_v0  ;;  %1599 = vmatprep.subr.mxu1 %v1267_v54 }
  0x4f   : > { %4464 = vmatmul.mubr.msk.f32.gmra.mxu0 %vm587_vm2, %v990_v51  ;;  %1431 = vmatprep.subr.mxu0 %v4491_v1  ;;  %v4507_v51 = vld [vmem:[%s8420_s3 + $0x338] sm:$0xff] }
  0x50   : > { %1432 = vmatpush1.msra.mxu0 %v4490_v2 }
  0x51   : > { %1433 = vmatprep.subr.mxu0 %v4489_v3 }
  0x52   : > { %1434 = vmatpush1.msra.mxu0 %v4488_v4 }
  0x53   : > { %1435 = vmatprep.subr.mxu0 %v4487_v5 }
  0x54   : > { %1436 = vmatpush1.msra.mxu0 %v4486_v6 }
  0x55   : > { %1437 = vmatprep.subr.mxu0 %v4485_v7 }
  0x56   : > { %1438 = vmatpush1.msra.mxu0 %v4484_v8 }
  0x57   : > { %1439 = vmatprep.subr.mxu0 %v4483_v9 }
  0x58   : > { %1440 = vmatpush1.msra.mxu0 %v4482_v10 }
  0x59   : > { %1441 = vmatprep.subr.mxu0 %v4481_v11 }
  0x5a   : > { %1442 = vmatpush1.msra.mxu0 %v4480_v12  ;;  %v1197_v12 = vlaneseq }
  0x5b   : > { %1443 = vmatprep.subr.mxu0 %v4479_v13 }
  0x5c   : > { %1444 = vmatpush1.msra.mxu0 %v4478_v14 }
  0x5d   : > { %1445 = vmatprep.subr.mxu0 %v4477_v15 }
  0x5e   : > { %1446 = vmatpush1.msra.mxu0 %v4476_v17 }
  0x5f   : > { %1447 = vmatprep.subr.mxu0 %v4475_v18  ;;  %v6055_v18 = vshrl.u32 %v1197_v12, 7 }
  0x60   : > { %1448 = vmatpush1.msra.mxu0 %v4474_v19 }
  0x61   : > { %1449 = vmatprep.subr.mxu0 %v4473_v20 }
  0x62   : > { %1450 = vmatpush1.msra.mxu0 %v4472_v21 }
  0x63   : > { %1451 = vmatprep.subr.mxu0 %v4471_v22  ;;  %v1207_v22 = vsub.s32 2, %v6055_v18 }
  0x64   : > { %1452 = vmatpush1.msra.mxu0 %v4470_v23 }
  0x65   : > { %1453 = vmatprep.subr.mxu0 %v4533_v24  ;;  %v1195_v24 = vld [vmem:[%s8460_s2] sm:$0x7] }
  0x66   : > { %1454 = vmatpush2.msra.mxu0 %v4532_v25  ;;  %v6062_v25 = vsub.s32 1, %v6055_v18 }
  0x67   : > { %1455 = vmatprep.subr.mxu0 %v4531_v26 }
  0x68   : > { %1456 = vmatpush2.msra.mxu0 %v4530_v27 }
  0x69   : > { %1457 = vmatprep.subr.mxu0 %v4529_v28 }
  0x6a   : > { %1458 = vmatpush2.msra.mxu0 %v4528_v29  ;;  %v6065_v29 = vsub.s32 0, %v6055_v18 }
  0x6b   : > { %1459 = vmatprep.subr.mxu0 %v4527_v30  ;;  %v1208_v30 = vrot.slane %v1195_v24, %v1207_v22 }
  0x6c   : > { %1460 = vmatpush2.msra.mxu0 %v4526_v31 }
  0x6d   : > { %1461 = vmatprep.subr.mxu0 %v4525_v32 }
  0x6e   : > { %1462 = vmatpush2.msra.mxu0 %v4524_v33  ;;  %v6070_v33 = vrot.slane %v1195_v24, %v6062_v25 }
  0x6f   : > { %1463 = vmatprep.subr.mxu0 %v4523_v34 }
  0x70   : > { %1464 = vmatpush2.msra.mxu0 %v4522_v35 }
  0x71   : > { %1465 = vmatprep.subr.mxu0 %v4521_v36 }
  0x72   : > { %1466 = vmatpush2.msra.mxu0 %v4520_v37 }
  0x73   : > { %1467 = vmatprep.subr.mxu0 %v4519_v38 }
  0x74   : > { %1468 = vmatpush2.msra.mxu0 %v4518_v39 }
  0x75   : > { %1469 = vmatprep.subr.mxu0 %v4517_v40 }
  0x76   : > { %1470 = vmatpush2.msra.mxu0 %v4516_v41 }
  0x77   : > { %1471 = vmatprep.subr.mxu0 %v4515_v42  ;;  %v1200_v42 = vrot.slane %v1195_v24, %v6065_v29 }
  0x78   : > { %1472 = vmatpush2.msra.mxu0 %v4514_v43 }
  0x79   : > { %1473 = vmatprep.subr.mxu0 %v4513_v44 }
  0x7a   : > { %1474 = vmatpush2.msra.mxu0 %v4512_v45 }
  0x7b   : > { %1475 = vmatprep.subr.mxu0 %v4511_v46 }
  0x7c   : > { %1476 = vmatpush2.msra.mxu0 %v4510_v47 }
  0x7d   : > { %1477 = vmatprep.subr.mxu0 %v4509_v48 }
  0x7e   : > { %1478 = vmatpush2.msra.mxu0 %v4508_v49 }
  0x7f   : > { %1479 = vmatprep.subr.mxu0 %v4507_v51 }
  0x80   : > { %1480 = vmatpush2.msra.mxu0 %v4506_v53 }
  0x81   : > { %1481 = vmatprep.subr.mxu0 %v4505_v55 }
  0x82   : > { %1482 = vmatpush2.msra.mxu0 %v4504_v56 }
  0x83   : > { %1483 = vmatprep.subr.mxu0 %v4503_v57 }
  0x84   : > { %1484 = vmatpush2.msra.mxu0 %v4502_v58 }
  0x85   : > { %4541 = vmatprep.subr.msk.mxu0 %vm596_vm0, %v1301_v59 }
  0xe7   : > { %v672_v60 = vpop.f32.mrf.mxu0 }
  0xe9   : > { %v5116_v61 = vpop.f32.mrf.mxu1  ;;  %v674_v62 = vpop.f32.mrf.mxu0 }
  0xeb   : > { %v761_v63 = vpop.f32.mrf.mxu1  ;;  %v678_v0 = vpop.f32.mrf.mxu0 }
  0xed   : > { %v5119_v1 = vpop.f32.mrf.mxu1  ;;  %v680_v2 = vpop.f32.mrf.mxu0 }
  0xef   : > { %v771_v3 = vpop.f32.mrf.mxu1  ;;  %v684_v4 = vpop.f32.mrf.mxu0 }
  0xf1   : > { %v863_v5 = vpop.f32.mrf.mxu1  ;;  %v686_v6 = vpop.f32.mrf.mxu0 }
  0xf2   : > { %v864_v34 = vadd.f32 %v863_v5, %v672_v60 }
  0xf3   : > { %v865_v7 = vpop.f32.mrf.mxu1  ;;  %v6051_v8 = vpop.f32.mrf.mxu0 }
  0xf4   : > { %v866_v27 = vadd.f32 %v865_v7, %v674_v62 }
  0xf5   : > { %v869_v9 = vpop.f32.mrf.mxu1  ;;  %v6053_v10 = vpop.f32.mrf.mxu0 }
  0xf6   : > { %v870_v38 = vadd.f32 %v869_v9, %v678_v0 }
  0xf7   : > { %v871_v11 = vpop.f32.mrf.mxu1 }
  0xf8   : > { %v5130_v13 = vpop.f32.mrf.mxu0  ;;  %v872_v45 = vadd.f32 %v871_v11, %v680_v2 }
  0xf9   : > { %v875_v14 = vpop.f32.mrf.mxu1  ;;  %v958_v28 = vadd.f32 %v5130_v13, %v5116_v61 }
  0xfa   : > { %v952_v15 = vpop.f32.mrf.mxu0  ;;  %v876_v50 = vadd.f32 %v875_v14, %v684_v4 }
  0xfb   : > { %v877_v17 = vpop.f32.mrf.mxu1  ;;  %v953_v35 = vadd.f32 %v952_v15, %v761_v63 }
  0xfc   : > { %v878_v59 = vadd.f32 %v877_v17, %v686_v6 }
  0xfd   : > { %v5133_v19 = vpop.f32.mrf.mxu0 }
  0xfe   : > { %v881_v20 = vpop.f32.mrf.mxu1  ;;  %v968_v51 = vadd.f32 %v5133_v19, %v5119_v1 }
  0xff   : > { %v962_v21 = vpop.f32.mrf.mxu0  ;;  %v882_v11 = vadd.f32 %v881_v20, %v6051_v8 }
 0x100   : > { %v883_v23 = vpop.f32.mrf.mxu1  ;;  %v963_v52 = vadd.f32 %v962_v21, %v771_v3  ;;  %v1266_v21 = vld [vmem:[%s8420_s3 + $0xf0] sm:$0xff] }
 0x101   : > { %v884_v14 = vadd.f32 %v883_v23, %v6053_v10  ;;  %v1265_v10 = vld [vmem:[%s8420_s3 + $0xe8] sm:$0xff] }
 0x102   : > { %v1075_v26 = vpop.f32.mrf.mxu0 }
 0x103   : > { %v1183_v41 = vadd.f32 %v1075_v26, %v864_v34 }
 0x104   : > { %v5144_v31 = vpop.f32.mrf.mxu1  ;;  %v1077_v32 = vpop.f32.mrf.mxu0 }
 0x105   : > { %v1188_v36 = vadd.f32 %v5144_v31, %v958_v28  ;;  %v1184_v37 = vadd.f32 %v1077_v32, %v866_v27  ;;  %v1212_v60 = vadd.f32 %v1200_v42, %v1183_v41 }
 0x106   : > { %v1164_v39 = vpop.f32.mrf.mxu1 }
 0x107   : > { %v1081_v40 = vpop.f32.mrf.mxu0  ;;  %v1217_v43 = vadd.f32 %v1208_v30, %v1188_v36  ;;  %v1185_v44 = vadd.f32 %v1164_v39, %v953_v35  ;;  %v1213_v46 = vadd.f32 %v6070_v33, %v1184_v37  ;;  %v6087_v15 = vmax.f32 %v1212_v60, 0.0 }
 0x108   : > { %v1186_v47 = vadd.f32 %v1081_v40, %v870_v38  ;;  %v1263_v38 = vld [vmem:[%s8420_s3 + $0xd8] sm:$0xff] }
 0x109   : > { %v5147_v48 = vpop.f32.mrf.mxu1  ;;  %v1083_v49 = vpop.f32.mrf.mxu0  ;;  %v6074_v53 = vmax.f32 %v1217_v43, 0.0  ;;  %v1214_v54 = vadd.f32 %v1208_v30, %v1185_v44  ;;  %v6076_v63 = vmax.f32 %v1213_v46, 0.0  ;;  %v1381_v39 = vrot.slane %v6087_v15, 1  ;;  %v1262_v44 = vld [vmem:[%s8420_s3 + $0xd0] sm:$0xff] }
 0x10a   : > { %v1215_v55 = vadd.f32 %v1200_v42, %v1186_v47  ;;  %v1187_v56 = vadd.f32 %v1083_v49, %v872_v45  ;;  %v1194_v2 = vadd.f32 %v5147_v48, %v968_v51 }
 0x10b   : > { %v1174_v57 = vpop.f32.mrf.mxu1  ;;  %v1087_v58 = vpop.f32.mrf.mxu0  ;;  %v6078_v0 = vmax.f32 %v1214_v54, 0.0  ;;  %v1388_v6 = vrot.slane %v6074_v53, 1  ;;  %v1384_v32 = vrot.slane %v6076_v63, 1  ;;  %v1259_v54 = vld [vmem:[%s8420_s3 + $0xb8] sm:$0xff] }
 0x10c   : > { %v1191_v61 = vadd.f32 %v1174_v57, %v963_v52  ;;  %v1189_v62 = vadd.f32 %v1087_v58, %v876_v50  ;;  %v1216_v4 = vadd.f32 %v6070_v33, %v1187_v56  ;;  %v6081_v3 = vmax.f32 %v1215_v55, 0.0  ;;  %v1260_v50 = vld [vmem:[%s8420_s3 + $0xc0] sm:$0xff] }
 0x10d   : > { %v1089_v1 = vpop.f32.mrf.mxu0  ;;  %v1387_v12 = vrot.slane %v6078_v0, 1  ;;  %v6096_v24 = vadd.f32 %v1208_v30, %v1194_v2  ;;  %v1300_v52 = vld [vmem:[%s8420_s3 + $0x200] sm:$0xf]  ;;  %v4611_v2 = vld [vmem:[%s8420_s3 + $0x628] sm:$0xf] }
 0x10e   : > { %v1220_v5 = vadd.f32 %v1208_v30, %v1191_v61  ;;  %v1218_v7 = vadd.f32 %v1200_v42, %v1189_v62  ;;  %v1190_v9 = vadd.f32 %v1089_v1, %v878_v59  ;;  %v6089_v17 = vmax.f32 %v1216_v4, 0.0  ;;  %v1264_v30 = vld [vmem:[%s8420_s3 + $0xe0] sm:$0xff]  ;;  %v1258_v59 = vld [vmem:[%s8420_s3 + $0xb0] sm:$0xff]  ;;  %v1257_v61 = vld [vmem:[%s8420_s3 + $0xa8] sm:$0xff] }
 0x10f   : > { %v1093_v13 = vpop.f32.mrf.mxu0  ;;  %v1389_v26 = vsel %vm579_vm1, %v1387_v12, %v1388_v6  ;;  %v1382_v23 = vrot.slane %v6081_v3, 1  ;;  %v1235_v41 = vmax.f32 %v6096_v24, 0.0  ;;  %v1256_v4 = vld [vmem:[%s8420_s3 + $0xa0] sm:$0xff]  ;;  %v1255_v1 = vld [vmem:[%s8420_s3 + $0x98] sm:$0xff]  ;;  %v1250_v12 = vld [vmem:[%s8420_s3 + $0x70] sm:$0xff] }
 0x110   : > { %v6091_v19 = vmax.f32 %v1220_v5, 0.0  ;;  %v1219_v8 = vadd.f32 %v6070_v33, %v1190_v9  ;;  %v1192_v20 = vadd.f32 %v1093_v13, %v882_v11  ;;  %v6105_v31 = vmax.f32 %v1218_v7, 0.0  ;;  %4538 = vmatmul.mubr.msk.f32.vlgmr.msra.gmra.mxu1 %vm1408_vm4, %v1389_v26  ;;  %v1254_v7 = vld [vmem:[%s8420_s3 + $0x90] sm:$0xff]  ;;  %v1253_v9 = vld [vmem:[%s8420_s3 + $0x88] sm:$0xff]  ;;  %v1252_v11 = vld [vmem:[%s8420_s3 + $0x80] sm:$0xff] }
 0x111   : > { %v1095_v27 = vpop.f32.mrf.mxu0  ;;  %1600 = vmatpush1.msra.mxu1 %v1266_v21  ;;  %v1385_v37 = vrot.slane %v6089_v17, 1  ;;  %1574 = vmatprep.mubr.f32.mxu1 %v5508_v16  ;;  %v1383_v47 = vsel %vm579_vm1, %v1381_v39, %v1382_v23  ;;  %v1400_v55 = vrot.slane %v1235_v41, 1  ;;  %v4610_v13 = vld [vmem:[%s8420_s3 + $0x620] sm:$0xf]  ;;  %v1245_v26 = vld [vmem:[%s8420_s3 + $0x48] sm:$0xff] }
 0x112   : > { %v1394_v28 = vrot.slane %v6091_v19, 1  ;;  %v6112_v34 = vmax.f32 %v1219_v8, 0.0  ;;  %v6114_v35 = vadd.f32 %v1200_v42, %v1192_v20  ;;  %v1193_v36 = vadd.f32 %v1095_v27, %v884_v14  ;;  %1601 = vmatprep.subr.mxu1 %v1265_v10  ;;  %v1249_v14 = vld [vmem:[%s8420_s3 + $0x68] sm:$0xff]  ;;  %v1248_v21 = vld [vmem:[%s8420_s3 + $0x60] sm:$0xff]  ;;  %v1247_v8 = vld [vmem:[%s8420_s3 + $0x58] sm:$0xff] }
 0x113   : > { %1602 = vmatpush1.msra.mxu1 %v1264_v30  ;;  %v1386_v43 = vsel %vm579_vm1, %v1384_v32, %v1385_v37  ;;  %v1390_v48 = vrot.slane %v6105_v31, 1  ;;  %v1246_v20 = vld [vmem:[%s8420_s3 + $0x50] sm:$0xff]  ;;  %v1244_v27 = vld [vmem:[%s8420_s3 + $0x40] sm:$0xff]  ;;  %v1243_v10 = vld [vmem:[%s8420_s3 + $0x38] sm:$0xff]  ;;  %v1839_v32 = vrot.slane %v6074_v53, 2 }
 0x114   : > { %v1395_v40 = vsel %vm579_vm1, %v1388_v6, %v1394_v28  ;;  %v6125_v42 = vadd.f32 %v6070_v33, %v1193_v36  ;;  %v1392_v45 = vrot.slane %v6112_v34, 1  ;;  %v1233_v46 = vmax.f32 %v6114_v35, 0.0  ;;  %1485 = vmatprep.mubr.f32.mxu0 %v1386_v43  ;;  %1603 = vmatprep.subr.mxu1 %v1263_v38  ;;  %v1261_v33 = vld [vmem:[%s8420_s3 + $0xc8] sm:$0xff]  ;;  %v1251_v6 = vld [vmem:[%s8420_s3 + $0x78] sm:$0xff]  ;;  %v1238_v38 = vld [vmem:[%s8420_s3 + $0x10] sm:$0xff] }
 0x115   : > { %1486 = vmatmul.mubr.f32.vlgmr.msra.gmra.mxu0 %v1383_v47  ;;  %4539 = vmatmul.mubr.msk.f32.gmra.mxu1 %vm1408_vm4, %v1395_v40  ;;  %v1391_v58 = vsel %vm579_vm1, %v1382_v23, %v1390_v48  ;;  %v1401_v60 = vsel %vm579_vm1, %v1394_v28, %v1400_v55  ;;  %v1838_v23 = vrot.slane %v6078_v0, 2  ;;  %v1242_v28 = vld [vmem:[%s8420_s3 + $0x30] sm:$0xff]  ;;  %v1241_v30 = vld [vmem:[%s8420_s3 + $0x28] sm:$0xff]  ;;  %v1239_v36 = vld [vmem:[%s8420_s3 + $0x18] sm:$0xff]  ;;  %v1851_v47 = vrot.slane %v1235_v41, 2 }
 0x116   : > { %v1234_v49 = vmax.f32 %v6125_v42, 0.0  ;;  %v1393_v51 = vsel %vm579_vm1, %v1385_v37, %v1392_v45  ;;  %1604 = vmatpush1.msra.mxu1 %v1262_v44  ;;  %1580 = vmatprep.mubr.f32.mxu1 %v5508_v16  ;;  %v1396_v57 = vrot.slane %v1233_v46, 1  ;;  %v1845_v37 = vrot.slane %v6091_v19, 2  ;;  %v1237_v39 = vld [vmem:[%s8420_s3 + $0x8] sm:$0xff]  ;;  %v1236_v40 = vld [vmem:[%s8420_s3] sm:$0xff]  ;;  %v1298_v43 = vld [vmem:[%s8420_s3 + $0x1f0] sm:$0xff] }
 0x117   : > { %1491 = vmatprep.mubr.f32.mxu0 %v1393_v51  ;;  %1605 = vmatprep.subr.mxu1 %v1261_v33  ;;  %v1296_v33 = vld [vmem:[%s8420_s3 + $0x1e0] sm:$0xff]  ;;  %v1293_v41 = vld [vmem:[%s8420_s3 + $0x1c8] sm:$0xff]  ;;  %v4662_v42 = vld [vmem:[%s8422_s5 + $0x438] sm:$0xff] }
 0x118   : > { %v1398_v56 = vrot.slane %v1234_v49, 1  ;;  %1606 = vmatpush1.msra.mxu1 %v1260_v50  ;;  %4542 = vmatpush1.msk.msra.mxu0 %vm596_vm0, %v1300_v52  ;;  %v1397_v5 = vsel %vm579_vm1, %v1390_v48, %v1396_v57  ;;  %v1846_v44 = vsel %vm984_vm3, %v1839_v32, %v1845_v37  ;;  %v1295_v48 = vld [vmem:[%s8420_s3 + $0x1d8] sm:$0xff]  ;;  %v1294_v50 = vld [vmem:[%s8420_s3 + $0x1d0] sm:$0xff]  ;;  %v1852_v24 = vsel %vm984_vm3, %v1845_v37, %v1851_v47  ;;  %v1292_v51 = vld [vmem:[%s8420_s3 + $0x1c0] sm:$0xff] }
 0x119   : > { %1607 = vmatprep.subr.mxu1 %v1259_v54  ;;  %1492 = vmatmul.mubr.f32.gmra.mxu0 %v1391_v58  ;;  %v1291_v52 = vld [vmem:[%s8420_s3 + $0x1b8] sm:$0xff]  ;;  %v1290_v54 = vld [vmem:[%s8420_s3 + $0x1b0] sm:$0xff]  ;;  %v1289_v55 = vld [vmem:[%s8420_s3 + $0x1a8] sm:$0xff] }
 0x11a   : > { %v1399_v62 = vsel %vm579_vm1, %v1392_v45, %v1398_v56  ;;  %4540 = vmatmul.mubr.msk.f32.gmra.mxu1 %vm1408_vm4, %v1401_v60  ;;  %4612 = vmatprep.subr.msk.mxu0 %vm596_vm0, %v4611_v2  ;;  %v1297_v45 = vld [vmem:[%s8420_s3 + $0x1e8] sm:$0xff]  ;;  %v1288_v56 = vld [vmem:[%s8420_s3 + $0x1a0] sm:$0xff]  ;;  %v1287_v57 = vld [vmem:[%s8420_s3 + $0x198] sm:$0xff] }
 0x11b   : > { %1497 = vmatprep.mubr.f32.mxu0 %v1399_v62  ;;  %1608 = vmatpush1.msra.mxu1 %v1258_v59  ;;  %v1286_v58 = vld [vmem:[%s8420_s3 + $0x190] sm:$0xff]  ;;  %v1285_v59 = vld [vmem:[%s8420_s3 + $0x188] sm:$0xff]  ;;  %v1284_v60 = vld [vmem:[%s8420_s3 + $0x180] sm:$0xff] }
 0x11c   : > { %1663 = vmatprep.mubr.f32.mxu1 %v6076_v63  ;;  %1609 = vmatprep.subr.mxu1 %v1257_v61  ;;  %v1283_v61 = vld [vmem:[%s8420_s3 + $0x178] sm:$0xff]  ;;  %v1282_v62 = vld [vmem:[%s8420_s3 + $0x170] sm:$0xff]  ;;  %v1281_v2 = vld [vmem:[%s8420_s3 + $0x168] sm:$0xff] }
 0x11d   : > { %1610 = vmatpush1.msra.mxu1 %v1256_v4  ;;  %1498 = vmatmul.mubr.f32.gmra.mxu0 %v1397_v5  ;;  %v1280_v4 = vld [vmem:[%s8420_s3 + $0x160] sm:$0xff]  ;;  %v1278_v5 = vld [vmem:[%s8420_s3 + $0x150] sm:$0xff]  ;;  %v4569_v37 = vld [vmem:[%s8420_s3 + $0x4d8] sm:$0xff] }
 0x11e   : > { %1611 = vmatprep.subr.mxu1 %v1255_v1  ;;  %1746 = vmatprep.mubr.f32.mxu0 %v5508_v16  ;;  %v1279_v1 = vld [vmem:[%s8420_s3 + $0x158] sm:$0xff]  ;;  %v4664_v35 = vld [vmem:[%s8422_s5 + $0x448] sm:$0xff] }
 0x11f   : > { %1612 = vmatpush1.msra.mxu1 %v1254_v7  ;;  %v1277_v7 = vld [vmem:[%s8420_s3 + $0x148] sm:$0xff]  ;;  %v4561_v47 = vld [vmem:[%s8420_s3 + $0x498] sm:$0xff] }
 0x120   : > { %1613 = vmatprep.subr.mxu1 %v1253_v9  ;;  %v1276_v9 = vld [vmem:[%s8420_s3 + $0x140] sm:$0xff] }
 0x121   : > { %1614 = vmatpush1.msra.mxu1 %v1252_v11  ;;  %4543 = vmatmul.mubr.msk.f32.vlgmr.msra.gmra.mxu0 %vm1408_vm4, %v6078_v0  ;;  %v1240_v0 = vld [vmem:[%s8420_s3 + $0x20] sm:$0xff]  ;;  %v1275_v11 = vld [vmem:[%s8420_s3 + $0x138] sm:$0xff] }
 0x122   : > { %1615 = vmatprep.subr.mxu1 %v1251_v6  ;;  %1752 = vmatprep.mubr.f32.mxu0 %v5508_v16  ;;  %v1274_v6 = vld [vmem:[%s8420_s3 + $0x130] sm:$0xff] }
 0x123   : > { %1616 = vmatpush1.msra.mxu1 %v1250_v12  ;;  %4613 = vmatpush1.msk.msra.mxu0 %vm596_vm0, %v4610_v13  ;;  %v1273_v12 = vld [vmem:[%s8420_s3 + $0x128] sm:$0xff]  ;;  %v1272_v13 = vld [vmem:[%s8420_s3 + $0x120] sm:$0xff] }
 0x124   : > { %1617 = vmatprep.subr.mxu1 %v1249_v14  ;;  %v1271_v14 = vld [vmem:[%s8420_s3 + $0x118] sm:$0xff] }
 0x125   : > { %1618 = vmatpush1.msra.mxu1 %v1248_v21  ;;  %4544 = vmatmul.mubr.msk.f32.gmra.mxu0 %vm1408_vm4, %v6074_v53  ;;  %v1840_v53 = vsel %vm984_vm3, %v1838_v23, %v1839_v32  ;;  %v1270_v21 = vld [vmem:[%s8420_s3 + $0x110] sm:$0xff]  ;;  %v4574_v23 = vld [vmem:[%s8420_s3 + $0x500] sm:$0xff]  ;;  %v4571_v32 = vld [vmem:[%s8420_s3 + $0x4e8] sm:$0xff] }
 0x126   : > { %1619 = vmatprep.subr.mxu1 %v1247_v8  ;;  %1758 = vmatprep.mubr.f32.mxu0 %v5508_v16  ;;  %v1269_v8 = vld [vmem:[%s8420_s3 + $0x108] sm:$0xff] }
 0x127   : > { %1620 = vmatpush1.msra.mxu1 %v1246_v20  ;;  %v1268_v20 = vld [vmem:[%s8420_s3 + $0x100] sm:$0xff] }
 0x128   : > { %1621 = vmatprep.subr.mxu1 %v1245_v26  ;;  %v4577_v26 = vld [vmem:[%s8420_s3 + $0x518] sm:$0xff] }
 0x129   : > { %1622 = vmatpush1.msra.mxu1 %v1244_v27  ;;  %4545 = vmatmul.mubr.msk.f32.gmra.mxu0 %vm1408_vm4, %v6091_v19  ;;  %v1299_v19 = vld [vmem:[%s8420_s3 + $0x1f8] sm:$0xff]  ;;  %v4576_v27 = vld [vmem:[%s8420_s3 + $0x510] sm:$0xff] }
 0x12a   : > { %1623 = vmatprep.subr.mxu1 %v1243_v10  ;;  %2018 = vmatprep.mubr.f32.mxu0 %v5508_v16  ;;  %v4575_v10 = vld [vmem:[%s8420_s3 + $0x508] sm:$0xff] }
 0x12b   : > { %1624 = vmatpush1.msra.mxu1 %v1242_v28  ;;  %v4573_v28 = vld [vmem:[%s8420_s3 + $0x4f8] sm:$0xff] }
 0x12c   : > { %1625 = vmatprep.subr.mxu1 %v1241_v30  ;;  %v4572_v30 = vld [vmem:[%s8420_s3 + $0x4f0] sm:$0xff] }
 0x12d   : > { %1626 = vmatpush1.msra.mxu1 %v1240_v0  ;;  %4614 = vmatmul.mubr.msk.f32.vlgmr.msra.gmra.mxu0 %vm1408_vm4, %v1840_v53  ;;  %v4570_v0 = vld [vmem:[%s8420_s3 + $0x4e0] sm:$0xff]  ;;  %v1835_v53 = vrot.slane %v6076_v63, 2  ;;  %v4565_v63 = vld [vmem:[%s8420_s3 + $0x4b8] sm:$0xff] }
 0x12e   : > { %1627 = vmatprep.subr.mxu1 %v1239_v36  ;;  %2024 = vmatprep.mubr.f32.mxu0 %v5508_v16  ;;  %v1836_v36 = vrot.slane %v6089_v17, 2 }
 0x12f   : > { %1628 = vmatpush1.msra.mxu1 %v1238_v38  ;;  %v4568_v38 = vld [vmem:[%s8420_s3 + $0x4d0] sm:$0xff] }
 0x130   : > { %1629 = vmatprep.subr.mxu1 %v1237_v39  ;;  %v4567_v39 = vld [vmem:[%s8420_s3 + $0x4c8] sm:$0xff] }
 0x131   : > { %1630 = vmatpush1.msra.mxu1 %v1236_v40  ;;  %4615 = vmatmul.mubr.msk.f32.gmra.mxu0 %vm1408_vm4, %v1846_v44  ;;  %v1837_v40 = vsel %vm984_vm3, %v1835_v53, %v1836_v36  ;;  %v4563_v44 = vld [vmem:[%s8420_s3 + $0x4a8] sm:$0xff]  ;;  %v4584_v53 = vld [vmem:[%s8420_s3 + $0x550] sm:$0xff] }
 0x132   : > { %1631 = vmatprep.subr.mxu1 %v1299_v19  ;;  %2030 = vmatprep.mubr.f32.mxu0 %v5508_v16  ;;  %v4566_v19 = vld [vmem:[%s8420_s3 + $0x4c0] sm:$0xff] }
 0x133   : > { %1632 = vmatpush2.msra.mxu1 %v1298_v43  ;;  %v4564_v43 = vld [vmem:[%s8420_s3 + $0x4b0] sm:$0xff] }
 0x134   : > { %1633 = vmatprep.subr.mxu1 %v1297_v45  ;;  %v4562_v45 = vld [vmem:[%s8420_s3 + $0x4a0] sm:$0xff] }
 0x135   : > { %1634 = vmatpush2.msra.mxu1 %v1296_v33  ;;  %4616 = vmatmul.mubr.msk.f32.gmra.mxu0 %vm1408_vm4, %v1852_v24  ;;  %v4560_v33 = vld [vmem:[%s8420_s3 + $0x490] sm:$0xff]  ;;  %v4557_v24 = vld [vmem:[%s8420_s3 + $0x478] sm:$0xff] }
 0x136   : > { %1635 = vmatprep.subr.mxu1 %v1295_v48  ;;  %v4559_v48 = vld [vmem:[%s8420_s3 + $0x488] sm:$0xff] }
 0x137   : > { %1636 = vmatpush2.msra.mxu1 %v1294_v50  ;;  %v4558_v50 = vld [vmem:[%s8420_s3 + $0x480] sm:$0xff] }
 0x138   : > { %1637 = vmatprep.subr.mxu1 %v1293_v41  ;;  %v4556_v41 = vld [vmem:[%s8420_s3 + $0x470] sm:$0xff] }
 0x139   : > { %1638 = vmatpush2.msra.mxu1 %v1292_v51  ;;  %v4555_v51 = vld [vmem:[%s8420_s3 + $0x468] sm:$0xff] }
 0x13a   : > { %1639 = vmatprep.subr.mxu1 %v1291_v52  ;;  %v4554_v52 = vld [vmem:[%s8420_s3 + $0x460] sm:$0xff] }
 0x13b   : > { %1640 = vmatpush2.msra.mxu1 %v1290_v54  ;;  %v4553_v54 = vld [vmem:[%s8420_s3 + $0x458] sm:$0xff] }
 0x13c   : > { %1641 = vmatprep.subr.mxu1 %v1289_v55  ;;  %v4552_v55 = vld [vmem:[%s8420_s3 + $0x450] sm:$0xff] }
 0x13d   : > { %1642 = vmatpush2.msra.mxu1 %v1288_v56  ;;  %v4551_v56 = vld [vmem:[%s8420_s3 + $0x448] sm:$0xff] }
 0x13e   : > { %1643 = vmatprep.subr.mxu1 %v1287_v57  ;;  %v4550_v57 = vld [vmem:[%s8420_s3 + $0x440] sm:$0xff] }
 0x13f   : > { %1644 = vmatpush2.msra.mxu1 %v1286_v58  ;;  %v4549_v58 = vld [vmem:[%s8420_s3 + $0x438] sm:$0xff] }
 0x140   : > { %1645 = vmatprep.subr.mxu1 %v1285_v59  ;;  %v4548_v59 = vld [vmem:[%s8420_s3 + $0x430] sm:$0xff] }
 0x141   : > { %1646 = vmatpush2.msra.mxu1 %v1284_v60  ;;  %v4547_v60 = vld [vmem:[%s8420_s3 + $0x428] sm:$0xff] }
 0x142   : > { %1647 = vmatprep.subr.mxu1 %v1283_v61  ;;  %v4546_v61 = vld [vmem:[%s8420_s3 + $0x420] sm:$0xff] }
 0x143   : > { %1648 = vmatpush2.msra.mxu1 %v1282_v62  ;;  %v4609_v62 = vld [vmem:[%s8420_s3 + $0x618] sm:$0xff] }
 0x144   : > { %1649 = vmatprep.subr.mxu1 %v1281_v2  ;;  %v4608_v2 = vld [vmem:[%s8420_s3 + $0x610] sm:$0xff] }
 0x145   : > { %1650 = vmatpush2.msra.mxu1 %v1280_v4  ;;  %v4607_v4 = vld [vmem:[%s8420_s3 + $0x608] sm:$0xff] }
 0x146   : > { %1651 = vmatprep.subr.mxu1 %v1279_v1  ;;  %v4606_v1 = vld [vmem:[%s8420_s3 + $0x600] sm:$0xff] }
 0x147   : > { %1652 = vmatpush2.msra.mxu1 %v1278_v5  ;;  %v4605_v5 = vld [vmem:[%s8420_s3 + $0x5f8] sm:$0xff] }
 0x148   : > { %1653 = vmatprep.subr.mxu1 %v1277_v7  ;;  %v4604_v7 = vld [vmem:[%s8420_s3 + $0x5f0] sm:$0xff] }
 0x149   : > { %1654 = vmatpush2.msra.mxu1 %v1276_v9  ;;  %v4603_v9 = vld [vmem:[%s8420_s3 + $0x5e8] sm:$0xff] }
 0x14a   : > { %1655 = vmatprep.subr.mxu1 %v1275_v11  ;;  %v4602_v11 = vld [vmem:[%s8420_s3 + $0x5e0] sm:$0xff] }
 0x14b   : > { %1656 = vmatpush2.msra.mxu1 %v1274_v6  ;;  %v4601_v6 = vld [vmem:[%s8420_s3 + $0x5d8] sm:$0xff] }
 0x14c   : > { %1657 = vmatprep.subr.mxu1 %v1273_v12  ;;  %v4600_v12 = vld [vmem:[%s8420_s3 + $0x5d0] sm:$0xff] }
 0x14d   : > { %1658 = vmatpush2.msra.mxu1 %v1272_v13  ;;  %v4599_v13 = vld [vmem:[%s8420_s3 + $0x5c8] sm:$0xff] }
 0x14e   : > { %1659 = vmatprep.subr.mxu1 %v1271_v14  ;;  %v4598_v14 = vld [vmem:[%s8420_s3 + $0x5c0] sm:$0xff] }
 0x14f   : > { %1660 = vmatpush2.msra.mxu1 %v1270_v21  ;;  %v4597_v21 = vld [vmem:[%s8420_s3 + $0x5b8] sm:$0xff] }
 0x150   : > { %1661 = vmatprep.subr.mxu1 %v1269_v8  ;;  %v4596_v8 = vld [vmem:[%s8420_s3 + $0x5b0] sm:$0xff] }
 0x151   : > { %1662 = vmatpush2.msra.mxu1 %v1268_v20  ;;  %v4595_v20 = vld [vmem:[%s8420_s3 + $0x5a8] sm:$0xff] }
 0x152   : > { %1664 = vmatmul.mubr.f32.vlgmr.msra.gmra.mxu1 %v6087_v15  ;;  %1871 = vmatprep.subr.mxu1 %v4577_v26  ;;  %v4594_v26 = vld [vmem:[%s8420_s3 + $0x5a0] sm:$0xff] }
 0x153   : > { %1669 = vmatprep.mubr.f32.mxu1 %v6089_v17  ;;  %1872 = vmatpush1.msra.mxu1 %v4576_v27  ;;  %v4593_v27 = vld [vmem:[%s8420_s3 + $0x598] sm:$0xff]  ;;  %v4663_v17 = vld [vmem:[%s8422_s5 + $0x440] sm:$0xff] }
 0x154   : > { %1873 = vmatprep.subr.mxu1 %v4575_v10  ;;  %v4592_v10 = vld [vmem:[%s8420_s3 + $0x590] sm:$0xff]  ;;  %2274 = vmatprep.subr.mxu0 %v4663_v17  ;;  %v4695_v17 = vld [vmem:[%s8422_s5 + $0x540] sm:$0xff] }
 0x155   : > { %1874 = vmatpush1.msra.mxu1 %v4574_v23  ;;  %v4591_v23 = vld [vmem:[%s8420_s3 + $0x588] sm:$0xff]  ;;  %2275 = vmatpush1.msra.mxu0 %v4662_v42  ;;  %v4693_v42 = vld [vmem:[%s8422_s5 + $0x530] sm:$0xff] }
 0x156   : > { %1670 = vmatmul.mubr.f32.gmra.mxu1 %v6081_v3  ;;  %1875 = vmatprep.subr.mxu1 %v4573_v28  ;;  %v4590_v28 = vld [vmem:[%s8420_s3 + $0x580] sm:$0xff] }
 0x157   : > { %1675 = vmatprep.mubr.f32.mxu1 %v6112_v34  ;;  %1876 = vmatpush1.msra.mxu1 %v4572_v30  ;;  %v4589_v30 = vld [vmem:[%s8420_s3 + $0x578] sm:$0xff] }
 0x158   : > { %1877 = vmatprep.subr.mxu1 %v4571_v32  ;;  %v4588_v32 = vld [vmem:[%s8420_s3 + $0x570] sm:$0xff] }
 0x159   : > { %1878 = vmatpush1.msra.mxu1 %v4570_v0  ;;  %v4587_v0 = vld [vmem:[%s8420_s3 + $0x568] sm:$0xff] }
 0x15a   : > { %1676 = vmatmul.mubr.f32.gmra.mxu1 %v6105_v31  ;;  %1879 = vmatprep.subr.mxu1 %v4569_v37  ;;  %v4586_v37 = vld [vmem:[%s8420_s3 + $0x560] sm:$0xff] }
 0x15b   : > { %1880 = vmatpush1.msra.mxu1 %v4568_v38  ;;  %1935 = vmatprep.mubr.f32.mxu1 %v1837_v40  ;;  %v4585_v38 = vld [vmem:[%s8420_s3 + $0x558] sm:$0xff]  ;;  %v4582_v40 = vld [vmem:[%s8420_s3 + $0x540] sm:$0xff] }
 0x15c   : > { %1881 = vmatprep.subr.mxu1 %v4567_v39  ;;  %v4583_v39 = vld [vmem:[%s8420_s3 + $0x548] sm:$0xff] }
 0x15d   : > { %1882 = vmatpush1.msra.mxu1 %v4566_v19  ;;  %v4581_v19 = vld [vmem:[%s8420_s3 + $0x538] sm:$0xff] }
 0x15e   : > { %1883 = vmatprep.subr.mxu1 %v4565_v63  ;;  %v4580_v63 = vld [vmem:[%s8420_s3 + $0x530] sm:$0xff] }
 0x15f   : > { %1884 = vmatpush1.msra.mxu1 %v4564_v43  ;;  %v1833_v43 = vrot.slane %v6081_v3, 2  ;;  %v1841_v3 = vrot.slane %v6105_v31, 2 }
 0x160   : > { %1885 = vmatprep.subr.mxu1 %v4563_v44  ;;  %v4579_v44 = vld [vmem:[%s8420_s3 + $0x528] sm:$0xff] }
 0x161   : > { %1886 = vmatpush1.msra.mxu1 %v4562_v45  ;;  %v4578_v45 = vld [vmem:[%s8420_s3 + $0x520] sm:$0xff] }
 0x162   : > { %1887 = vmatprep.subr.mxu1 %v4561_v47  ;;  %v1843_v47 = vrot.slane %v6112_v34, 2  ;;  %v1842_v34 = vsel %vm984_vm3, %v1833_v43, %v1841_v3 }
 0x163   : > { %1888 = vmatpush1.msra.mxu1 %v4560_v33  ;;  %v1832_v33 = vrot.slane %v6087_v15, 2  ;;  %v1847_v15 = vrot.slane %v1233_v46, 2  ;;  %v4660_v46 = vld [vmem:[%s8422_s5 + $0x428] sm:$0xff] }
 0x164   : > { %1889 = vmatprep.subr.mxu1 %v4559_v48  ;;  %2276 = vmatprep.subr.mxu0 %v4660_v46  ;;  %v4692_v46 = vld [vmem:[%s8422_s5 + $0x528] sm:$0xff] }
 0x165   : > { %1890 = vmatpush1.msra.mxu1 %v4558_v50  ;;  %v1834_v48 = vsel %vm984_vm3, %v1832_v33, %v1833_v43  ;;  %v1849_v50 = vrot.slane %v1234_v49, 2  ;;  %v1848_v31 = vsel %vm984_vm3, %v1841_v3, %v1847_v15  ;;  %v4659_v49 = vld [vmem:[%s8422_s5 + $0x420] sm:$0xff]  ;;  %v4704_v33 = vld [vmem:[%s8422_s5 + $0x588] sm:$0xff] }
 0x166   : > { %1891 = vmatprep.subr.mxu1 %v4557_v24  ;;  %v1844_v24 = vsel %vm984_vm3, %v1836_v36, %v1843_v47  ;;  %v4661_v36 = vld [vmem:[%s8422_s5 + $0x430] sm:$0xff]  ;;  %2277 = vmatpush1.msra.mxu0 %v4659_v49  ;;  %v4619_v43 = vld [vmem:[%s8422_s5 + $0x2e0] sm:$0xff]  ;;  %v4700_v15 = vld [vmem:[%s8422_s5 + $0x568] sm:$0xff] }
 0x167   : > { %1892 = vmatpush1.msra.mxu1 %v4556_v41  ;;  %v1850_v41 = vsel %vm984_vm3, %v1843_v47, %v1849_v50  ;;  %v4706_v47 = vld [vmem:[%s8422_s5 + $0x598] sm:$0xff]  ;;  %v4703_v3 = vld [vmem:[%s8422_s5 + $0x580] sm:$0xff]  ;;  %v4701_v50 = vld [vmem:[%s8422_s5 + $0x570] sm:$0xff] }
 0x168   : > { %1893 = vmatprep.subr.mxu1 %v4555_v51  ;;  %v4657_v51 = vld [vmem:[%s8422_s5 + $0x410] sm:$0xff]  ;;  %v4690_v49 = vld [vmem:[%s8422_s5 + $0x518] sm:$0xff] }
 0x169   : > { %1894 = vmatpush1.msra.mxu1 %v4554_v52  ;;  %v4658_v52 = vld [vmem:[%s8422_s5 + $0x418] sm:$0xff]  ;;  %2278 = vmatprep.subr.mxu0 %v4657_v51  ;;  %v4691_v51 = vld [vmem:[%s8422_s5 + $0x520] sm:$0xff] }
 0x16a   : > { %1895 = vmatprep.subr.mxu1 %v4553_v54  ;;  %v4656_v54 = vld [vmem:[%s8422_s5 + $0x408] sm:$0xff] }
 0x16b   : > { %1896 = vmatpush1.msra.mxu1 %v4552_v55  ;;  %v4654_v55 = vld [vmem:[%s8422_s5 + $0x3f8] sm:$0xff]  ;;  %2279 = vmatpush1.msra.mxu0 %v4656_v54 }
 0x16c   : > { %1897 = vmatprep.subr.mxu1 %v4551_v56  ;;  %v4655_v56 = vld [vmem:[%s8422_s5 + $0x400] sm:$0xff]  ;;  %2280 = vmatprep.subr.mxu0 %v4654_v55  ;;  %v4686_v54 = vld [vmem:[%s8422_s5 + $0x4f8] sm:$0xff]  ;;  %v4688_v55 = vld [vmem:[%s8422_s5 + $0x508] sm:$0xff] }
 0x16d   : > { %1898 = vmatpush1.msra.mxu1 %v4550_v57  ;;  %v4653_v57 = vld [vmem:[%s8422_s5 + $0x3f0] sm:$0xff] }
 0x16e   : > { %1899 = vmatprep.subr.mxu1 %v4549_v58  ;;  %v4651_v58 = vld [vmem:[%s8422_s5 + $0x3e0] sm:$0xff]  ;;  %2281 = vmatpush1.msra.mxu0 %v4653_v57 }
 0x16f   : > { %1900 = vmatpush1.msra.mxu1 %v4548_v59  ;;  %v4652_v59 = vld [vmem:[%s8422_s5 + $0x3e8] sm:$0xff]  ;;  %2282 = vmatprep.subr.mxu0 %v4651_v58  ;;  %v4683_v57 = vld [vmem:[%s8422_s5 + $0x4e0] sm:$0xff]  ;;  %v4685_v58 = vld [vmem:[%s8422_s5 + $0x4f0] sm:$0xff] }
 0x170   : > { %1901 = vmatprep.subr.mxu1 %v4547_v60  ;;  %v4650_v60 = vld [vmem:[%s8422_s5 + $0x3d8] sm:$0xff] }
 0x171   : > { %1902 = vmatpush1.msra.mxu1 %v4546_v61  ;;  %v4648_v61 = vld [vmem:[%s8422_s5 + $0x3c8] sm:$0xff]  ;;  %2283 = vmatpush1.msra.mxu0 %v4650_v60 }
 0x172   : > { %1903 = vmatprep.subr.mxu1 %v4609_v62  ;;  %v4649_v62 = vld [vmem:[%s8422_s5 + $0x3d0] sm:$0xff]  ;;  %2284 = vmatprep.subr.mxu0 %v4648_v61  ;;  %v4680_v60 = vld [vmem:[%s8422_s5 + $0x4c8] sm:$0xff]  ;;  %v4682_v61 = vld [vmem:[%s8422_s5 + $0x4d8] sm:$0xff] }
 0x173   : > { %1904 = vmatpush2.msra.mxu1 %v4608_v2  ;;  %v4647_v2 = vld [vmem:[%s8422_s5 + $0x3c0] sm:$0xff] }
 0x174   : > { %1905 = vmatprep.subr.mxu1 %v4607_v4  ;;  %v4645_v4 = vld [vmem:[%s8422_s5 + $0x3b0] sm:$0xff]  ;;  %2285 = vmatpush1.msra.mxu0 %v4647_v2 }
 0x175   : > { %1906 = vmatpush2.msra.mxu1 %v4606_v1  ;;  %v4646_v1 = vld [vmem:[%s8422_s5 + $0x3b8] sm:$0xff]  ;;  %2286 = vmatprep.subr.mxu0 %v4645_v4  ;;  %v4677_v2 = vld [vmem:[%s8422_s5 + $0x4b0] sm:$0xff]  ;;  %v4679_v4 = vld [vmem:[%s8422_s5 + $0x4c0] sm:$0xff] }
 0x176   : > { %1907 = vmatprep.subr.mxu1 %v4605_v5  ;;  %v4644_v5 = vld [vmem:[%s8422_s5 + $0x3a8] sm:$0xff] }
 0x177   : > { %1908 = vmatpush2.msra.mxu1 %v4604_v7  ;;  %v4642_v7 = vld [vmem:[%s8422_s5 + $0x398] sm:$0xff]  ;;  %2287 = vmatpush1.msra.mxu0 %v4644_v5 }
 0x178   : > { %1909 = vmatprep.subr.mxu1 %v4603_v9  ;;  %v4643_v9 = vld [vmem:[%s8422_s5 + $0x3a0] sm:$0xff]  ;;  %2288 = vmatprep.subr.mxu0 %v4642_v7  ;;  %v4674_v5 = vld [vmem:[%s8422_s5 + $0x498] sm:$0xff]  ;;  %v4676_v7 = vld [vmem:[%s8422_s5 + $0x4a8] sm:$0xff] }
 0x179   : > { %1910 = vmatpush2.msra.mxu1 %v4602_v11  ;;  %v4641_v11 = vld [vmem:[%s8422_s5 + $0x390] sm:$0xff] }
 0x17a   : > { %1911 = vmatprep.subr.mxu1 %v4601_v6  ;;  %v4639_v6 = vld [vmem:[%s8422_s5 + $0x380] sm:$0xff]  ;;  %2289 = vmatpush1.msra.mxu0 %v4641_v11 }
 0x17b   : > { %1912 = vmatpush2.msra.mxu1 %v4600_v12  ;;  %v4640_v12 = vld [vmem:[%s8422_s5 + $0x388] sm:$0xff]  ;;  %2290 = vmatprep.subr.mxu0 %v4639_v6  ;;  %v4671_v11 = vld [vmem:[%s8422_s5 + $0x480] sm:$0xff]  ;;  %v4673_v6 = vld [vmem:[%s8422_s5 + $0x490] sm:$0xff] }
 0x17c   : > { %1913 = vmatprep.subr.mxu1 %v4599_v13  ;;  %v4638_v13 = vld [vmem:[%s8422_s5 + $0x378] sm:$0xff] }
 0x17d   : > { %1914 = vmatpush2.msra.mxu1 %v4598_v14  ;;  %v4636_v14 = vld [vmem:[%s8422_s5 + $0x368] sm:$0xff]  ;;  %2291 = vmatpush1.msra.mxu0 %v4638_v13 }
 0x17e   : > { %1915 = vmatprep.subr.mxu1 %v4597_v21  ;;  %v4637_v21 = vld [vmem:[%s8422_s5 + $0x370] sm:$0xff]  ;;  %2292 = vmatprep.subr.mxu0 %v4636_v14  ;;  %v4668_v13 = vld [vmem:[%s8422_s5 + $0x468] sm:$0xff]  ;;  %v4670_v14 = vld [vmem:[%s8422_s5 + $0x478] sm:$0xff] }
 0x17f   : > { %1916 = vmatpush2.msra.mxu1 %v4596_v8  ;;  %v4635_v8 = vld [vmem:[%s8422_s5 + $0x360] sm:$0xff] }
 0x180   : > { %1917 = vmatprep.subr.mxu1 %v4595_v20  ;;  %v4633_v20 = vld [vmem:[%s8422_s5 + $0x350] sm:$0xff]  ;;  %2293 = vmatpush1.msra.mxu0 %v4635_v8 }
 0x181   : > { %1918 = vmatpush2.msra.mxu1 %v4594_v26  ;;  %v4634_v26 = vld [vmem:[%s8422_s5 + $0x358] sm:$0xff]  ;;  %2294 = vmatprep.subr.mxu0 %v4633_v20  ;;  %v4665_v8 = vld [vmem:[%s8422_s5 + $0x450] sm:$0xff]  ;;  %v4667_v20 = vld [vmem:[%s8422_s5 + $0x460] sm:$0xff] }
 0x182   : > { %1919 = vmatprep.subr.mxu1 %v4593_v27  ;;  %v4632_v27 = vld [vmem:[%s8422_s5 + $0x348] sm:$0xff] }
 0x183   : > { %1920 = vmatpush2.msra.mxu1 %v4592_v10  ;;  %v4630_v10 = vld [vmem:[%s8422_s5 + $0x338] sm:$0xff]  ;;  %2295 = vmatpush1.msra.mxu0 %v4632_v27 }
 0x184   : > { %1921 = vmatprep.subr.mxu1 %v4591_v23  ;;  %v4631_v23 = vld [vmem:[%s8422_s5 + $0x340] sm:$0xff]  ;;  %2296 = vmatprep.subr.mxu0 %v4630_v10 }
 0x185   : > { %1922 = vmatpush2.msra.mxu1 %v4590_v28  ;;  %v4629_v28 = vld [vmem:[%s8422_s5 + $0x330] sm:$0xff] }
 0x186   : > { %1923 = vmatprep.subr.mxu1 %v4589_v30  ;;  %v4627_v30 = vld [vmem:[%s8422_s5 + $0x320] sm:$0xff]  ;;  %2297 = vmatpush1.msra.mxu0 %v4629_v28 }
 0x187   : > { %1924 = vmatpush2.msra.mxu1 %v4588_v32  ;;  %v4628_v32 = vld [vmem:[%s8422_s5 + $0x328] sm:$0xff]  ;;  %2298 = vmatprep.subr.mxu0 %v4627_v30 }
 0x188   : > { %1925 = vmatprep.subr.mxu1 %v4587_v0  ;;  %v4626_v0 = vld [vmem:[%s8422_s5 + $0x318] sm:$0xff] }
 0x189   : > { %1926 = vmatpush2.msra.mxu1 %v4586_v37  ;;  %v4624_v37 = vld [vmem:[%s8422_s5 + $0x308] sm:$0xff]  ;;  %2299 = vmatpush1.msra.mxu0 %v4626_v0 }
 0x18a   : > { %1927 = vmatprep.subr.mxu1 %v4585_v38  ;;  %v4625_v38 = vld [vmem:[%s8422_s5 + $0x310] sm:$0xff]  ;;  %2300 = vmatprep.subr.mxu0 %v4624_v37 }
 0x18b   : > { %1928 = vmatpush2.msra.mxu1 %v4584_v53  ;;  %v4623_v53 = vld [vmem:[%s8422_s5 + $0x300] sm:$0xff] }
 0x18c   : > { %1929 = vmatprep.subr.mxu1 %v4583_v39  ;;  %v4621_v39 = vld [vmem:[%s8422_s5 + $0x2f0] sm:$0xff]  ;;  %2301 = vmatpush1.msra.mxu0 %v4623_v53 }
 0x18d   : > { %1930 = vmatpush2.msra.mxu1 %v4582_v40  ;;  %v4622_v40 = vld [vmem:[%s8422_s5 + $0x2f8] sm:$0xff]  ;;  %2302 = vmatprep.subr.mxu0 %v4621_v39 }
 0x18e   : > { %1931 = vmatprep.subr.mxu1 %v4581_v19  ;;  %v4620_v19 = vld [vmem:[%s8422_s5 + $0x2e8] sm:$0xff] }
 0x18f   : > { %1932 = vmatpush2.msra.mxu1 %v4580_v63  ;;  %v4618_v63 = vld [vmem:[%s8422_s5 + $0x2d8] sm:$0xff]  ;;  %2303 = vmatpush1.msra.mxu0 %v4620_v19 }
 0x190   : > { %1933 = vmatprep.subr.mxu1 %v4579_v44  ;;  %v4617_v44 = vld [vmem:[%s8422_s5 + $0x2d0] sm:$0xff]  ;;  %2304 = vmatprep.subr.mxu0 %v4618_v63 }
 0x191   : > { %1934 = vmatpush2.msra.mxu1 %v4578_v45  ;;  %v4705_v45 = vld [vmem:[%s8422_s5 + $0x590] sm:$0xff]  ;;  %2305 = vmatpush1.msra.mxu0 %v4617_v44 }
 0x192   : > { %1936 = vmatmul.mubr.f32.vlgmr.msra.gmra.mxu1 %v1834_v48  ;;  %2357 = vmatprep.subr.mxu1 %v5508_v16  ;;  %v4702_v48 = vld [vmem:[%s8422_s5 + $0x578] sm:$0xff] }
 0x193   : > { %1941 = vmatprep.mubr.f32.mxu1 %v1844_v24  ;;  %2358 = vmatpush1.msra.mxu1 %v4664_v35  ;;  %v4699_v24 = vld [vmem:[%s8422_s5 + $0x560] sm:$0xff]  ;;  %v4694_v35 = vld [vmem:[%s8422_s5 + $0x538] sm:$0xff] }
 0x194   : > { %2359 = vmatprep.subr.mxu1 %v5508_v16  ;;  %2310 = vmatprep.subr.mxu0 %v4705_v45 }
 0x195   : > { %2360 = vmatpush1.msra.mxu1 %v4661_v36  ;;  %2311 = vmatpush2.msra.mxu0 %v4704_v33  ;;  %v4689_v36 = vld [vmem:[%s8422_s5 + $0x510] sm:$0xff] }
 0x196   : > { %1942 = vmatmul.mubr.f32.gmra.mxu1 %v1842_v34  ;;  %2361 = vmatprep.subr.mxu1 %v5508_v16  ;;  %v4698_v34 = vld [vmem:[%s8422_s5 + $0x558] sm:$0xff] }
 0x197   : > { %1947 = vmatprep.mubr.f32.mxu1 %v1850_v41  ;;  %2362 = vmatpush1.msra.mxu1 %v4658_v52  ;;  %v4696_v41 = vld [vmem:[%s8422_s5 + $0x548] sm:$0xff]  ;;  %v4687_v52 = vld [vmem:[%s8422_s5 + $0x500] sm:$0xff] }
 0x198   : > { %2363 = vmatprep.subr.mxu1 %v5508_v16  ;;  %2312 = vmatprep.subr.mxu0 %v4702_v48 }
 0x199   : > { %2364 = vmatpush1.msra.mxu1 %v4655_v56  ;;  %2313 = vmatpush2.msra.mxu0 %v4701_v50  ;;  %v4684_v56 = vld [vmem:[%s8422_s5 + $0x4e8] sm:$0xff] }
 0x19a   : > { %1948 = vmatmul.mubr.f32.gmra.mxu1 %v1848_v31  ;;  %2365 = vmatprep.subr.mxu1 %v5508_v16  ;;  %v4697_v31 = vld [vmem:[%s8422_s5 + $0x550] sm:$0xff] }
 0x19b   : > { %2366 = vmatpush1.msra.mxu1 %v4652_v59  ;;  %2314 = vmatprep.subr.mxu0 %v4699_v24  ;;  %v4681_v59 = vld [vmem:[%s8422_s5 + $0x4d0] sm:$0xff] }
 0x19c   : > { %2367 = vmatprep.subr.mxu1 %v5508_v16  ;;  %2315 = vmatpush2.msra.mxu0 %v4698_v34 }
 0x19d   : > { %2368 = vmatpush1.msra.mxu1 %v4649_v62  ;;  %2316 = vmatprep.subr.mxu0 %v4696_v41  ;;  %v4678_v62 = vld [vmem:[%s8422_s5 + $0x4b8] sm:$0xff] }
 0x19e   : > { %2369 = vmatprep.subr.mxu1 %v5508_v16  ;;  %2317 = vmatpush2.msra.mxu0 %v4695_v17 }
 0x19f   : > { %2370 = vmatpush1.msra.mxu1 %v4646_v1  ;;  %2318 = vmatprep.subr.mxu0 %v4693_v42  ;;  %v4675_v1 = vld [vmem:[%s8422_s5 + $0x4a0] sm:$0xff] }
 0x1a0   : > { %2371 = vmatprep.subr.mxu1 %v5508_v16  ;;  %2319 = vmatpush2.msra.mxu0 %v4692_v46 }
 0x1a1   : > { %2372 = vmatpush1.msra.mxu1 %v4643_v9  ;;  %2320 = vmatprep.subr.mxu0 %v4690_v49  ;;  %v4672_v9 = vld [vmem:[%s8422_s5 + $0x488] sm:$0xff] }
 0x1a2   : > { %2373 = vmatprep.subr.mxu1 %v5508_v16  ;;  %2321 = vmatpush2.msra.mxu0 %v4689_v36 }
 0x1a3   : > { %2374 = vmatpush1.msra.mxu1 %v4640_v12  ;;  %2322 = vmatprep.subr.mxu0 %v4687_v52  ;;  %v4669_v12 = vld [vmem:[%s8422_s5 + $0x470] sm:$0xff] }
 0x1a4   : > { %2375 = vmatprep.subr.mxu1 %v5508_v16  ;;  %2323 = vmatpush2.msra.mxu0 %v4686_v54 }
 0x1a5   : > { %2376 = vmatpush1.msra.mxu1 %v4637_v21  ;;  %2324 = vmatprep.subr.mxu0 %v4684_v56  ;;  %v4666_v21 = vld [vmem:[%s8422_s5 + $0x458] sm:$0xff] }
 0x1a6   : > { %2377 = vmatprep.subr.mxu1 %v5508_v16  ;;  %2325 = vmatpush2.msra.mxu0 %v4683_v57 }
 0x1a7   : > { %2378 = vmatpush1.msra.mxu1 %v4634_v26  ;;  %2326 = vmatprep.subr.mxu0 %v4681_v59  ;;  %v2113_v26 = vld [vmem:[%s8422_s5 + $0x170] sm:$0xff] }
 0x1a8   : > { %2379 = vmatprep.subr.mxu1 %v5508_v16  ;;  %2327 = vmatpush2.msra.mxu0 %v4680_v60 }
 0x1a9   : > { %2380 = vmatpush1.msra.mxu1 %v4631_v23  ;;  %2328 = vmatprep.subr.mxu0 %v4678_v62 }
 0x1aa   : > { %2381 = vmatprep.subr.mxu1 %v5508_v16  ;;  %2329 = vmatpush2.msra.mxu0 %v4677_v2 }
 0x1ab   : > { %2382 = vmatpush1.msra.mxu1 %v4628_v32  ;;  %2330 = vmatprep.subr.mxu0 %v4675_v1 }
 0x1ac   : > { %2383 = vmatprep.subr.mxu1 %v5508_v16  ;;  %2331 = vmatpush2.msra.mxu0 %v4674_v5 }
 0x1ad   : > { %2384 = vmatpush1.msra.mxu1 %v4625_v38  ;;  %2332 = vmatprep.subr.mxu0 %v4672_v9 }
 0x1ae   : > { %2385 = vmatprep.subr.mxu1 %v5508_v16  ;;  %2333 = vmatpush2.msra.mxu0 %v4671_v11 }
 0x1af   : > { %2386 = vmatpush1.msra.mxu1 %v4622_v40  ;;  %2334 = vmatprep.subr.mxu0 %v4669_v12 }
 0x1b0   : > { %2387 = vmatprep.subr.mxu1 %v5508_v16  ;;  %2335 = vmatpush2.msra.mxu0 %v4668_v13 }
 0x1b1   : > { %2388 = vmatpush1.msra.mxu1 %v4619_v43  ;;  %2336 = vmatprep.subr.mxu0 %v4666_v21 }
 0x1b2   : > { %2393 = vmatprep.subr.mxu1 %v5508_v16  ;;  %2337 = vmatpush2.msra.mxu0 %v4665_v8 }
 0x1b3   : > { %2394 = vmatpush2.msra.mxu1 %v4706_v47  ;;  %2443 = vmatprep.subr.mxu0 %v2113_v26 }
 0x1b4   : > { %2395 = vmatprep.subr.mxu1 %v5508_v16 }
 0x1b5   : > { %2396 = vmatpush2.msra.mxu1 %v4703_v3 }
 0x1b6   : > { %2397 = vmatprep.subr.mxu1 %v5508_v16 }
 0x1b7   : > { %2398 = vmatpush2.msra.mxu1 %v4700_v15 }
 0x1b8   : > { %2399 = vmatprep.subr.mxu1 %v5508_v16 }
 0x1b9   : > { %2400 = vmatpush2.msra.mxu1 %v4697_v31 }
 0x1ba   : > { %2401 = vmatprep.subr.mxu1 %v5508_v16 }
 0x1bb   : > { %2402 = vmatpush2.msra.mxu1 %v4694_v35 }
 0x1bc   : > { %2403 = vmatprep.subr.mxu1 %v5508_v16 }
 0x1bd   : > { %2404 = vmatpush2.msra.mxu1 %v4691_v51 }
 0x1be   : > { %2405 = vmatprep.subr.mxu1 %v5508_v16 }
 0x1bf   : > { %2406 = vmatpush2.msra.mxu1 %v4688_v55  ;;  %v2043_v55 = vld [vmem:[%s8421_s4] sm:$0x3] }
 0x1c0   : > { %2407 = vmatprep.subr.mxu1 %v5508_v16  ;;  %v2052_v59 = vrot.slane %v2043_v55, %v6062_v25  ;;  %v2048_v5 = vrot.slane %v2043_v55, %v6065_v29  ;;  %v2107_v55 = vld [vmem:[%s8422_s5 + $0x140] sm:$0xff] }
 0x1c1   : > { %2408 = vmatpush2.msra.mxu1 %v4685_v58 }
 0x1c2   : > { %2409 = vmatprep.subr.mxu1 %v5508_v16 }
 0x1c3   : > { %2410 = vmatpush2.msra.mxu1 %v4682_v61 }
 0x1c4   : > { %2411 = vmatprep.subr.mxu1 %v5508_v16 }
 0x1c5   : > { %2412 = vmatpush2.msra.mxu1 %v4679_v4 }
 0x1c6   : > { %2413 = vmatprep.subr.mxu1 %v5508_v16 }
 0x1c7   : > { %2414 = vmatpush2.msra.mxu1 %v4676_v7 }
 0x1c8   : > { %2415 = vmatprep.subr.mxu1 %v5508_v16 }
 0x1c9   : > { %2416 = vmatpush2.msra.mxu1 %v4673_v6 }
 0x1ca   : > { %2417 = vmatprep.subr.mxu1 %v5508_v16 }
 0x1cb   : > { %2418 = vmatpush2.msra.mxu1 %v4670_v14 }
 0x1cc   : > { %2419 = vmatprep.subr.mxu1 %v5508_v16 }
 0x1cd   : > { %2420 = vmatpush2.msra.mxu1 %v4667_v20 }
 0x1ce   : > { %2526 = vmatprep.subr.mxu1 %v5508_v16 }
 0x1d0   : > { %v1570_v30 = vpop.f32.mrf.mxu1 }
 0x1d2   : > { %v1572_v0 = vpop.f32.mrf.mxu1 }
 0x1d5   : > { %v1487_v27 = vpop.f32.mrf.mxu0  ;;  %v1576_v38 = vpop.f32.mrf.mxu1 }
 0x1d6   : > { %v1571_v41 = vadd.f32 %v1570_v30, %v1487_v27 }
 0x1d7   : > { %v1489_v10 = vpop.f32.mrf.mxu0  ;;  %v1578_v39 = vpop.f32.mrf.mxu1 }
 0x1d8   : > { %v1573_v31 = vadd.f32 %v1572_v0, %v1489_v10 }
 0x1d9   : > { %v1493_v23 = vpop.f32.mrf.mxu0 }
 0x1da   : > { %v1582_v19 = vpop.f32.mrf.mxu1  ;;  %v1577_v46 = vadd.f32 %v1576_v38, %v1493_v23 }
 0x1db   : > { %v1495_v28 = vpop.f32.mrf.mxu0 }
 0x1dc   : > { %v1584_v43 = vpop.f32.mrf.mxu1  ;;  %v1579_v51 = vadd.f32 %v1578_v39, %v1495_v28 }
 0x1dd   : > { %v1499_v32 = vpop.f32.mrf.mxu0 }
 0x1de   : > { %v1583_v60 = vadd.f32 %v1582_v19, %v1499_v32 }
 0x1df   : > { %v1501_v37 = vpop.f32.mrf.mxu0 }
 0x1e0   : > { %v1585_v4 = vadd.f32 %v1584_v43, %v1501_v37 }
 0x1e1   : > { %v1748_v53 = vpop.f32.mrf.mxu0 }
 0x1e3   : > { %v1750_v40 = vpop.f32.mrf.mxu0 }
 0x1e5   : > { %v1754_v63 = vpop.f32.mrf.mxu0 }
 0x1e7   : > { %v1756_v44 = vpop.f32.mrf.mxu0 }
 0x1e9   : > { %v1760_v47 = vpop.f32.mrf.mxu0 }
 0x1eb   : > { %v1762_v48 = vpop.f32.mrf.mxu0 }
 0x1ed   : > { %v2020_v50 = vpop.f32.mrf.mxu0 }
 0x1ef   : > { %v2022_v15 = vpop.f32.mrf.mxu0 }
 0x1f1   : > { %v2026_v17 = vpop.f32.mrf.mxu0 }
 0x1f3   : > { %v2028_v56 = vpop.f32.mrf.mxu0 }
 0x1f5   : > { %v2032_v13 = vpop.f32.mrf.mxu0 }
 0x1f7   : > { %v2034_v37 = vpop.f32.mrf.mxu0 }
 0x212   : > { %v1665_v45 = vpop.f32.mrf.mxu1 }
 0x213   : > { %v1666_v42 = vadd.f32 %v1665_v45, %v1571_v41 }
 0x214   : > { %v1667_v33 = vpop.f32.mrf.mxu1 }
 0x215   : > { %v1668_v49 = vadd.f32 %v1667_v33, %v1573_v31  ;;  %v1749_v57 = vadd.f32 %v1748_v53, %v1666_v42  ;;  %v2114_v42 = vld [vmem:[%s8422_s5 + $0x178] sm:$0xff] }
 0x216   : > { %v1671_v3 = vpop.f32.mrf.mxu1 }
 0x217   : > { %v1672_v52 = vadd.f32 %v1671_v3, %v1577_v46  ;;  %v1751_v61 = vadd.f32 %v1750_v40, %v1668_v49  ;;  %v2110_v46 = vld [vmem:[%s8422_s5 + $0x158] sm:$0xff]  ;;  %v2109_v49 = vld [vmem:[%s8422_s5 + $0x150] sm:$0xff] }
 0x218   : > { %v1673_v24 = vpop.f32.mrf.mxu1 }
 0x219   : > { %v1674_v62 = vadd.f32 %v1673_v24, %v1579_v51  ;;  %v1755_v9 = vadd.f32 %v1754_v63, %v1672_v52 }
 0x21a   : > { %v1677_v34 = vpop.f32.mrf.mxu1 }
 0x21b   : > { %v1678_v11 = vadd.f32 %v1677_v34, %v1583_v60  ;;  %v1757_v8 = vadd.f32 %v1756_v44, %v1674_v62  ;;  %v2103_v60 = vld [vmem:[%s8422_s5 + $0x120] sm:$0xff]  ;;  %v2101_v62 = vld [vmem:[%s8422_s5 + $0x110] sm:$0xff] }
 0x21c   : > { %v1679_v35 = vpop.f32.mrf.mxu1 }
 0x21d   : > { %v1680_v14 = vadd.f32 %v1679_v35, %v1585_v4  ;;  %v1761_v28 = vadd.f32 %v1760_v47, %v1678_v11  ;;  %v2102_v4 = vld [vmem:[%s8422_s5 + $0x118] sm:$0xff] }
 0x21e   : > { %v2094_v11 = vld [vmem:[%s8422_s5 + $0xd8] sm:$0xff] }
 0x21f   : > { %v1763_v38 = vadd.f32 %v1762_v48, %v1680_v14  ;;  %v2093_v14 = vld [vmem:[%s8422_s5 + $0xd0] sm:$0xff] }
 0x252   : > { %v1937_v36 = vpop.f32.mrf.mxu1 }
 0x253   : > { %v2021_v54 = vadd.f32 %v2020_v50, %v1937_v36  ;;  %v2111_v36 = vld [vmem:[%s8422_s5 + $0x160] sm:$0xff] }
 0x254   : > { %v1939_v58 = vpop.f32.mrf.mxu1 }
 0x255   : > { %v2023_v2 = vadd.f32 %v2022_v15, %v1939_v58  ;;  %v2037_v1 = vadd.f32 %v2021_v54, %v1749_v57  ;;  %v2108_v57 = vld [vmem:[%s8422_s5 + $0x148] sm:$0xff] }
 0x256   : > { %v1943_v7 = vpop.f32.mrf.mxu1 }
 0x257   : > { %v2038_v6 = vadd.f32 %v2023_v2, %v1751_v61  ;;  %v2027_v12 = vadd.f32 %v2026_v17, %v1943_v7  ;;  %v2055_v10 = vadd.f32 %v2048_v5, %v2037_v1  ;;  %v2112_v17 = vld [vmem:[%s8422_s5 + $0x168] sm:$0xff]  ;;  %v2105_v61 = vld [vmem:[%s8422_s5 + $0x130] sm:$0xff]  ;;  %v2098_v1 = vld [vmem:[%s8422_s5 + $0xf8] sm:$0xff] }
 0x258   : > { %v1945_v21 = vpop.f32.mrf.mxu1  ;;  %v2100_v2 = vld [vmem:[%s8422_s5 + $0x108] sm:$0xff]  ;;  %v2099_v7 = vld [vmem:[%s8422_s5 + $0x100] sm:$0xff] }
 0x259   : > { %v2056_v20 = vadd.f32 %v2052_v59, %v2038_v6  ;;  %v2039_v26 = vadd.f32 %v2027_v12, %v1755_v9  ;;  %v2029_v27 = vadd.f32 %v2028_v56, %v1945_v21  ;;  %v6890_v44 = vmax.f32 %v2055_v10, 0.0  ;;  %v2106_v56 = vld [vmem:[%s8422_s5 + $0x138] sm:$0xff]  ;;  %v2095_v9 = vld [vmem:[%s8422_s5 + $0xe0] sm:$0xff]  ;;  %v2096_v6 = vld [vmem:[%s8422_s5 + $0xe8] sm:$0xff] }
 0x25a   : > { %v1949_v23 = vpop.f32.mrf.mxu1  ;;  %v2092_v12 = vld [vmem:[%s8422_s5 + $0xc8] sm:$0xff]  ;;  %v2089_v21 = vld [vmem:[%s8422_s5 + $0xb0] sm:$0xff]  ;;  %v2087_v10 = vld [vmem:[%s8422_s5 + $0xa0] sm:$0xff] }
 0x25b   : > { %v2057_v30 = vadd.f32 %v2048_v5, %v2039_v26  ;;  %v2040_v32 = vadd.f32 %v2029_v27, %v1757_v8  ;;  %v2033_v0 = vadd.f32 %v2032_v13, %v1949_v23  ;;  %v6886_v53 = vmax.f32 %v2056_v20, 0.0  ;;  %v2091_v13 = vld [vmem:[%s8422_s5 + $0xc0] sm:$0xff]  ;;  %v2088_v8 = vld [vmem:[%s8422_s5 + $0xa8] sm:$0xff]  ;;  %v2090_v20 = vld [vmem:[%s8422_s5 + $0xb8] sm:$0xff] }
 0x25c   : > { %v1951_v39 = vpop.f32.mrf.mxu1  ;;  %v2254_v34 = vrot.slane %v6890_v44, 1  ;;  %v2086_v26 = vld [vmem:[%s8422_s5 + $0x98] sm:$0xff]  ;;  %v2085_v27 = vld [vmem:[%s8422_s5 + $0x90] sm:$0xff]  ;;  %v2083_v23 = vld [vmem:[%s8422_s5 + $0x80] sm:$0xff] }
 0x25d   : > { %v6888_v40 = vmax.f32 %v2057_v30, 0.0  ;;  %v2058_v19 = vadd.f32 %v2052_v59, %v2040_v32  ;;  %v2041_v63 = vadd.f32 %v2033_v0, %v1761_v28  ;;  %v2035_v43 = vadd.f32 %v2034_v37, %v1951_v39  ;;  %v2082_v28 = vld [vmem:[%s8422_s5 + $0x78] sm:$0xff]  ;;  %v2084_v30 = vld [vmem:[%s8422_s5 + $0x88] sm:$0xff]  ;;  %v2079_v0 = vld [vmem:[%s8422_s5 + $0x60] sm:$0xff] }
 0x25e   : > { %v2257_v24 = vrot.slane %v6886_v53, 1  ;;  %v2080_v32 = vld [vmem:[%s8422_s5 + $0x68] sm:$0xff]  ;;  %v2081_v37 = vld [vmem:[%s8422_s5 + $0x70] sm:$0xff] }
 0x25f   : > { %v6892_v45 = vmax.f32 %v2058_v19, 0.0  ;;  %v2059_v33 = vadd.f32 %v2048_v5, %v2041_v63  ;;  %v2042_v3 = vadd.f32 %v2035_v43, %v1763_v38  ;;  %v2255_v47 = vrot.slane %v6888_v40, 1  ;;  %v2097_v5 = vld [vmem:[%s8422_s5 + $0xf0] sm:$0xff]  ;;  %v2076_v39 = vld [vmem:[%s8422_s5 + $0x48] sm:$0xff]  ;;  %v2078_v19 = vld [vmem:[%s8422_s5 + $0x58] sm:$0xff] }
 0x260   : > { %v2077_v38 = vld [vmem:[%s8422_s5 + $0x50] sm:$0xff]  ;;  %v2074_v63 = vld [vmem:[%s8422_s5 + $0x38] sm:$0xff] }
 0x261   : > { %v2060_v50 = vadd.f32 %v2052_v59, %v2042_v3  ;;  %v2258_v48 = vrot.slane %v6892_v45, 1  ;;  %v6897_v15 = vmax.f32 %v2059_v33, 0.0  ;;  %v2256_v35 = vsel %vm579_vm1, %v2254_v34, %v2255_v47  ;;  %v2104_v59 = vld [vmem:[%s8422_s5 + $0x128] sm:$0xff]  ;;  %v2073_v43 = vld [vmem:[%s8422_s5 + $0x30] sm:$0xff]  ;;  %v2075_v33 = vld [vmem:[%s8422_s5 + $0x40] sm:$0xff] }
 0x262   : > { %v2071_v3 = vld [vmem:[%s8422_s5 + $0x20] sm:$0xff]  ;;  %v2069_v34 = vld [vmem:[%s8422_s5 + $0x10] sm:$0xff] }
 0x263   : > { %v6900_v41 = vmax.f32 %v2060_v50, 0.0  ;;  %v2259_v31 = vsel %vm579_vm1, %v2257_v24, %v2258_v48  ;;  %v2260_v52 = vrot.slane %v6897_v15, 1  ;;  %v2072_v50 = vld [vmem:[%s8422_s5 + $0x28] sm:$0xff] }
 0x264   : > { %4707 = vmatprep.mubr.msk.f32.mxu0 %vm2267_vm5, %v2259_v31  ;;  %4710 = vmatprep.mubr.msk.f32.mxu1 %vm2267_vm5, %v2259_v31  ;;  %v2068_v24 = vld [vmem:[%s8422_s5 + $0x8] sm:$0xff]  ;;  %v2155_v31 = vld [vmem:[%s8422_s5 + $0x2c0] sm:$0xff] }
 0x265   : > { %2339 = vmatmul.mubr.f32.vlgmr.msra.gmra.mxu0 %v2256_v35  ;;  %2422 = vmatmul.mubr.f32.vlgmr.msra.gmra.mxu1 %v2256_v35  ;;  %v2262_v51 = vrot.slane %v6900_v41, 1  ;;  %v2261_v58 = vsel %vm579_vm1, %v2255_v47, %v2260_v52  ;;  %v2070_v47 = vld [vmem:[%s8422_s5 + $0x18] sm:$0xff]  ;;  %v2152_v35 = vld [vmem:[%s8422_s5 + $0x2a8] sm:$0xff] }
 0x266   : > { %2444 = vmatpush1.msra.mxu0 %v2112_v17  ;;  %2527 = vmatpush1.msra.mxu1 %v2114_v42  ;;  %v2154_v17 = vld [vmem:[%s8422_s5 + $0x2b8] sm:$0xff]  ;;  %v2156_v42 = vld [vmem:[%s8422_s5 + $0x2c8] sm:$0xff] }
 0x267   : > { %2445 = vmatprep.subr.mxu0 %v2110_v46  ;;  %2528 = vmatprep.subr.mxu1 %v5508_v16  ;;  %v2263_v54 = vsel %vm579_vm1, %v2258_v48, %v2262_v51  ;;  %v2067_v48 = vld [vmem:[%s8422_s5] sm:$0xff] }
 0x268   : > { %2446 = vmatpush1.msra.mxu0 %v2109_v49  ;;  %2529 = vmatpush1.msra.mxu1 %v2111_v36  ;;  %v2151_v46 = vld [vmem:[%s8422_s5 + $0x2a0] sm:$0xff]  ;;  %v2153_v49 = vld [vmem:[%s8422_s5 + $0x2b0] sm:$0xff] }
 0x269   : > { %4708 = vmatprep.mubr.msk.f32.mxu0 %vm2267_vm5, %v2263_v54  ;;  %4711 = vmatprep.mubr.msk.f32.mxu1 %vm2267_vm5, %v2263_v54  ;;  %v2149_v36 = vld [vmem:[%s8422_s5 + $0x290] sm:$0xff]  ;;  %v2146_v54 = vld [vmem:[%s8422_s5 + $0x278] sm:$0xff] }
 0x26a   : > { %2447 = vmatprep.subr.mxu0 %v2107_v55  ;;  %2530 = vmatprep.subr.mxu1 %v5508_v16  ;;  %v2145_v55 = vld [vmem:[%s8422_s5 + $0x270] sm:$0xff] }
 0x26b   : > { %2345 = vmatmul.mubr.f32.gmra.mxu0 %v2261_v58  ;;  %2427 = vmatmul.mubr.f32.gmra.mxu1 %v2261_v58  ;;  %v2142_v58 = vld [vmem:[%s8422_s5 + $0x258] sm:$0xff] }
 0x26c   : > { %2448 = vmatpush1.msra.mxu0 %v2106_v56  ;;  %2531 = vmatpush1.msra.mxu1 %v2108_v57  ;;  %v2147_v56 = vld [vmem:[%s8422_s5 + $0x280] sm:$0xff] }
 0x26d   : > { %4709 = vmatprep.mubr.msk.f32.mxu0 %vm2267_vm5, %v2262_v51  ;;  %4712 = vmatprep.mubr.msk.f32.mxu1 %vm2267_vm5, %v2262_v51  ;;  %v2148_v51 = vld [vmem:[%s8422_s5 + $0x288] sm:$0xff]  ;;  %v2143_v57 = vld [vmem:[%s8422_s5 + $0x260] sm:$0xff] }
 0x26e   : > { %2449 = vmatprep.subr.mxu0 %v2104_v59  ;;  %2532 = vmatprep.subr.mxu1 %v5508_v16  ;;  %v2144_v59 = vld [vmem:[%s8422_s5 + $0x268] sm:$0xff] }
 0x26f   : > { %2450 = vmatpush1.msra.mxu0 %v2103_v60  ;;  %2533 = vmatpush1.msra.mxu1 %v2105_v61  ;;  %v2140_v60 = vld [vmem:[%s8422_s5 + $0x248] sm:$0xff]  ;;  %v2139_v61 = vld [vmem:[%s8422_s5 + $0x240] sm:$0xff] }
 0x270   : > { %2451 = vmatprep.subr.mxu0 %v2101_v62  ;;  %2534 = vmatprep.subr.mxu1 %v5508_v16  ;;  %v2141_v62 = vld [vmem:[%s8422_s5 + $0x250] sm:$0xff] }
 0x271   : > { %2351 = vmatmul.mubr.f32.gmra.mxu0 %v2260_v52  ;;  %2432 = vmatmul.mubr.f32.gmra.mxu1 %v2260_v52  ;;  %v2150_v52 = vld [vmem:[%s8422_s5 + $0x298] sm:$0xff] }
 0x272   : > { %2452 = vmatpush1.msra.mxu0 %v2100_v2  ;;  %2535 = vmatpush1.msra.mxu1 %v2102_v4  ;;  %v2137_v2 = vld [vmem:[%s8422_s5 + $0x230] sm:$0xff]  ;;  %v2136_v4 = vld [vmem:[%s8422_s5 + $0x228] sm:$0xff] }
 0x273   : > { %2453 = vmatprep.subr.mxu0 %v2098_v1  ;;  %4713 = vmatprep.mubr.msk.f32.mxu0 %vm2267_vm5, %v6886_v53  ;;  %v2138_v1 = vld [vmem:[%s8422_s5 + $0x238] sm:$0xff] }
 0x274   : > { %2536 = vmatprep.subr.mxu1 %v5508_v16  ;;  %4716 = vmatprep.mubr.msk.f32.mxu1 %vm2267_vm5, %v6886_v53 }
 0x275   : > { %2454 = vmatpush1.msra.mxu0 %v2097_v5  ;;  %2537 = vmatpush1.msra.mxu1 %v2099_v7  ;;  %v2134_v5 = vld [vmem:[%s8422_s5 + $0x218] sm:$0xff]  ;;  %v2133_v7 = vld [vmem:[%s8422_s5 + $0x210] sm:$0xff] }
 0x276   : > { %2455 = vmatprep.subr.mxu0 %v2095_v9  ;;  %2538 = vmatprep.subr.mxu1 %v5508_v16  ;;  %v2135_v9 = vld [vmem:[%s8422_s5 + $0x220] sm:$0xff] }
 0x277   : > { %2456 = vmatpush1.msra.mxu0 %v2094_v11  ;;  %2539 = vmatpush1.msra.mxu1 %v2096_v6  ;;  %v2131_v11 = vld [vmem:[%s8422_s5 + $0x200] sm:$0xff]  ;;  %v2130_v6 = vld [vmem:[%s8422_s5 + $0x1f8] sm:$0xff] }
 0x278   : > { %2457 = vmatprep.subr.mxu0 %v2092_v12  ;;  %2540 = vmatprep.subr.mxu1 %v5508_v16  ;;  %v2132_v12 = vld [vmem:[%s8422_s5 + $0x208] sm:$0xff] }
 0x279   : > { %2458 = vmatpush1.msra.mxu0 %v2091_v13  ;;  %2541 = vmatpush1.msra.mxu1 %v2093_v14  ;;  %v2128_v13 = vld [vmem:[%s8422_s5 + $0x1e8] sm:$0xff]  ;;  %v2127_v14 = vld [vmem:[%s8422_s5 + $0x1e0] sm:$0xff] }
 0x27a   : > { %2459 = vmatprep.subr.mxu0 %v2089_v21  ;;  %2542 = vmatprep.subr.mxu1 %v5508_v16  ;;  %v2129_v21 = vld [vmem:[%s8422_s5 + $0x1f0] sm:$0xff] }
 0x27b   : > { %2460 = vmatpush1.msra.mxu0 %v2088_v8  ;;  %2543 = vmatpush1.msra.mxu1 %v2090_v20  ;;  %v2125_v8 = vld [vmem:[%s8422_s5 + $0x1d0] sm:$0xff]  ;;  %v2124_v20 = vld [vmem:[%s8422_s5 + $0x1c8] sm:$0xff] }
 0x27c   : > { %2461 = vmatprep.subr.mxu0 %v2086_v26  ;;  %2544 = vmatprep.subr.mxu1 %v5508_v16  ;;  %v2126_v26 = vld [vmem:[%s8422_s5 + $0x1d8] sm:$0xff] }
 0x27d   : > { %2462 = vmatpush1.msra.mxu0 %v2085_v27  ;;  %2545 = vmatpush1.msra.mxu1 %v2087_v10  ;;  %v2122_v27 = vld [vmem:[%s8422_s5 + $0x1b8] sm:$0xff]  ;;  %v2121_v10 = vld [vmem:[%s8422_s5 + $0x1b0] sm:$0xff] }
 0x27e   : > { %2463 = vmatprep.subr.mxu0 %v2083_v23  ;;  %2546 = vmatprep.subr.mxu1 %v5508_v16  ;;  %v2123_v23 = vld [vmem:[%s8422_s5 + $0x1c0] sm:$0xff] }
 0x27f   : > { %2464 = vmatpush1.msra.mxu0 %v2082_v28  ;;  %2547 = vmatpush1.msra.mxu1 %v2084_v30  ;;  %v2119_v28 = vld [vmem:[%s8422_s5 + $0x1a0] sm:$0xff]  ;;  %v2118_v30 = vld [vmem:[%s8422_s5 + $0x198] sm:$0xff] }
 0x280   : > { %2465 = vmatprep.subr.mxu0 %v2080_v32  ;;  %2548 = vmatprep.subr.mxu1 %v5508_v16  ;;  %v2120_v32 = vld [vmem:[%s8422_s5 + $0x1a8] sm:$0xff] }
 0x281   : > { %2466 = vmatpush1.msra.mxu0 %v2079_v0  ;;  %2549 = vmatpush1.msra.mxu1 %v2081_v37  ;;  %v2116_v0 = vld [vmem:[%s8422_s5 + $0x188] sm:$0xff]  ;;  %v2115_v37 = vld [vmem:[%s8422_s5 + $0x180] sm:$0xff] }
 0x282   : > { %2467 = vmatprep.subr.mxu0 %v2077_v38  ;;  %2550 = vmatprep.subr.mxu1 %v5508_v16  ;;  %v2117_v38 = vld [vmem:[%s8422_s5 + $0x190] sm:$0xff] }
 0x283   : > { %2468 = vmatpush1.msra.mxu0 %v2076_v39  ;;  %2551 = vmatpush1.msra.mxu1 %v2078_v19  ;;  %v4765_v39 = vld [vmem:[%s8422_s5 + $0x710] sm:$0xff]  ;;  %v4764_v19 = vld [vmem:[%s8422_s5 + $0x708] sm:$0xff] }
 0x284   : > { %2469 = vmatprep.subr.mxu0 %v2074_v63  ;;  %2552 = vmatprep.subr.mxu1 %v5508_v16  ;;  %v4766_v63 = vld [vmem:[%s8422_s5 + $0x718] sm:$0xff] }
 0x285   : > { %2470 = vmatpush1.msra.mxu0 %v2073_v43  ;;  %2553 = vmatpush1.msra.mxu1 %v2075_v33  ;;  %v4762_v43 = vld [vmem:[%s8422_s5 + $0x6f8] sm:$0xff]  ;;  %v4761_v33 = vld [vmem:[%s8422_s5 + $0x6f0] sm:$0xff] }
 0x286   : > { %2471 = vmatprep.subr.mxu0 %v2071_v3  ;;  %2554 = vmatprep.subr.mxu1 %v5508_v16  ;;  %v4763_v3 = vld [vmem:[%s8422_s5 + $0x700] sm:$0xff] }
 0x287   : > { %2472 = vmatpush1.msra.mxu0 %v2070_v47  ;;  %2555 = vmatpush1.msra.mxu1 %v2072_v50  ;;  %v4759_v47 = vld [vmem:[%s8422_s5 + $0x6e0] sm:$0xff]  ;;  %v4758_v50 = vld [vmem:[%s8422_s5 + $0x6d8] sm:$0xff] }
 0x288   : > { %2473 = vmatprep.subr.mxu0 %v2068_v24  ;;  %2556 = vmatprep.subr.mxu1 %v5508_v16  ;;  %v4760_v24 = vld [vmem:[%s8422_s5 + $0x6e8] sm:$0xff] }
 0x289   : > { %2474 = vmatpush1.msra.mxu0 %v2067_v48  ;;  %2557 = vmatpush1.msra.mxu1 %v2069_v34  ;;  %v4756_v48 = vld [vmem:[%s8422_s5 + $0x6c8] sm:$0xff]  ;;  %v4755_v34 = vld [vmem:[%s8422_s5 + $0x6c0] sm:$0xff] }
 0x28a   : > { %2479 = vmatprep.subr.mxu0 %v2155_v31  ;;  %2562 = vmatprep.subr.mxu1 %v5508_v16  ;;  %v4757_v31 = vld [vmem:[%s8422_s5 + $0x6d0] sm:$0xff] }
 0x28b   : > { %2480 = vmatpush2.msra.mxu0 %v2154_v17  ;;  %2563 = vmatpush2.msra.mxu1 %v2156_v42  ;;  %v2701_v17 = vrot.slane %v6892_v45, 2  ;;  %v4753_v42 = vld [vmem:[%s8422_s5 + $0x6b0] sm:$0xff] }
 0x28c   : > { %2481 = vmatprep.subr.mxu0 %v2152_v35  ;;  %2564 = vmatprep.subr.mxu1 %v5508_v16  ;;  %v4752_v35 = vld [vmem:[%s8422_s5 + $0x6a8] sm:$0xff] }
 0x28d   : > { %2482 = vmatpush2.msra.mxu0 %v2151_v46  ;;  %2565 = vmatpush2.msra.mxu1 %v2153_v49  ;;  %v2700_v46 = vrot.slane %v6886_v53, 2  ;;  %v4754_v49 = vld [vmem:[%s8422_s5 + $0x6b8] sm:$0xff]  ;;  %v4749_v53 = vld [vmem:[%s8422_s5 + $0x690] sm:$0xff] }
 0x28e   : > { %2483 = vmatprep.subr.mxu0 %v2149_v36  ;;  %2566 = vmatprep.subr.mxu1 %v5508_v16 }
 0x28f   : > { %2484 = vmatpush2.msra.mxu0 %v2148_v51  ;;  %2567 = vmatpush2.msra.mxu1 %v2150_v52  ;;  %v2702_v36 = vsel %vm984_vm3, %v2700_v46, %v2701_v17  ;;  %v4750_v51 = vld [vmem:[%s8422_s5 + $0x698] sm:$0xff]  ;;  %v4751_v52 = vld [vmem:[%s8422_s5 + $0x6a0] sm:$0xff]  ;;  %v4793_v46 = vld [vmem:[%s8422_s5 + $0x7f0] sm:$0xff] }
 0x290   : > { %2485 = vmatprep.subr.mxu0 %v2146_v54  ;;  %2568 = vmatprep.subr.mxu1 %v5508_v16  ;;  %v4747_v54 = vld [vmem:[%s8422_s5 + $0x680] sm:$0xff] }
 0x291   : > { %2486 = vmatpush2.msra.mxu0 %v2145_v55  ;;  %2569 = vmatpush2.msra.mxu1 %v2147_v56  ;;  %v4746_v55 = vld [vmem:[%s8422_s5 + $0x678] sm:$0xff]  ;;  %v4748_v56 = vld [vmem:[%s8422_s5 + $0x688] sm:$0xff] }
 0x292   : > { %2487 = vmatprep.subr.mxu0 %v2143_v57  ;;  %2570 = vmatprep.subr.mxu1 %v5508_v16  ;;  %v4744_v57 = vld [vmem:[%s8422_s5 + $0x668] sm:$0xff] }
 0x293   : > { %2488 = vmatpush2.msra.mxu0 %v2142_v58  ;;  %2571 = vmatpush2.msra.mxu1 %v2144_v59  ;;  %v4743_v58 = vld [vmem:[%s8422_s5 + $0x660] sm:$0xff]  ;;  %v4745_v59 = vld [vmem:[%s8422_s5 + $0x670] sm:$0xff] }
 0x294   : > { %2489 = vmatprep.subr.mxu0 %v2140_v60  ;;  %2572 = vmatprep.subr.mxu1 %v5508_v16  ;;  %v4741_v60 = vld [vmem:[%s8422_s5 + $0x650] sm:$0xff] }
 0x295   : > { %2490 = vmatpush2.msra.mxu0 %v2139_v61  ;;  %2573 = vmatpush2.msra.mxu1 %v2141_v62  ;;  %v4740_v61 = vld [vmem:[%s8422_s5 + $0x648] sm:$0xff]  ;;  %v4742_v62 = vld [vmem:[%s8422_s5 + $0x658] sm:$0xff] }
 0x296   : > { %2491 = vmatprep.subr.mxu0 %v2137_v2  ;;  %2574 = vmatprep.subr.mxu1 %v5508_v16  ;;  %v4738_v2 = vld [vmem:[%s8422_s5 + $0x638] sm:$0xff] }
 0x297   : > { %2492 = vmatpush2.msra.mxu0 %v2136_v4  ;;  %2575 = vmatpush2.msra.mxu1 %v2138_v1  ;;  %v4737_v4 = vld [vmem:[%s8422_s5 + $0x630] sm:$0xff]  ;;  %v4739_v1 = vld [vmem:[%s8422_s5 + $0x640] sm:$0xff] }
 0x298   : > { %2493 = vmatprep.subr.mxu0 %v2134_v5  ;;  %2576 = vmatprep.subr.mxu1 %v5508_v16  ;;  %v4735_v5 = vld [vmem:[%s8422_s5 + $0x620] sm:$0xff] }
 0x299   : > { %2494 = vmatpush2.msra.mxu0 %v2133_v7  ;;  %2577 = vmatpush2.msra.mxu1 %v2135_v9  ;;  %v4734_v7 = vld [vmem:[%s8422_s5 + $0x618] sm:$0xff]  ;;  %v4736_v9 = vld [vmem:[%s8422_s5 + $0x628] sm:$0xff] }
 0x29a   : > { %2495 = vmatprep.subr.mxu0 %v2131_v11  ;;  %2578 = vmatprep.subr.mxu1 %v5508_v16  ;;  %v4732_v11 = vld [vmem:[%s8422_s5 + $0x608] sm:$0xff] }
 0x29b   : > { %2496 = vmatpush2.msra.mxu0 %v2130_v6  ;;  %2579 = vmatpush2.msra.mxu1 %v2132_v12  ;;  %v4731_v6 = vld [vmem:[%s8422_s5 + $0x600] sm:$0xff]  ;;  %v4733_v12 = vld [vmem:[%s8422_s5 + $0x610] sm:$0xff] }
 0x29c   : > { %2497 = vmatprep.subr.mxu0 %v2128_v13  ;;  %2580 = vmatprep.subr.mxu1 %v5508_v16  ;;  %v4729_v13 = vld [vmem:[%s8422_s5 + $0x5f0] sm:$0xff] }
 0x29d   : > { %2498 = vmatpush2.msra.mxu0 %v2127_v14  ;;  %2581 = vmatpush2.msra.mxu1 %v2129_v21  ;;  %v4728_v14 = vld [vmem:[%s8422_s5 + $0x5e8] sm:$0xff]  ;;  %v4730_v21 = vld [vmem:[%s8422_s5 + $0x5f8] sm:$0xff] }
 0x29e   : > { %2499 = vmatprep.subr.mxu0 %v2125_v8  ;;  %2582 = vmatprep.subr.mxu1 %v5508_v16  ;;  %v4726_v8 = vld [vmem:[%s8422_s5 + $0x5d8] sm:$0xff] }
 0x29f   : > { %2500 = vmatpush2.msra.mxu0 %v2124_v20  ;;  %2583 = vmatpush2.msra.mxu1 %v2126_v26  ;;  %v4725_v20 = vld [vmem:[%s8422_s5 + $0x5d0] sm:$0xff]  ;;  %v4727_v26 = vld [vmem:[%s8422_s5 + $0x5e0] sm:$0xff] }
 0x2a0   : > { %2501 = vmatprep.subr.mxu0 %v2122_v27  ;;  %2584 = vmatprep.subr.mxu1 %v5508_v16  ;;  %v4723_v27 = vld [vmem:[%s8422_s5 + $0x5c0] sm:$0xff] }
 0x2a1   : > { %2502 = vmatpush2.msra.mxu0 %v2121_v10  ;;  %2585 = vmatpush2.msra.mxu1 %v2123_v23  ;;  %v4722_v10 = vld [vmem:[%s8422_s5 + $0x5b8] sm:$0xff]  ;;  %v4724_v23 = vld [vmem:[%s8422_s5 + $0x5c8] sm:$0xff] }
 0x2a2   : > { %2503 = vmatprep.subr.mxu0 %v2119_v28  ;;  %2586 = vmatprep.subr.mxu1 %v5508_v16  ;;  %v4720_v28 = vld [vmem:[%s8422_s5 + $0x5a8] sm:$0xff] }
 0x2a3   : > { %2504 = vmatpush2.msra.mxu0 %v2118_v30  ;;  %2587 = vmatpush2.msra.mxu1 %v2120_v32  ;;  %v4719_v30 = vld [vmem:[%s8422_s5 + $0x5a0] sm:$0xff]  ;;  %v4721_v32 = vld [vmem:[%s8422_s5 + $0x5b0] sm:$0xff] }
 0x2a4   : > { %2505 = vmatprep.subr.mxu0 %v2116_v0  ;;  %2588 = vmatprep.subr.mxu1 %v5508_v16  ;;  %v4807_v0 = vld [vmem:[%s8422_s5 + $0x860] sm:$0xff] }
 0x2a5   : > { %2506 = vmatpush2.msra.mxu0 %v2115_v37  ;;  %2589 = vmatpush2.msra.mxu1 %v2117_v38  ;;  %v4806_v37 = vld [vmem:[%s8422_s5 + $0x858] sm:$0xff]  ;;  %v4808_v38 = vld [vmem:[%s8422_s5 + $0x868] sm:$0xff] }
 0x2a6   : > { %2508 = vmatmul.mubr.f32.vlgmr.msra.gmra.mxu0 %v6890_v44  ;;  %2591 = vmatmul.mubr.f32.vlgmr.msra.gmra.mxu1 %v6890_v44 }
 0x2a7   : > { %2716 = vmatprep.subr.mxu0 %v4765_v39  ;;  %2799 = vmatprep.subr.mxu1 %v5508_v16  ;;  %v4804_v39 = vld [vmem:[%s8422_s5 + $0x848] sm:$0xff] }
 0x2a8   : > { %4714 = vmatprep.mubr.msk.f32.mxu0 %vm2267_vm5, %v6892_v45  ;;  %4717 = vmatprep.mubr.msk.f32.mxu1 %vm2267_vm5, %v6892_v45 }
 0x2a9   : > { %2717 = vmatpush1.msra.mxu0 %v4764_v19  ;;  %2800 = vmatpush1.msra.mxu1 %v4766_v63  ;;  %v4803_v19 = vld [vmem:[%s8422_s5 + $0x840] sm:$0xff]  ;;  %v4805_v63 = vld [vmem:[%s8422_s5 + $0x850] sm:$0xff] }
 0x2aa   : > { %2718 = vmatprep.subr.mxu0 %v4762_v43  ;;  %2801 = vmatprep.subr.mxu1 %v5508_v16  ;;  %v4801_v43 = vld [vmem:[%s8422_s5 + $0x830] sm:$0xff] }
 0x2ab   : > { %2719 = vmatpush1.msra.mxu0 %v4761_v33  ;;  %2802 = vmatpush1.msra.mxu1 %v4763_v3  ;;  %v4800_v33 = vld [vmem:[%s8422_s5 + $0x828] sm:$0xff]  ;;  %v4802_v3 = vld [vmem:[%s8422_s5 + $0x838] sm:$0xff] }
 0x2ac   : > { %2514 = vmatmul.mubr.f32.gmra.mxu0 %v6888_v40  ;;  %2596 = vmatmul.mubr.f32.gmra.mxu1 %v6888_v40 }
 0x2ad   : > { %2720 = vmatprep.subr.mxu0 %v4759_v47  ;;  %2803 = vmatprep.subr.mxu1 %v5508_v16  ;;  %v4798_v47 = vld [vmem:[%s8422_s5 + $0x818] sm:$0xff] }
 0x2ae   : > { %4715 = vmatprep.mubr.msk.f32.mxu0 %vm2267_vm5, %v6900_v41  ;;  %4718 = vmatprep.mubr.msk.f32.mxu1 %vm2267_vm5, %v6900_v41 }
 0x2af   : > { %2721 = vmatpush1.msra.mxu0 %v4758_v50  ;;  %2804 = vmatpush1.msra.mxu1 %v4760_v24  ;;  %v4797_v50 = vld [vmem:[%s8422_s5 + $0x810] sm:$0xff]  ;;  %v4799_v24 = vld [vmem:[%s8422_s5 + $0x820] sm:$0xff] }
 0x2b0   : > { %2722 = vmatprep.subr.mxu0 %v4756_v48  ;;  %2805 = vmatprep.subr.mxu1 %v5508_v16  ;;  %v4795_v48 = vld [vmem:[%s8422_s5 + $0x800] sm:$0xff] }
 0x2b1   : > { %2723 = vmatpush1.msra.mxu0 %v4755_v34  ;;  %2806 = vmatpush1.msra.mxu1 %v4757_v31  ;;  %v4794_v34 = vld [vmem:[%s8422_s5 + $0x7f8] sm:$0xff]  ;;  %v4796_v31 = vld [vmem:[%s8422_s5 + $0x808] sm:$0xff] }
 0x2b2   : > { %2520 = vmatmul.mubr.f32.gmra.mxu0 %v6897_v15  ;;  %2601 = vmatmul.mubr.f32.gmra.mxu1 %v6897_v15 }
 0x2b3   : > { %2724 = vmatprep.subr.mxu0 %v4753_v42  ;;  %2807 = vmatprep.subr.mxu1 %v5508_v16  ;;  %v4792_v42 = vld [vmem:[%s8422_s5 + $0x7e8] sm:$0xff] }
 0x2b4   : > { %2725 = vmatpush1.msra.mxu0 %v4752_v35  ;;  %4809 = vmatprep.mubr.msk.f32.mxu0 %vm2267_vm5, %v2702_v36  ;;  %v4791_v35 = vld [vmem:[%s8422_s5 + $0x7e0] sm:$0xff] }
 0x2b5   : > { %2808 = vmatpush1.msra.mxu1 %v4754_v49  ;;  %4812 = vmatprep.mubr.msk.f32.mxu1 %vm2267_vm5, %v2702_v36  ;;  %v4789_v49 = vld [vmem:[%s8422_s5 + $0x7d0] sm:$0xff]  ;;  %v4788_v36 = vld [vmem:[%s8422_s5 + $0x7c8] sm:$0xff] }
 0x2b6   : > { %2726 = vmatprep.subr.mxu0 %v4750_v51  ;;  %2809 = vmatprep.subr.mxu1 %v5508_v16  ;;  %v4790_v51 = vld [vmem:[%s8422_s5 + $0x7d8] sm:$0xff] }
 0x2b7   : > { %2727 = vmatpush1.msra.mxu0 %v4749_v53  ;;  %2810 = vmatpush1.msra.mxu1 %v4751_v52  ;;  %v4786_v53 = vld [vmem:[%s8422_s5 + $0x7b8] sm:$0xff]  ;;  %v4785_v52 = vld [vmem:[%s8422_s5 + $0x7b0] sm:$0xff] }
 0x2b8   : > { %2728 = vmatprep.subr.mxu0 %v4747_v54  ;;  %2811 = vmatprep.subr.mxu1 %v5508_v16  ;;  %v4787_v54 = vld [vmem:[%s8422_s5 + $0x7c0] sm:$0xff] }
 0x2b9   : > { %2729 = vmatpush1.msra.mxu0 %v4746_v55  ;;  %2812 = vmatpush1.msra.mxu1 %v4748_v56  ;;  %v4783_v55 = vld [vmem:[%s8422_s5 + $0x7a0] sm:$0xff]  ;;  %v4782_v56 = vld [vmem:[%s8422_s5 + $0x798] sm:$0xff] }
 0x2ba   : > { %2730 = vmatprep.subr.mxu0 %v4744_v57  ;;  %2813 = vmatprep.subr.mxu1 %v5508_v16  ;;  %v4784_v57 = vld [vmem:[%s8422_s5 + $0x7a8] sm:$0xff] }
 0x2bb   : > { %2731 = vmatpush1.msra.mxu0 %v4743_v58  ;;  %2814 = vmatpush1.msra.mxu1 %v4745_v59  ;;  %v4780_v58 = vld [vmem:[%s8422_s5 + $0x788] sm:$0xff]  ;;  %v4779_v59 = vld [vmem:[%s8422_s5 + $0x780] sm:$0xff] }
 0x2bc   : > { %2732 = vmatprep.subr.mxu0 %v4741_v60  ;;  %2815 = vmatprep.subr.mxu1 %v5508_v16  ;;  %v4781_v60 = vld [vmem:[%s8422_s5 + $0x790] sm:$0xff] }
 0x2bd   : > { %2733 = vmatpush1.msra.mxu0 %v4740_v61  ;;  %2816 = vmatpush1.msra.mxu1 %v4742_v62  ;;  %v4777_v61 = vld [vmem:[%s8422_s5 + $0x770] sm:$0xff]  ;;  %v4776_v62 = vld [vmem:[%s8422_s5 + $0x768] sm:$0xff] }
 0x2be   : > { %2734 = vmatprep.subr.mxu0 %v4738_v2  ;;  %2817 = vmatprep.subr.mxu1 %v5508_v16  ;;  %v4778_v2 = vld [vmem:[%s8422_s5 + $0x778] sm:$0xff] }
 0x2bf   : > { %2735 = vmatpush1.msra.mxu0 %v4737_v4  ;;  %2818 = vmatpush1.msra.mxu1 %v4739_v1  ;;  %v4774_v4 = vld [vmem:[%s8422_s5 + $0x758] sm:$0xff]  ;;  %v4773_v1 = vld [vmem:[%s8422_s5 + $0x750] sm:$0xff] }
 0x2c0   : > { %2736 = vmatprep.subr.mxu0 %v4735_v5  ;;  %2819 = vmatprep.subr.mxu1 %v5508_v16  ;;  %v4775_v5 = vld [vmem:[%s8422_s5 + $0x760] sm:$0xff] }
 0x2c1   : > { %2737 = vmatpush1.msra.mxu0 %v4734_v7  ;;  %2820 = vmatpush1.msra.mxu1 %v4736_v9  ;;  %v4771_v7 = vld [vmem:[%s8422_s5 + $0x740] sm:$0xff]  ;;  %v4770_v9 = vld [vmem:[%s8422_s5 + $0x738] sm:$0xff] }
 0x2c2   : > { %2738 = vmatprep.subr.mxu0 %v4732_v11  ;;  %2821 = vmatprep.subr.mxu1 %v5508_v16  ;;  %v4772_v11 = vld [vmem:[%s8422_s5 + $0x748] sm:$0xff] }
 0x2c3   : > { %2739 = vmatpush1.msra.mxu0 %v4731_v6  ;;  %2822 = vmatpush1.msra.mxu1 %v4733_v12  ;;  %v4768_v6 = vld [vmem:[%s8422_s5 + $0x728] sm:$0xff]  ;;  %v2698_v12 = vrot.slane %v6888_v40, 2 }
 0x2c4   : > { %2740 = vmatprep.subr.mxu0 %v4729_v13  ;;  %2823 = vmatprep.subr.mxu1 %v5508_v16  ;;  %v4767_v13 = vld [vmem:[%s8422_s5 + $0x720] sm:$0xff] }
 0x2c5   : > { %2741 = vmatpush1.msra.mxu0 %v4728_v14  ;;  %2824 = vmatpush1.msra.mxu1 %v4730_v21  ;;  %v4769_v14 = vld [vmem:[%s8422_s5 + $0x730] sm:$0xff]  ;;  %v2705_v21 = vrot.slane %v6900_v41, 2 }
 0x2c6   : > { %2742 = vmatprep.subr.mxu0 %v4726_v8  ;;  %2825 = vmatprep.subr.mxu1 %v5508_v16  ;;  %v2697_v8 = vrot.slane %v6890_v44, 2 }
 0x2c7   : > { %2743 = vmatpush1.msra.mxu0 %v4725_v20  ;;  %2826 = vmatpush1.msra.mxu1 %v4727_v26  ;;  %v2703_v20 = vrot.slane %v6897_v15, 2  ;;  %v2706_v26 = vsel %vm984_vm3, %v2701_v17, %v2705_v21 }
 0x2c8   : > { %2744 = vmatprep.subr.mxu0 %v4723_v27  ;;  %2827 = vmatprep.subr.mxu1 %v5508_v16  ;;  %v2699_v40 = vsel %vm984_vm3, %v2697_v8, %v2698_v12 }
 0x2c9   : > { %2745 = vmatpush1.msra.mxu0 %v4722_v10  ;;  %2828 = vmatpush1.msra.mxu1 %v4724_v23  ;;  %v2704_v44 = vsel %vm984_vm3, %v2698_v12, %v2703_v20 }
 0x2ca   : > { %2746 = vmatprep.subr.mxu0 %v4720_v28  ;;  %2829 = vmatprep.subr.mxu1 %v5508_v16 }
 0x2cb   : > { %2747 = vmatpush1.msra.mxu0 %v4719_v30  ;;  %2830 = vmatpush1.msra.mxu1 %v4721_v32 }
 0x2cc   : > { %2752 = vmatprep.subr.mxu0 %v4807_v0  ;;  %2835 = vmatprep.subr.mxu1 %v5508_v16 }
 0x2cd   : > { %2753 = vmatpush2.msra.mxu0 %v4806_v37  ;;  %2836 = vmatpush2.msra.mxu1 %v4808_v38 }
 0x2ce   : > { %2754 = vmatprep.subr.mxu0 %v4804_v39  ;;  %2837 = vmatprep.subr.mxu1 %v5508_v16 }
 0x2cf   : > { %2755 = vmatpush2.msra.mxu0 %v4803_v19  ;;  %2838 = vmatpush2.msra.mxu1 %v4805_v63 }
 0x2d0   : > { %2756 = vmatprep.subr.mxu0 %v4801_v43  ;;  %2839 = vmatprep.subr.mxu1 %v5508_v16 }
 0x2d1   : > { %2757 = vmatpush2.msra.mxu0 %v4800_v33  ;;  %2840 = vmatpush2.msra.mxu1 %v4802_v3 }
 0x2d2   : > { %2758 = vmatprep.subr.mxu0 %v4798_v47  ;;  %2841 = vmatprep.subr.mxu1 %v5508_v16 }
 0x2d3   : > { %2759 = vmatpush2.msra.mxu0 %v4797_v50  ;;  %2842 = vmatpush2.msra.mxu1 %v4799_v24 }
 0x2d4   : > { %2760 = vmatprep.subr.mxu0 %v4795_v48  ;;  %2843 = vmatprep.subr.mxu1 %v5508_v16 }
 0x2d5   : > { %2761 = vmatpush2.msra.mxu0 %v4794_v34  ;;  %2844 = vmatpush2.msra.mxu1 %v4796_v31 }
 0x2d6   : > { %2762 = vmatprep.subr.mxu0 %v4792_v42  ;;  %2845 = vmatprep.subr.mxu1 %v5508_v16 }
 0x2d7   : > { %2763 = vmatpush2.msra.mxu0 %v4791_v35  ;;  %2846 = vmatpush2.msra.mxu1 %v4793_v46  ;;  %v2888_v46 = vld [vmem:[%s8423_s6] sm:$0x7] }
 0x2d8   : > { %2764 = vmatprep.subr.mxu0 %v4789_v49  ;;  %2847 = vmatprep.subr.mxu1 %v5508_v16 }
 0x2d9   : > { %2765 = vmatpush2.msra.mxu0 %v4788_v36  ;;  %2848 = vmatpush2.msra.mxu1 %v4790_v51  ;;  %v2893_v36 = vrot.slane %v2888_v46, %v6065_v29 }
 0x2da   : > { %2766 = vmatprep.subr.mxu0 %v4786_v53  ;;  %2849 = vmatprep.subr.mxu1 %v5508_v16 }
 0x2db   : > { %2767 = vmatpush2.msra.mxu0 %v4785_v52  ;;  %2850 = vmatpush2.msra.mxu1 %v4787_v54 }
 0x2dc   : > { %2768 = vmatprep.subr.mxu0 %v4783_v55  ;;  %2851 = vmatprep.subr.mxu1 %v5508_v16 }
 0x2dd   : > { %2769 = vmatpush2.msra.mxu0 %v4782_v56  ;;  %2852 = vmatpush2.msra.mxu1 %v4784_v57 }
 0x2de   : > { %2770 = vmatprep.subr.mxu0 %v4780_v58  ;;  %2853 = vmatprep.subr.mxu1 %v5508_v16 }
 0x2df   : > { %2771 = vmatpush2.msra.mxu0 %v4779_v59  ;;  %2854 = vmatpush2.msra.mxu1 %v4781_v60 }
 0x2e0   : > { %2772 = vmatprep.subr.mxu0 %v4777_v61  ;;  %2855 = vmatprep.subr.mxu1 %v5508_v16 }
 0x2e1   : > { %2773 = vmatpush2.msra.mxu0 %v4776_v62  ;;  %2856 = vmatpush2.msra.mxu1 %v4778_v2  ;;  %v2901_v62 = vrot.slane %v2888_v46, %v1207_v22 }
 0x2e2   : > { %2774 = vmatprep.subr.mxu0 %v4774_v4  ;;  %2857 = vmatprep.subr.mxu1 %v5508_v16 }
 0x2e3   : > { %2775 = vmatpush2.msra.mxu0 %v4773_v1  ;;  %2858 = vmatpush2.msra.mxu1 %v4775_v5 }
 0x2e4   : > { %2776 = vmatprep.subr.mxu0 %v4771_v7  ;;  %2859 = vmatprep.subr.mxu1 %v5508_v16 }
 0x2e5   : > { %2777 = vmatpush2.msra.mxu0 %v4770_v9  ;;  %2860 = vmatpush2.msra.mxu1 %v4772_v11  ;;  %v2897_v9 = vrot.slane %v2888_v46, %v6062_v25  ;;  %v3098_v46 = vld [vmem:[%s8424_s7 + $0xa0] sm:$0xff] }
 0x2e6   : > { %2778 = vmatprep.subr.mxu0 %v4768_v6  ;;  %2861 = vmatprep.subr.mxu1 %v5508_v16 }
 0x2e7   : > { %2779 = vmatpush2.msra.mxu0 %v4767_v13  ;;  %2862 = vmatpush2.msra.mxu1 %v4769_v14 }
 0x2e8   : > { %2781 = vmatmul.mubr.f32.vlgmr.msra.gmra.mxu0 %v2699_v40  ;;  %2864 = vmatmul.mubr.f32.vlgmr.msra.gmra.mxu1 %v2699_v40 }
 0x2e9   : > { %4810 = vmatprep.mubr.msk.f32.mxu0 %vm2267_vm5, %v2706_v26  ;;  %4813 = vmatprep.mubr.msk.f32.mxu1 %vm2267_vm5, %v2706_v26 }
 0x2ea   : > { %3219 = vmatprep.subr.mxu1 %v5508_v16 }
 0x2ec   : > { %2787 = vmatmul.mubr.f32.gmra.mxu0 %v2704_v44  ;;  %2869 = vmatmul.mubr.f32.gmra.mxu1 %v2704_v44 }
 0x2ed   : > { %4811 = vmatprep.mubr.msk.f32.mxu0 %vm2267_vm5, %v2705_v21  ;;  %4814 = vmatprep.mubr.msk.f32.mxu1 %vm2267_vm5, %v2705_v21 }
 0x2f0   : > { %2793 = vmatmul.mubr.f32.gmra.mxu0 %v2703_v20  ;;  %2874 = vmatmul.mubr.f32.gmra.mxu1 %v2703_v20 }
 0x2f1   : > { %3065 = vmatprep.mubr.f32.mxu0 %v5508_v16 }
 0x325   : > { %v2423_v45 = vpop.f32.mrf.mxu1  ;;  %v2340_v23 = vpop.f32.mrf.mxu0 }
 0x327   : > { %v2425_v15 = vpop.f32.mrf.mxu1  ;;  %v2342_v28 = vpop.f32.mrf.mxu0 }
 0x32b   : > { %v2428_v41 = vpop.f32.mrf.mxu1  ;;  %v2346_v30 = vpop.f32.mrf.mxu0 }
 0x32d   : > { %v2430_v17 = vpop.f32.mrf.mxu1  ;;  %v2348_v32 = vpop.f32.mrf.mxu0 }
 0x331   : > { %v2433_v27 = vpop.f32.mrf.mxu1  ;;  %v2352_v0 = vpop.f32.mrf.mxu0 }
 0x333   : > { %v2435_v10 = vpop.f32.mrf.mxu1  ;;  %v2354_v37 = vpop.f32.mrf.mxu0 }
 0x366   : > { %v2509_v38 = vpop.f32.mrf.mxu0  ;;  %v2592_v39 = vpop.f32.mrf.mxu1 }
 0x367   : > { %v2510_v19 = vadd.f32 %v2509_v38, %v2340_v23  ;;  %v2593_v63 = vadd.f32 %v2592_v39, %v2423_v45  ;;  %v3091_v38 = vld [vmem:[%s8424_s7 + $0x68] sm:$0xff]  ;;  %v3090_v39 = vld [vmem:[%s8424_s7 + $0x60] sm:$0xff] }
 0x368   : > { %v2511_v43 = vpop.f32.mrf.mxu0  ;;  %v2594_v33 = vpop.f32.mrf.mxu1 }
 0x369   : > { %v2512_v26 = vadd.f32 %v2511_v43, %v2342_v28  ;;  %v3087_v43 = vld [vmem:[%s8424_s7 + $0x48] sm:$0xff]  ;;  %v3086_v33 = vld [vmem:[%s8424_s7 + $0x40] sm:$0xff] }
 0x36c   : > { %v2515_v3 = vpop.f32.mrf.mxu0  ;;  %v2597_v47 = vpop.f32.mrf.mxu1 }
 0x36d   : > { %v2516_v50 = vadd.f32 %v2515_v3, %v2346_v30  ;;  %v2598_v57 = vadd.f32 %v2597_v47, %v2428_v41  ;;  %v3085_v3 = vld [vmem:[%s8424_s7 + $0x38] sm:$0xff]  ;;  %v3084_v47 = vld [vmem:[%s8424_s7 + $0x30] sm:$0xff] }
 0x36e   : > { %v2517_v24 = vpop.f32.mrf.mxu0  ;;  %v2599_v48 = vpop.f32.mrf.mxu1 }
 0x36f   : > { %v2518_v60 = vadd.f32 %v2517_v24, %v2348_v32  ;;  %v3082_v24 = vld [vmem:[%s8424_s7 + $0x20] sm:$0xff]  ;;  %v3081_v48 = vld [vmem:[%s8424_s7 + $0x18] sm:$0xff] }
 0x372   : > { %v2521_v34 = vpop.f32.mrf.mxu0  ;;  %v2602_v31 = vpop.f32.mrf.mxu1 }
 0x373   : > { %v2522_v42 = vadd.f32 %v2521_v34, %v2352_v0  ;;  %v2603_v5 = vadd.f32 %v2602_v31, %v2433_v27  ;;  %v3093_v0 = vld [vmem:[%s8424_s7 + $0x78] sm:$0xff]  ;;  %v3080_v34 = vld [vmem:[%s8424_s7 + $0x10] sm:$0xff]  ;;  %v3079_v31 = vld [vmem:[%s8424_s7 + $0x8] sm:$0xff] }
 0x374   : > { %v2604_v35 = vpop.f32.mrf.mxu1  ;;  %v2523_v49 = vpop.f32.mrf.mxu0  ;;  %3220 = vmatpush1.msra.mxu1 %v3093_v0  ;;  %v4826_v0 = vld [vmem:[%s8424_s7 + $0xe8] sm:$0xff] }
 0x375   : > { %v2524_v13 = vadd.f32 %v2523_v49, %v2354_v37  ;;  %v3092_v37 = vld [vmem:[%s8424_s7 + $0x70] sm:$0xff]  ;;  %3221 = vmatprep.subr.mxu1 %v5508_v16  ;;  %v3099_v35 = vld [vmem:[%s8424_s7 + $0xa8] sm:$0xff]  ;;  %v3097_v49 = vld [vmem:[%s8424_s7 + $0x98] sm:$0xff] }
 0x376   : > { %3222 = vmatpush1.msra.mxu1 %v3092_v37  ;;  %v4825_v37 = vld [vmem:[%s8424_s7 + $0xe0] sm:$0xff] }
 0x377   : > { %3223 = vmatprep.subr.mxu1 %v5508_v16 }
 0x378   : > { %3224 = vmatpush1.msra.mxu1 %v3091_v38  ;;  %v4824_v38 = vld [vmem:[%s8424_s7 + $0xd8] sm:$0xff] }
 0x379   : > { %3225 = vmatprep.subr.mxu1 %v5508_v16 }
 0x37a   : > { %3226 = vmatpush1.msra.mxu1 %v3090_v39  ;;  %v4823_v39 = vld [vmem:[%s8424_s7 + $0xd0] sm:$0xff] }
 0x37b   : > { %3227 = vmatprep.subr.mxu1 %v5508_v16 }
 0x3a8   : > { %v2782_v51 = vpop.f32.mrf.mxu0  ;;  %v2865_v53 = vpop.f32.mrf.mxu1 }
 0x3a9   : > { %v2879_v52 = vadd.f32 %v2782_v51, %v2510_v19  ;;  %v2881_v8 = vadd.f32 %v2865_v53, %v2593_v63  ;;  %v3089_v19 = vld [vmem:[%s8424_s7 + $0x58] sm:$0xff]  ;;  %v3088_v63 = vld [vmem:[%s8424_s7 + $0x50] sm:$0xff] }
 0x3aa   : > { %v2784_v54 = vpop.f32.mrf.mxu0  ;;  %v2867_v55 = vpop.f32.mrf.mxu1  ;;  %3228 = vmatpush1.msra.mxu1 %v3089_v19  ;;  %v4822_v19 = vld [vmem:[%s8424_s7 + $0xc8] sm:$0xff] }
 0x3ab   : > { %v7554_v56 = vadd.f32 %v2893_v36, %v2879_v52  ;;  %v2880_v25 = vadd.f32 %v2784_v54, %v2512_v26  ;;  %v2907_v27 = vadd.f32 %v2901_v62, %v2881_v8  ;;  %3229 = vmatprep.subr.mxu1 %v5508_v16 }
 0x3ac   : > { %v2788_v58 = vpop.f32.mrf.mxu0  ;;  %v2870_v59 = vpop.f32.mrf.mxu1  ;;  %3230 = vmatpush1.msra.mxu1 %v3088_v63  ;;  %v4821_v63 = vld [vmem:[%s8424_s7 + $0xc0] sm:$0xff] }
 0x3ad   : > { %v2882_v61 = vadd.f32 %v2788_v58, %v2516_v50  ;;  %v2884_v2 = vadd.f32 %v2870_v59, %v2598_v57  ;;  %v7570_v23 = vadd.f32 %v2897_v9, %v2880_v25  ;;  %v2916_v30 = vmax.f32 %v2907_v27, 0.0  ;;  %3231 = vmatprep.subr.mxu1 %v5508_v16  ;;  %v3083_v50 = vld [vmem:[%s8424_s7 + $0x28] sm:$0xff]  ;;  %v4832_v27 = vld [vmem:[%s8424_s7 + $0x118] sm:$0xff] }
 0x3ae   : > { %v2790_v4 = vpop.f32.mrf.mxu0  ;;  %v2872_v1 = vpop.f32.mrf.mxu1  ;;  %3232 = vmatpush1.msra.mxu1 %v3087_v43  ;;  %v4834_v25 = vld [vmem:[%s8424_s7 + $0x128] sm:$0xff]  ;;  %v4820_v43 = vld [vmem:[%s8424_s7 + $0xb8] sm:$0xff] }
 0x3af   : > { %v7558_v29 = vadd.f32 %v2893_v36, %v2882_v61  ;;  %v2883_v7 = vadd.f32 %v2790_v4, %v2518_v60  ;;  %v2910_v12 = vadd.f32 %v2901_v62, %v2884_v2  ;;  %v2915_v32 = vmax.f32 %v7570_v23, 0.0  ;;  %3233 = vmatprep.subr.mxu1 %v5508_v16  ;;  %v4830_v23 = vld [vmem:[%s8424_s7 + $0x108] sm:$0xff] }
 0x3b0   : > { %v2794_v11 = vpop.f32.mrf.mxu0  ;;  %v2875_v6 = vpop.f32.mrf.mxu1  ;;  %3234 = vmatpush1.msra.mxu1 %v3086_v33  ;;  %v4819_v33 = vld [vmem:[%s8424_s7 + $0xb0] sm:$0xff] }
 0x3b1   : > { %v2885_v14 = vadd.f32 %v2794_v11, %v2522_v42  ;;  %v2887_v21 = vadd.f32 %v2875_v6, %v2603_v5  ;;  %v7561_v40 = vadd.f32 %v2897_v9, %v2883_v7  ;;  %v2919_v20 = vmax.f32 %v2910_v12, 0.0  ;;  %3235 = vmatprep.subr.mxu1 %v5508_v16  ;;  %v3078_v42 = vld [vmem:[%s8424_s7] sm:$0xff] }
 0x3b2   : > { %v2796_v18 = vpop.f32.mrf.mxu0  ;;  %v2877_v22 = vpop.f32.mrf.mxu1  ;;  %3236 = vmatpush1.msra.mxu1 %v3085_v3  ;;  %v2917_v54 = vmax.f32 %v7558_v29, 0.0  ;;  %v2914_v7 = vmax.f32 %v7554_v56, 0.0  ;;  %v4840_v3 = vld [vmem:[%s8424_s7 + $0x158] sm:$0xff] }
 0x3b3   : > { %v7563_v44 = vadd.f32 %v2893_v36, %v2885_v14  ;;  %v2886_v45 = vadd.f32 %v2796_v18, %v2524_v13  ;;  %v2913_v15 = vadd.f32 %v2901_v62, %v2887_v21  ;;  %2935 = vrot.lane.b32.xlu1 %v2919_v20, %s5509_s27  ;;  %v2918_v10 = vmax.f32 %v7561_v40, 0.0  ;;  %3237 = vmatprep.subr.mxu1 %v5508_v16 }
 0x3b4   : > { %3238 = vmatpush1.msra.mxu1 %v3084_v47  ;;  %v3096_v47 = vld [vmem:[%s8424_s7 + $0x90] sm:$0xff] }
 0x3b5   : > { %v7565_v41 = vadd.f32 %v2897_v9, %v2886_v45  ;;  %v2922_v17 = vmax.f32 %v2913_v15, 0.0  ;;  %3239 = vmatprep.subr.mxu1 %v5508_v16  ;;  %v2920_v59 = vmax.f32 %v7563_v44, 0.0  ;;  %v2985_v15 = vld [vmem:[%s8433_s16] sm:$0xff] }
 0x3b6   : > { %3240 = vmatpush1.msra.mxu1 %v3083_v50  ;;  %v4839_v50 = vld [vmem:[%s8424_s7 + $0x150] sm:$0xff] }
 0x3b7   : > { %2939 = vrot.lane.b32.xlu0 %v2922_v17, %s5509_s27  ;;  %2933 = vrot.lane.b32.xlu1 %v2918_v10, %s5509_s27  ;;  %v2921_v28 = vmax.f32 %v7565_v41, 0.0  ;;  %v4833_v41 = vld [vmem:[%s8424_s7 + $0x120] sm:$0xff]  ;;  %v2986_v17 = vld [vmem:[%s8433_s16 + $0x8] sm:$0x7] }
 0x3b8   : > { %3241 = vmatprep.subr.mxu1 %v5508_v16 }
 0x3b9   : > { %3242 = vmatpush1.msra.mxu1 %v3082_v24  ;;  %v3095_v24 = vld [vmem:[%s8424_s7 + $0x88] sm:$0xff] }
 0x3ba   : > { %3243 = vmatprep.subr.mxu1 %v5508_v16 }
 0x3bb   : > { %2937 = vrot.lane.b32.xlu0 %v2921_v28, %s5509_s27  ;;  %2931 = vrot.lane.b32.xlu1 %v2916_v30, %s5509_s27  ;;  %v4828_v30 = vld [vmem:[%s8424_s7 + $0xf8] sm:$0xff] }
 0x3bc   : > { %3244 = vmatpush1.msra.mxu1 %v3081_v48  ;;  %v4838_v48 = vld [vmem:[%s8424_s7 + $0x148] sm:$0xff] }
 0x3bd   : > { %3245 = vmatprep.subr.mxu1 %v5508_v16 }
 0x3be   : > { %3246 = vmatpush1.msra.mxu1 %v3080_v34  ;;  %v3094_v34 = vld [vmem:[%s8424_s7 + $0x80] sm:$0xff] }
 0x3bf   : > { %2929 = vrot.lane.b32.xlu0 %v2915_v32, %s5509_s27  ;;  %3247 = vmatprep.subr.mxu1 %v5508_v16  ;;  %s5446_s27 = scalar_lea.vmem %s4353_s29, 16 }
 0x3c0   : > { %3248 = vmatpush1.msra.mxu1 %v3079_v31  ;;  %v4837_v31 = vld [vmem:[%s8424_s7 + $0x140] sm:$0xff]  ;;  %p5447_p11 = scmp.ne.s32.totalorder %s4353_s29, %s5446_s27 }
 0x3c1   : > { %3249 = vmatprep.subr.mxu1 %v5508_v16 }
 0x3c2   : > { %3250 = vmatpush1.msra.mxu1 %v3078_v42  ;;  %v4836_v42 = vld [vmem:[%s8424_s7 + $0x138] sm:$0xff]  ;;  %p5448_p12 = pnand %p5447_p11, %p5642_p5 }
 0x3c3   : > { %3271 = vmatprep.subr.mxu1 %v5508_v16 }
 0x3c4   : > { %3272 = vmatpush2.msra.mxu1 %v3099_v35  ;;  %v4835_v35 = vld [vmem:[%s8424_s7 + $0x130] sm:$0xff]  ;;  %p5449_p13 = pneg %p5448_p12 }
 0x3c5   : > { %3273 = vmatprep.subr.mxu1 %v5508_v16 }
 0x3c6   : > { %3274 = vmatpush2.msra.mxu1 %v3098_v46 }
 0x3c7   : > { %3275 = vmatprep.subr.mxu1 %v5508_v16 }
 0x3c8   : > { %3276 = vmatpush2.msra.mxu1 %v3097_v49 }
 0x3c9   : > { %3277 = vmatprep.subr.mxu1 %v5508_v16 }
 0x3ca   : > { %3278 = vmatpush2.msra.mxu1 %v3096_v47  ;;  %v4873_v47 = vld [vmem:[%s8426_s9 + $0x78] sm:$0xff] }
 0x3cb   : > { %3279 = vmatprep.subr.mxu1 %v5508_v16 }
 0x3cc   : > { %3280 = vmatpush2.msra.mxu1 %v3095_v24  ;;  %v4872_v24 = vld [vmem:[%s8426_s9 + $0x70] sm:$0xff] }
 0x3cd   : > { %3281 = vmatprep.subr.mxu1 %v5508_v16 }
 0x3ce   : > { %3282 = vmatpush2.msra.mxu1 %v3094_v34  ;;  %v4871_v34 = vld [vmem:[%s8426_s9 + $0x68] sm:$0xff] }
 0x3cf   : > { %5148 = vmatprep.subr.mxu1 %v5508_v16 }
 0x425   : > { %v2936_v36 = vpop.permute.xlu1 %2935 }
 0x426   : > { %v2954_v55 = vmax.f32 %v2918_v10, %v2936_v36  ;;  %v4831_v10 = vld [vmem:[%s8424_s7 + $0x110] sm:$0xff] }
 0x428   : > { %v2967_v1 = vrot.slane %v2954_v55, 1 }
 0x429   : > { %v2940_v51 = vpop.permute.xlu0 %2939  ;;  %v2934_v52 = vpop.permute.xlu1 %2933 }
 0x42a   : > { %v2956_v53 = vmax.f32 %v2921_v28, %v2940_v51  ;;  %v2943_v57 = vsel %vm2941_vm6, %v2934_v52, %v2936_v36  ;;  %v4829_v28 = vld [vmem:[%s8424_s7 + $0x100] sm:$0xff] }
 0x42b   : > { %v2953_v60 = vmax.f32 %v2917_v54, %v2943_v57 }
 0x42c   : > { %v2971_v58 = vrot.slane %v2956_v53, 1 }
 0x42d   : > { %v2938_v61 = vpop.permute.xlu0 %2937  ;;  %v2932_v4 = vpop.permute.xlu1 %2931  ;;  %v2964_v9 = vrot.slane %v2953_v60, 1 }
 0x42e   : > { %v2984_v62 = vmax.f32 %v2956_v53, %v2971_v58  ;;  %v2944_v2 = vsel %vm2941_vm6, %v2938_v61, %v2940_v51  ;;  %v2952_v29 = vmax.f32 %v2915_v32, %v2932_v4  ;;  %v2972_v13 = vsel %vm579_vm1, %v2967_v1, %v2971_v58  ;;  %v4827_v32 = vld [vmem:[%s8424_s7 + $0xf0] sm:$0xff]  ;;  %v4860_v58 = vld [vmem:[%s8424_s7 + $0x1d8] sm:$0xff] }
 0x42f   : > { %v2955_v5 = vmax.f32 %v2920_v59, %v2944_v2  ;;  %v2982_v22 = vmax.f32 %v2954_v55, %v2972_v13  ;;  %v4859_v61 = vld [vmem:[%s8424_s7 + $0x1d0] sm:$0xff]  ;;  %v4858_v2 = vld [vmem:[%s8424_s7 + $0x1c8] sm:$0xff]  ;;  %v4849_v13 = vld [vmem:[%s8424_s7 + $0x180] sm:$0xff] }
 0x430   : > { %4815 = vmatprep.subr.msk.mxu0 %vm2994_vm7, %v2984_v62  ;;  %v2966_v6 = vrot.slane %v2952_v29, 1 }
 0x431   : > { %v2969_v11 = vrot.slane %v2955_v5, 1  ;;  %v2930_v12 = vpop.permute.xlu0 %2929 }
 0x432   : > { %v2942_v14 = vsel %vm2941_vm6, %v2930_v12, %v2932_v4  ;;  %v2968_v8 = vsel %vm579_vm1, %v2966_v6, %v2967_v1  ;;  %v4857_v1 = vld [vmem:[%s8424_s7 + $0x1c0] sm:$0xff]  ;;  %v4851_v6 = vld [vmem:[%s8424_s7 + $0x190] sm:$0xff]  ;;  %v4850_v12 = vld [vmem:[%s8424_s7 + $0x188] sm:$0xff] }
 0x433   : > { %v2983_v21 = vmax.f32 %v2955_v5, %v2969_v11  ;;  %v2951_v40 = vmax.f32 %v2914_v7, %v2942_v14  ;;  %v2970_v18 = vsel %vm579_vm1, %v2964_v9, %v2969_v11  ;;  %v2980_v56 = vmax.f32 %v2952_v29, %v2968_v8  ;;  %v4856_v5 = vld [vmem:[%s8424_s7 + $0x1b8] sm:$0xff]  ;;  %v4855_v29 = vld [vmem:[%s8424_s7 + $0x1b0] sm:$0xff]  ;;  %v4854_v7 = vld [vmem:[%s8424_s7 + $0x1a8] sm:$0xff] }
 0x434   : > { %v2981_v20 = vmax.f32 %v2953_v60, %v2970_v18  ;;  %v4852_v11 = vld [vmem:[%s8424_s7 + $0x198] sm:$0xff]  ;;  %v4846_v8 = vld [vmem:[%s8424_s7 + $0x168] sm:$0xff] }
 0x435   : > { %v2963_v26 = vrot.slane %v2951_v40, 1  ;;  %4816 = vmatpush1.msk.msra.mxu0 %vm2994_vm7, %v2983_v21  ;;  %v4848_v14 = vld [vmem:[%s8424_s7 + $0x178] sm:$0xff]  ;;  %v4847_v21 = vld [vmem:[%s8424_s7 + $0x170] sm:$0xff]  ;;  %v4866_v18 = vld [vmem:[%s8424_s7 + $0x208] sm:$0xff] }
 0x436   : > { %3029 = vmatprep.subr.mxu0 %v2982_v22  ;;  %v4865_v22 = vld [vmem:[%s8424_s7 + $0x200] sm:$0xff] }
 0x437   : > { %v2965_v44 = vsel %vm579_vm1, %v2963_v26, %v2964_v9  ;;  %3030 = vmatpush1.msra.mxu0 %v2981_v20  ;;  %v4853_v9 = vld [vmem:[%s8424_s7 + $0x1a0] sm:$0xff]  ;;  %v4864_v20 = vld [vmem:[%s8424_s7 + $0x1f8] sm:$0xff]  ;;  %v4863_v26 = vld [vmem:[%s8424_s7 + $0x1f0] sm:$0xff] }
 0x438   : > { %v2979_v45 = vmax.f32 %v2951_v40, %v2965_v44  ;;  %3031 = vmatprep.subr.mxu0 %v2980_v56  ;;  %v4845_v40 = vld [vmem:[%s8424_s7 + $0x160] sm:$0xff]  ;;  %v4862_v56 = vld [vmem:[%s8424_s7 + $0x1e8] sm:$0xff] }
 0x43a   : > { %3032 = vmatpush1.msra.mxu0 %v2979_v45  ;;  %v4861_v45 = vld [vmem:[%s8424_s7 + $0x1e0] sm:$0xff] }
 0x43b   : > { %4817 = vmatmul.mubr.msk.f32.vlgmr.msra.gmra.mxu0 %vm2987_vm8, %v2985_v15  ;;  %3140 = vmatprep.subr.mxu0 %v5508_v16 }
 0x43c   : > { %3071 = vmatprep.mubr.f32.mxu0 %v5508_v16  ;;  %3141 = vmatpush1.msra.mxu0 %v4834_v25 }
 0x43d   : > { %3142 = vmatprep.subr.mxu0 %v5508_v16 }
 0x43e   : > { %3143 = vmatpush1.msra.mxu0 %v4833_v41  ;;  %v3428_v41 = vld [vmem:[%s8426_s9 + $0x58] sm:$0x3] }
 0x43f   : > { %4818 = vmatmul.mubr.msk.f32.gmra.mxu0 %vm2987_vm8, %v2986_v17  ;;  %3144 = vmatprep.subr.mxu0 %v5508_v16  ;;  %v4881_v17 = vld [vmem:[%s8426_s9 + $0xb8] sm:$0x3] }
 0x440   : > { %3145 = vmatpush1.msra.mxu0 %v4832_v27  ;;  %v3427_v27 = vld [vmem:[%s8426_s9 + $0x50] sm:$0xff] }
 0x441   : > { %3146 = vmatprep.subr.mxu0 %v5508_v16 }
 0x442   : > { %3147 = vmatpush1.msra.mxu0 %v4831_v10  ;;  %v4880_v10 = vld [vmem:[%s8426_s9 + $0xb0] sm:$0xff] }
 0x443   : > { %3148 = vmatprep.subr.mxu0 %v5508_v16 }
 0x444   : > { %3149 = vmatpush1.msra.mxu0 %v4830_v23  ;;  %v3426_v23 = vld [vmem:[%s8426_s9 + $0x48] sm:$0xff] }
 0x445   : > { %3150 = vmatprep.subr.mxu0 %v5508_v16 }
 0x446   : > { %3151 = vmatpush1.msra.mxu0 %v4829_v28  ;;  %v4879_v28 = vld [vmem:[%s8426_s9 + $0xa8] sm:$0xff] }
 0x447   : > { %3152 = vmatprep.subr.mxu0 %v5508_v16 }
 0x448   : > { %3153 = vmatpush1.msra.mxu0 %v4828_v30  ;;  %v3425_v30 = vld [vmem:[%s8426_s9 + $0x40] sm:$0xff] }
 0x449   : > { %3154 = vmatprep.subr.mxu0 %v5508_v16 }
 0x44a   : > { %3155 = vmatpush1.msra.mxu0 %v4827_v32  ;;  %v4878_v32 = vld [vmem:[%s8426_s9 + $0xa0] sm:$0xff] }
 0x44b   : > { %3156 = vmatprep.subr.mxu0 %v5508_v16 }
 0x44c   : > { %3157 = vmatpush1.msra.mxu0 %v4826_v0  ;;  %v3424_v0 = vld [vmem:[%s8426_s9 + $0x38] sm:$0xff] }
 0x44d   : > { %3158 = vmatprep.subr.mxu0 %v5508_v16 }
 0x44e   : > { %3159 = vmatpush1.msra.mxu0 %v4825_v37  ;;  %v4877_v37 = vld [vmem:[%s8426_s9 + $0x98] sm:$0xff] }
 0x44f   : > { %3160 = vmatprep.subr.mxu0 %v5508_v16 }
 0x450   : > { %3161 = vmatpush1.msra.mxu0 %v4824_v38  ;;  %v3423_v38 = vld [vmem:[%s8426_s9 + $0x30] sm:$0xff] }
 0x451   : > { %3162 = vmatprep.subr.mxu0 %v5508_v16 }
 0x452   : > { %3163 = vmatpush1.msra.mxu0 %v4823_v39  ;;  %v4876_v39 = vld [vmem:[%s8426_s9 + $0x90] sm:$0xff] }
 0x453   : > { %3164 = vmatprep.subr.mxu0 %v5508_v16 }
 0x454   : > { %3165 = vmatpush1.msra.mxu0 %v4822_v19  ;;  %v3422_v19 = vld [vmem:[%s8426_s9 + $0x28] sm:$0xff] }
 0x455   : > { %3166 = vmatprep.subr.mxu0 %v5508_v16 }
 0x456   : > { %3167 = vmatpush1.msra.mxu0 %v4821_v63  ;;  %v4875_v63 = vld [vmem:[%s8426_s9 + $0x88] sm:$0xff] }
 0x457   : > { %3168 = vmatprep.subr.mxu0 %v5508_v16 }
 0x458   : > { %3169 = vmatpush1.msra.mxu0 %v4820_v43  ;;  %v3421_v43 = vld [vmem:[%s8426_s9 + $0x20] sm:$0xff] }
 0x459   : > { %3170 = vmatprep.subr.mxu0 %v5508_v16 }
 0x45a   : > { %3171 = vmatpush1.msra.mxu0 %v4819_v33  ;;  %v4874_v33 = vld [vmem:[%s8426_s9 + $0x80] sm:$0xff] }
 0x45b   : > { %3192 = vmatprep.subr.mxu0 %v5508_v16 }
 0x45c   : > { %3193 = vmatpush2.msra.mxu0 %v4840_v3  ;;  %v3420_v3 = vld [vmem:[%s8426_s9 + $0x18] sm:$0xff] }
 0x45d   : > { %3194 = vmatprep.subr.mxu0 %v5508_v16 }
 0x45e   : > { %3195 = vmatpush2.msra.mxu0 %v4839_v50  ;;  %v3419_v50 = vld [vmem:[%s8426_s9 + $0x10] sm:$0xff] }
 0x45f   : > { %3196 = vmatprep.subr.mxu0 %v5508_v16 }
 0x460   : > { %3197 = vmatpush2.msra.mxu0 %v4838_v48  ;;  %v3418_v48 = vld [vmem:[%s8426_s9 + $0x8] sm:$0xff] }
 0x461   : > { %3198 = vmatprep.subr.mxu0 %v5508_v16 }
 0x462   : > { %3199 = vmatpush2.msra.mxu0 %v4837_v31  ;;  %v3417_v31 = vld [vmem:[%s8426_s9] sm:$0xff] }
 0x463   : > { %3200 = vmatprep.subr.mxu0 %v5508_v16 }
 0x464   : > { %3201 = vmatpush2.msra.mxu0 %v4836_v42  ;;  %v4870_v42 = vld [vmem:[%s8426_s9 + $0x60] sm:$0xff] }
 0x465   : > { %3202 = vmatprep.subr.mxu0 %v5508_v16 }
 0x466   : > { %3203 = vmatpush2.msra.mxu0 %v4835_v35 }
 0x467   : > { %3329 = vmatprep.subr.mxu0 %v5508_v16 }
 0x4fb   : > { %v7780_v46 = vpop.f32.mrf.mxu0 }
 0x4fc   : > { %v3127_v55 = vrot.slane %v7780_v46, 1  ;;  %v3317_v15 = vrot.slane %v7780_v46, 2 }
 0x4fd   : > { %v3069_v49 = vpop.f32.mrf.mxu0 }
 0x4fe   : > { %4843 = vmatprep.mubr.msk.f32.mxu1 %vm3135_vm9, %v3069_v49  ;;  %v3130_v52 = vrot.slane %v3069_v49, 1  ;;  %v3320_v62 = vrot.slane %v3069_v49, 2 }
 0x4ff   : > { %v7783_v36 = vpop.f32.mrf.mxu0  ;;  %3284 = vmatmul.mubr.f32.vlgmr.msra.gmra.mxu1 %v7780_v46 }
 0x500   : > { %v3128_v51 = vrot.slane %v7783_v36, 1  ;;  %v3318_v44 = vrot.slane %v7783_v36, 2  ;;  %5149 = vmatpush3.msk.msra.mxu1 %vm3447_vm10, %v4881_v17  ;;  %v4913_v17 = vld [vmem:[%s8428_s11 + $0xd0] sm:$0xff] }
 0x501   : > { %v7787_v53 = vpop.f32.mrf.mxu0  ;;  %5150 = vmatprep.subr.mxu1 %v5508_v16 }
 0x502   : > { %v3131_v54 = vrot.slane %v7787_v53, 1  ;;  %4844 = vmatprep.mubr.msk.f32.mxu1 %vm3135_vm9, %v7787_v53  ;;  %v3129_v59 = vsel %vm579_vm1, %v3127_v55, %v3128_v51  ;;  %v3321_v60 = vrot.slane %v7787_v53, 2  ;;  %v3319_v25 = vsel %vm984_vm3, %v3317_v15, %v3318_v44  ;;  %5151 = vmatpush3.msra.mxu1 %v4880_v10  ;;  %v3711_v15 = vld [vmem:[%s8428_s11 + $0x68] sm:$0xff] }
 0x503   : > { %3289 = vmatmul.mubr.f32.gmra.mxu1 %v7783_v36  ;;  %5152 = vmatprep.subr.mxu1 %v5508_v16  ;;  %v4912_v10 = vld [vmem:[%s8428_s11 + $0xc8] sm:$0xff] }
 0x504   : > { %v3132_v57 = vsel %vm579_vm1, %v3130_v52, %v3131_v54  ;;  %v3322_v4 = vsel %vm984_vm3, %v3320_v62, %v3321_v60  ;;  %5153 = vmatpush3.msra.mxu1 %v4879_v28  ;;  %5172 = vmatprep.mubr.msk.f32.mxu1 %vm5510_vm11, %v5508_v16  ;;  %v4911_v28 = vld [vmem:[%s8428_s11 + $0xc0] sm:$0xff] }
 0x505   : > { %4841 = vmatprep.mubr.msk.f32.mxu0 %vm3135_vm9, %v3132_v57  ;;  %5154 = vmatprep.subr.mxu1 %v5508_v16 }
 0x506   : > { %3205 = vmatmul.mubr.f32.vlgmr.msra.gmra.mxu0 %v3129_v59  ;;  %5155 = vmatpush3.msra.mxu1 %v4878_v32  ;;  %v4910_v32 = vld [vmem:[%s8428_s11 + $0xb8] sm:$0xff] }
 0x507   : > { %3330 = vmatpush1.msra.mxu0 %v4860_v58  ;;  %4842 = vmatprep.mubr.msk.f32.mxu0 %vm3135_vm9, %v3131_v54  ;;  %v4869_v58 = vld [vmem:[%s8425_s8] ss:$0 sm:$0xff] }
 0x508   : > { %3331 = vmatprep.subr.mxu0 %v5508_v16  ;;  %5156 = vmatprep.subr.mxu1 %v5508_v16 }
 0x509   : > { %3332 = vmatpush1.msra.mxu0 %v4859_v61  ;;  %5157 = vmatpush3.msra.mxu1 %v4877_v37  ;;  %v4909_v37 = vld [vmem:[%s8428_s11 + $0xb0] sm:$0xff] }
 0x50a   : > { %3333 = vmatprep.subr.mxu0 %v5508_v16  ;;  %3210 = vmatmul.mubr.f32.gmra.mxu0 %v3128_v51 }
 0x50b   : > { %3334 = vmatpush1.msra.mxu0 %v4858_v2  ;;  %4867 = vmatprep.mubr.msk.f32.mxu0 %vm3135_vm9, %v3322_v4 }
 0x50c   : > { %3335 = vmatprep.subr.mxu0 %v5508_v16  ;;  %5158 = vmatprep.subr.mxu1 %v5508_v16 }
 0x50d   : > { %3336 = vmatpush1.msra.mxu0 %v4857_v1  ;;  %5159 = vmatpush3.msra.mxu1 %v4876_v39  ;;  %v4908_v39 = vld [vmem:[%s8428_s11 + $0xa8] sm:$0xff] }
 0x50e   : > { %3337 = vmatprep.subr.mxu0 %v5508_v16  ;;  %5160 = vmatprep.subr.mxu1 %v5508_v16 }
 0x50f   : > { %3338 = vmatpush1.msra.mxu0 %v4856_v5  ;;  %5161 = vmatpush3.msra.mxu1 %v4875_v63  ;;  %v4897_v5 = vld [vmem:[%s8426_s9 + $0x118] sm:$0x3]  ;;  %v4907_v63 = vld [vmem:[%s8428_s11 + $0xa0] sm:$0xff] }
 0x510   : > { %3339 = vmatprep.subr.mxu0 %v5508_v16  ;;  %5162 = vmatprep.subr.mxu1 %v5508_v16 }
 0x511   : > { %3340 = vmatpush1.msra.mxu0 %v4855_v29  ;;  %5163 = vmatpush3.msra.mxu1 %v4874_v33  ;;  %v4896_v29 = vld [vmem:[%s8426_s9 + $0x110] sm:$0xff]  ;;  %v4906_v33 = vld [vmem:[%s8428_s11 + $0x98] sm:$0xff] }
 0x512   : > { %3341 = vmatprep.subr.mxu0 %v5508_v16  ;;  %5164 = vmatprep.subr.mxu1 %v5508_v16 }
 0x513   : > { %3342 = vmatpush1.msra.mxu0 %v4854_v7  ;;  %5165 = vmatpush3.msra.mxu1 %v4873_v47  ;;  %v4895_v7 = vld [vmem:[%s8426_s9 + $0x108] sm:$0xff]  ;;  %v4905_v47 = vld [vmem:[%s8428_s11 + $0x90] sm:$0xff] }
 0x514   : > { %3343 = vmatprep.subr.mxu0 %v5508_v16  ;;  %5166 = vmatprep.subr.mxu1 %v5508_v16 }
 0x515   : > { %3344 = vmatpush1.msra.mxu0 %v4853_v9  ;;  %5167 = vmatpush3.msra.mxu1 %v4872_v24  ;;  %v4894_v9 = vld [vmem:[%s8426_s9 + $0x100] sm:$0xff]  ;;  %v4904_v24 = vld [vmem:[%s8428_s11 + $0x88] sm:$0xff] }
 0x516   : > { %3345 = vmatprep.subr.mxu0 %v5508_v16  ;;  %5168 = vmatprep.subr.mxu1 %v5508_v16 }
 0x517   : > { %3346 = vmatpush1.msra.mxu0 %v4852_v11  ;;  %5169 = vmatpush3.msra.mxu1 %v4871_v34  ;;  %v4903_v34 = vld [vmem:[%s8428_s11 + $0x80] sm:$0xff] }
 0x518   : > { %3347 = vmatprep.subr.mxu0 %v5508_v16  ;;  %5170 = vmatprep.subr.mxu1 %v5508_v16 }
 0x519   : > { %3348 = vmatpush1.msra.mxu0 %v4851_v6  ;;  %5171 = vmatpush3.msra.mxu1 %v4870_v42  ;;  %v4893_v6 = vld [vmem:[%s8426_s9 + $0xf8] sm:$0xff] }
 0x51a   : > { %3349 = vmatprep.subr.mxu0 %v5508_v16  ;;  %5202 = vmatprep.subr.mxu1 %v5508_v16  ;;  %v4902_v42 = vld [vmem:[%s8428_s11 + $0x78] sm:$0xff] }
 0x51b   : > { %3350 = vmatpush1.msra.mxu0 %v4850_v12 }
 0x51c   : > { %3351 = vmatprep.subr.mxu0 %v5508_v16 }
 0x51d   : > { %3352 = vmatpush1.msra.mxu0 %v4849_v13  ;;  %v4892_v13 = vld [vmem:[%s8426_s9 + $0xf0] sm:$0xff] }
 0x51e   : > { %3353 = vmatprep.subr.mxu0 %v5508_v16 }
 0x51f   : > { %3354 = vmatpush1.msra.mxu0 %v4848_v14  ;;  %v4891_v14 = vld [vmem:[%s8426_s9 + $0xe8] sm:$0xff] }
 0x520   : > { %3355 = vmatprep.subr.mxu0 %v5508_v16 }
 0x521   : > { %3356 = vmatpush1.msra.mxu0 %v4847_v21 }
 0x522   : > { %3357 = vmatprep.subr.mxu0 %v5508_v16 }
 0x523   : > { %3358 = vmatpush1.msra.mxu0 %v4846_v8  ;;  %v4890_v8 = vld [vmem:[%s8426_s9 + $0xe0] sm:$0xff] }
 0x524   : > { %3359 = vmatprep.subr.mxu0 %v5508_v16 }
 0x525   : > { %3360 = vmatpush1.msra.mxu0 %v4845_v40  ;;  %v4889_v40 = vld [vmem:[%s8426_s9 + $0xd8] sm:$0xff] }
 0x526   : > { %3381 = vmatprep.subr.mxu0 %v5508_v16 }
 0x527   : > { %3382 = vmatpush2.msra.mxu0 %v4866_v18 }
 0x528   : > { %3383 = vmatprep.subr.mxu0 %v5508_v16 }
 0x529   : > { %3384 = vmatpush2.msra.mxu0 %v4865_v22  ;;  %v4888_v22 = vld [vmem:[%s8426_s9 + $0xd0] sm:$0xff] }
 0x52a   : > { %3385 = vmatprep.subr.mxu0 %v5508_v16 }
 0x52b   : > { %3386 = vmatpush2.msra.mxu0 %v4864_v20  ;;  %v4887_v20 = vld [vmem:[%s8426_s9 + $0xc8] sm:$0xff] }
 0x52c   : > { %3387 = vmatprep.subr.mxu0 %v5508_v16 }
 0x52d   : > { %3388 = vmatpush2.msra.mxu0 %v4863_v26 }
 0x52e   : > { %3389 = vmatprep.subr.mxu0 %v5508_v16 }
 0x52f   : > { %3390 = vmatpush2.msra.mxu0 %v4862_v56  ;;  %v4886_v56 = vld [vmem:[%s8426_s9 + $0xc0] sm:$0xff] }
 0x530   : > { %3391 = vmatprep.subr.mxu0 %v5508_v16 }
 0x531   : > { %3392 = vmatpush2.msra.mxu0 %v4861_v45 }
 0x532   : > { %3394 = vmatmul.mubr.f32.vlgmr.msra.gmra.mxu0 %v3319_v25  ;;  %5175 = vmatprep.subr.mxu0 %v5508_v16  ;;  %v4914_v25 = vld [vmem:[%s8428_s11 + $0xd8] sm:$0xff] }
 0x533   : > { %4868 = vmatprep.mubr.msk.f32.mxu0 %vm3135_vm9, %v3321_v60  ;;  %5176 = vmatpush3.msk.msra.mxu0 %vm3447_vm10, %v3428_v41  ;;  %v3710_v41 = vld [vmem:[%s8428_s11 + $0x60] sm:$0xff] }
 0x534   : > { %5177 = vmatprep.subr.mxu0 %v5508_v16 }
 0x535   : > { %5178 = vmatpush3.msra.mxu0 %v3427_v27  ;;  %v3709_v27 = vld [vmem:[%s8428_s11 + $0x58] sm:$0xff] }
 0x536   : > { %3399 = vmatmul.mubr.f32.gmra.mxu0 %v3318_v44  ;;  %5179 = vmatprep.subr.mxu0 %v5508_v16 }
 0x537   : > { %5180 = vmatpush3.msra.mxu0 %v3426_v23  ;;  %5199 = vmatprep.mubr.msk.f32.mxu0 %vm5510_vm11, %v5508_v16  ;;  %v3708_v23 = vld [vmem:[%s8428_s11 + $0x50] sm:$0xff] }
 0x538   : > { %5181 = vmatprep.subr.mxu0 %v5508_v16 }
 0x539   : > { %5182 = vmatpush3.msra.mxu0 %v3425_v30  ;;  %v3707_v30 = vld [vmem:[%s8428_s11 + $0x48] sm:$0xff] }
 0x53a   : > { %5183 = vmatprep.subr.mxu0 %v5508_v16 }
 0x53b   : > { %5184 = vmatpush3.msra.mxu0 %v3424_v0  ;;  %v3706_v0 = vld [vmem:[%s8428_s11 + $0x40] sm:$0xff] }
 0x53c   : > { %5185 = vmatprep.subr.mxu0 %v5508_v16 }
 0x53d   : > { %5186 = vmatpush3.msra.mxu0 %v3423_v38  ;;  %v3705_v38 = vld [vmem:[%s8428_s11 + $0x38] sm:$0xff] }
 0x53e   : > { %5187 = vmatprep.subr.mxu0 %v5508_v16 }
 0x53f   : > { %5188 = vmatpush3.msra.mxu0 %v3422_v19  ;;  %v3704_v19 = vld [vmem:[%s8428_s11 + $0x30] sm:$0xff] }
 0x540   : > { %5189 = vmatprep.subr.mxu0 %v5508_v16 }
 0x541   : > { %5190 = vmatpush3.msra.mxu0 %v3421_v43  ;;  %v3703_v43 = vld [vmem:[%s8428_s11 + $0x28] sm:$0xff] }
 0x542   : > { %5191 = vmatprep.subr.mxu0 %v5508_v16 }
 0x543   : > { %5192 = vmatpush3.msra.mxu0 %v3420_v3  ;;  %v3702_v3 = vld [vmem:[%s8428_s11 + $0x20] sm:$0xff] }
 0x544   : > { %5193 = vmatprep.subr.mxu0 %v5508_v16 }
 0x545   : > { %5194 = vmatpush3.msra.mxu0 %v3419_v50  ;;  %v3701_v50 = vld [vmem:[%s8428_s11 + $0x18] sm:$0xff] }
 0x546   : > { %5195 = vmatprep.subr.mxu0 %v5508_v16 }
 0x547   : > { %5196 = vmatpush3.msra.mxu0 %v3418_v48  ;;  %v3700_v48 = vld [vmem:[%s8428_s11 + $0x10] sm:$0xff] }
 0x548   : > { %5197 = vmatprep.subr.mxu0 %v5508_v16 }
 0x549   : > { %5198 = vmatpush3.msra.mxu0 %v3417_v31  ;;  %v3699_v31 = vld [vmem:[%s8428_s11 + $0x8] sm:$0xff] }
 0x54a   : > { %5229 = vmatprep.subr.mxu0 %v5508_v16 }
 0x5bf   : > { %v3285_v35 = vpop.f32.mrf.mxu1 }
 0x5c1   : > { %v3287_v46 = vpop.f32.mrf.mxu1 }
 0x5c2   : > { %v4901_v46 = vld [vmem:[%s8428_s11 + $0x70] sm:$0xff] }
 0x5c3   : > { %v3290_v49 = vpop.f32.mrf.mxu1 }
 0x5c5   : > { %v3292_v36 = vpop.f32.mrf.mxu1 }
 0x5c6   : > { %v3206_v51 = vpop.f32.mrf.mxu0 }
 0x5c7   : > { %v3286_v55 = vadd.f32 %v3285_v35, %v3206_v51  ;;  %v3698_v35 = vld [vmem:[%s8428_s11] sm:$0xff] }
 0x5c8   : > { %v3208_v53 = vpop.f32.mrf.mxu0 }
 0x5ca   : > { %v3211_v52 = vpop.f32.mrf.mxu0 }
 0x5cb   : > { %v3291_v11 = vadd.f32 %v3290_v49, %v3211_v52 }
 0x5cc   : > { %v3213_v54 = vpop.f32.mrf.mxu0 }
 0x5f2   : > { %v3395_v57 = vpop.f32.mrf.mxu0 }
 0x5f3   : > { %v3404_v59 = vadd.f32 %v3395_v57, %v3286_v55  ;;  %v4900_v55 = vld [vmem:[%s8427_s10] ss:$0 sm:$0xff] }
 0x5f4   : > { %v3397_v60 = vpop.f32.mrf.mxu0 }
 0x5f5   : > { %v3413_v61 = vadd.f32 %v4869_v58, %v3404_v59 }
 0x5f6   : > { %v3400_v62 = vpop.f32.mrf.mxu0 }
 0x5f7   : > { %v3415_v2 = vmax.f32 %v3413_v61, 0.0  ;;  %v3405_v12 = vadd.f32 %v3400_v62, %v3291_v11  ;;  %v4930_v62 = vld [vmem:[%s8428_s11 + $0x148] sm:$0xff] }
 0x5f8   : > { %v3402_v4 = vpop.f32.mrf.mxu0  ;;  %v4922_v11 = vld [vmem:[%s8428_s11 + $0x108] sm:$0xff] }
 0x5f9   : > { %v3443_v1 = vrot.slane %v3415_v2, 1  ;;  %5200 = vmatmul.mubr.msk.f32.vlgmr.msra.gmra.mxu0 %vm3444_vm12, %v3415_v2  ;;  %v3414_v21 = vadd.f32 %v4869_v58, %v3405_v12  ;;  %v3610_v44 = vrot.slane %v3415_v2, 2  ;;  %v4929_v2 = vld [vmem:[%s8428_s11 + $0x140] sm:$0xff]  ;;  %v4928_v4 = vld [vmem:[%s8428_s11 + $0x138] sm:$0xff] }
 0x5fa   : > { %5257 = vmatprep.mubr.msk.f32.mxu0 %vm5510_vm11, %v5508_v16  ;;  %5230 = vmatpush3.msra.mxu0 %v4914_v25  ;;  %v4920_v12 = vld [vmem:[%s8428_s11 + $0xf8] sm:$0xff] }
 0x5fb   : > { %5173 = vmatmul.mubr.msk.f32.vlgmr.msra.gmra.mxu1 %vm3444_vm12, %v3443_v1  ;;  %v3416_v18 = vmax.f32 %v3414_v21, 0.0  ;;  %5231 = vmatprep.subr.mxu0 %v5508_v16  ;;  %v4927_v1 = vld [vmem:[%s8428_s11 + $0x130] sm:$0xff]  ;;  %v4917_v21 = vld [vmem:[%s8428_s11 + $0xe0] sm:$0xff]  ;;  %v4938_v25 = vld [vmem:[%s8430_s13 + $0x78] sm:$0xff] }
 0x5fc   : > { %5203 = vmatpush3.msk.msra.mxu1 %vm3447_vm10, %v4897_v5  ;;  %5226 = vmatprep.mubr.msk.f32.mxu1 %vm5510_vm11, %v5508_v16  ;;  %v4926_v5 = vld [vmem:[%s8428_s11 + $0x128] sm:$0xff] }
 0x5fd   : > { %5204 = vmatprep.subr.mxu1 %v5508_v16  ;;  %v3611_v26 = vrot.slane %v3416_v18, 2  ;;  %5232 = vmatpush3.msra.mxu0 %v4913_v17  ;;  %v4942_v18 = vld [vmem:[%s8430_s13 + $0x98] sm:$0xff]  ;;  %v4937_v17 = vld [vmem:[%s8430_s13 + $0x70] sm:$0xff] }
 0x5fe   : > { %5205 = vmatpush3.msra.mxu1 %v4896_v29  ;;  %5233 = vmatprep.subr.mxu0 %v5508_v16  ;;  %v4925_v29 = vld [vmem:[%s8428_s11 + $0x120] sm:$0xff] }
 0x5ff   : > { %5206 = vmatprep.subr.mxu1 %v5508_v16  ;;  %v3612_v45 = vsel %vm984_vm3, %v3610_v44, %v3611_v26  ;;  %5234 = vmatpush3.msra.mxu0 %v4912_v10  ;;  %v3978_v26 = vld [vmem:[%s8430_s13 + $0x38] sm:$0xff]  ;;  %v3977_v44 = vld [vmem:[%s8430_s13 + $0x30] sm:$0xff]  ;;  %v4936_v10 = vld [vmem:[%s8430_s13 + $0x68] sm:$0xff] }
 0x600   : > { %5207 = vmatpush3.msra.mxu1 %v4895_v7  ;;  %5235 = vmatprep.subr.mxu0 %v5508_v16  ;;  %v4924_v7 = vld [vmem:[%s8428_s11 + $0x118] sm:$0xff] }
 0x601   : > { %5208 = vmatprep.subr.mxu1 %v5508_v16  ;;  %5236 = vmatpush3.msra.mxu0 %v4911_v28  ;;  %v4935_v28 = vld [vmem:[%s8430_s13 + $0x60] sm:$0xff] }
 0x602   : > { %5209 = vmatpush3.msra.mxu1 %v4894_v9  ;;  %5237 = vmatprep.subr.mxu0 %v5508_v16  ;;  %v4923_v9 = vld [vmem:[%s8428_s11 + $0x110] sm:$0xff] }
 0x603   : > { %5210 = vmatprep.subr.mxu1 %v5508_v16  ;;  %5238 = vmatpush3.msra.mxu0 %v4910_v32  ;;  %v4934_v32 = vld [vmem:[%s8430_s13 + $0x58] sm:$0xff] }
 0x604   : > { %5211 = vmatpush3.msra.mxu1 %v4893_v6  ;;  %5239 = vmatprep.subr.mxu0 %v5508_v16  ;;  %v4921_v6 = vld [vmem:[%s8428_s11 + $0x100] sm:$0xff] }
 0x605   : > { %5212 = vmatprep.subr.mxu1 %v5508_v16  ;;  %5240 = vmatpush3.msra.mxu0 %v4909_v37  ;;  %v4933_v37 = vld [vmem:[%s8430_s13 + $0x50] sm:$0xff] }
 0x606   : > { %5213 = vmatpush3.msra.mxu1 %v4892_v13  ;;  %5241 = vmatprep.subr.mxu0 %v5508_v16  ;;  %v4919_v13 = vld [vmem:[%s8428_s11 + $0xf0] sm:$0xff] }
 0x607   : > { %5214 = vmatprep.subr.mxu1 %v5508_v16  ;;  %5242 = vmatpush3.msra.mxu0 %v4908_v39 }
 0x608   : > { %5215 = vmatpush3.msra.mxu1 %v4891_v14  ;;  %5243 = vmatprep.subr.mxu0 %v5508_v16  ;;  %v4918_v14 = vld [vmem:[%s8428_s11 + $0xe8] sm:$0xff] }
 0x609   : > { %5216 = vmatprep.subr.mxu1 %v5508_v16  ;;  %5244 = vmatpush3.msra.mxu0 %v4907_v63 }
 0x60a   : > { %5217 = vmatpush3.msra.mxu1 %v4890_v8  ;;  %5245 = vmatprep.subr.mxu0 %v5508_v16 }
 0x60b   : > { %5218 = vmatprep.subr.mxu1 %v5508_v16  ;;  %5246 = vmatpush3.msra.mxu0 %v4906_v33 }
 0x60c   : > { %5219 = vmatpush3.msra.mxu1 %v4889_v40  ;;  %5247 = vmatprep.subr.mxu0 %v5508_v16  ;;  %v3980_v40 = vld [vmem:[%s8430_s13 + $0x48] sm:$0xff] }
 0x60d   : > { %5220 = vmatprep.subr.mxu1 %v5508_v16  ;;  %5248 = vmatpush3.msra.mxu0 %v4905_v47 }
 0x60e   : > { %5221 = vmatpush3.msra.mxu1 %v4888_v22  ;;  %5249 = vmatprep.subr.mxu0 %v5508_v16  ;;  %v3979_v22 = vld [vmem:[%s8430_s13 + $0x40] sm:$0xff] }
 0x60f   : > { %5222 = vmatprep.subr.mxu1 %v5508_v16  ;;  %5250 = vmatpush3.msra.mxu0 %v4904_v24 }
 0x610   : > { %5223 = vmatpush3.msra.mxu1 %v4887_v20  ;;  %5251 = vmatprep.subr.mxu0 %v5508_v16  ;;  %v4941_v20 = vld [vmem:[%s8430_s13 + $0x90] sm:$0xff] }
 0x611   : > { %5224 = vmatprep.subr.mxu1 %v5508_v16  ;;  %5252 = vmatpush3.msra.mxu0 %v4903_v34 }
 0x612   : > { %5225 = vmatpush3.msra.mxu1 %v4886_v56  ;;  %5253 = vmatprep.subr.mxu0 %v5508_v16  ;;  %v4940_v56 = vld [vmem:[%s8430_s13 + $0x88] sm:$0xff] }
 0x613   : > { %5227 = vmatmul.mubr.msk.f32.vlgmr.msra.gmra.mxu1 %vm3444_vm12, %v3612_v45  ;;  %5260 = vmatprep.subr.mxu1 %v5508_v16  ;;  %v4939_v45 = vld [vmem:[%s8430_s13 + $0x80] sm:$0xff] }
 0x614   : > { %5288 = vmatprep.mubr.msk.f32.mxu1 %vm5510_vm11, %v5508_v16  ;;  %5261 = vmatpush3.msra.mxu1 %v3711_v15  ;;  %v3976_v15 = vld [vmem:[%s8430_s13 + $0x28] sm:$0xff] }
 0x615   : > { %5262 = vmatprep.subr.mxu1 %v5508_v16  ;;  %5254 = vmatpush3.msra.mxu0 %v4902_v42  ;;  %v4953_v42 = vld [vmem:[%s8430_s13 + $0xe0] sm:$0xff] }
 0x616   : > { %5263 = vmatpush3.msra.mxu1 %v3710_v41  ;;  %5255 = vmatprep.subr.mxu0 %v5508_v16  ;;  %v3975_v41 = vld [vmem:[%s8430_s13 + $0x20] sm:$0xff] }
 0x617   : > { %5264 = vmatprep.subr.mxu1 %v5508_v16  ;;  %5256 = vmatpush3.msra.mxu0 %v4901_v46  ;;  %v4951_v46 = vld [vmem:[%s8430_s13 + $0xd0] sm:$0xff] }
 0x618   : > { %5265 = vmatpush3.msra.mxu1 %v3709_v27  ;;  %5291 = vmatprep.subr.mxu0 %v5508_v16  ;;  %v3974_v27 = vld [vmem:[%s8430_s13 + $0x18] sm:$0xff] }
 0x619   : > { %5266 = vmatprep.subr.mxu1 %v5508_v16 }
 0x61a   : > { %5267 = vmatpush3.msra.mxu1 %v3708_v23  ;;  %v3973_v23 = vld [vmem:[%s8430_s13 + $0x10] sm:$0xff] }
 0x61b   : > { %5268 = vmatprep.subr.mxu1 %v5508_v16 }
 0x61c   : > { %5269 = vmatpush3.msra.mxu1 %v3707_v30  ;;  %v3972_v30 = vld [vmem:[%s8430_s13 + $0x8] sm:$0xff] }
 0x61d   : > { %5270 = vmatprep.subr.mxu1 %v5508_v16 }
 0x61e   : > { %5271 = vmatpush3.msra.mxu1 %v3706_v0  ;;  %v3971_v0 = vld [vmem:[%s8430_s13] sm:$0xff] }
 0x61f   : > { %5272 = vmatprep.subr.mxu1 %v5508_v16 }
 0x620   : > { %5273 = vmatpush3.msra.mxu1 %v3705_v38 }
 0x621   : > { %5274 = vmatprep.subr.mxu1 %v5508_v16 }
 0x622   : > { %5275 = vmatpush3.msra.mxu1 %v3704_v19 }
 0x623   : > { %5276 = vmatprep.subr.mxu1 %v5508_v16 }
 0x624   : > { %5277 = vmatpush3.msra.mxu1 %v3703_v43 }
 0x625   : > { %5278 = vmatprep.subr.mxu1 %v5508_v16 }
 0x626   : > { %5279 = vmatpush3.msra.mxu1 %v3702_v3  ;;  %v4932_v3 = vld [vmem:[%s8429_s12] ss:$0 sm:$0xff] }
 0x627   : > { %5280 = vmatprep.subr.mxu1 %v5508_v16 }
 0x628   : > { %5281 = vmatpush3.msra.mxu1 %v3701_v50 }
 0x629   : > { %5282 = vmatprep.subr.mxu1 %v5508_v16 }
 0x62a   : > { %5283 = vmatpush3.msra.mxu1 %v3700_v48 }
 0x62b   : > { %5284 = vmatprep.subr.mxu1 %v5508_v16 }
 0x62c   : > { %5285 = vmatpush3.msra.mxu1 %v3699_v31  ;;  %v4954_v31 = vld [vmem:[%s8430_s13 + $0xe8] sm:$0xff] }
 0x62d   : > { %5286 = vmatprep.subr.mxu1 %v5508_v16 }
 0x62e   : > { %5287 = vmatpush3.msra.mxu1 %v3698_v35  ;;  %v4952_v35 = vld [vmem:[%s8430_s13 + $0xd8] sm:$0xff] }
 0x62f   : > { %5322 = vmatprep.subr.mxu1 %v5508_v16 }
 0x6b9   : > { %v3592_v49 = vpop.f32.mrf.mxu0 }
 0x6bb   : > { %v3517_v36 = vpop.f32.mrf.mxu1  ;;  %v5201_v51 = vpop.f32.mrf.mxu0 }
 0x6bc   : > { %v3593_v52 = vadd.f32 %v3592_v49, %v3517_v36  ;;  %v4950_v49 = vld [vmem:[%s8430_s13 + $0xc8] sm:$0xff]  ;;  %v4949_v36 = vld [vmem:[%s8430_s13 + $0xc0] sm:$0xff]  ;;  %v4948_v51 = vld [vmem:[%s8430_s13 + $0xb8] sm:$0xff] }
 0x6bd   : > { %v5174_v53 = vpop.f32.mrf.mxu1 }
 0x6be   : > { %v4947_v53 = vld [vmem:[%s8430_s13 + $0xb0] sm:$0xff] }
 0x6d3   : > { %v3684_v54 = vpop.f32.mrf.mxu1 }
 0x6d4   : > { %v3688_v57 = vadd.f32 %v3684_v54, %v3593_v52  ;;  %v4946_v52 = vld [vmem:[%s8430_s13 + $0xa8] sm:$0xff]  ;;  %v4945_v54 = vld [vmem:[%s8430_s13 + $0xa0] sm:$0xff] }
 0x6d5   : > { %v5228_v58 = vpop.f32.mrf.mxu1 }
 0x6d6   : > { %v3696_v59 = vadd.f32 %v4900_v55, %v3688_v57 }
 0x6d8   : > { %v3697_v60 = vmax.f32 %v3696_v59, 0.0 }
 0x6da   : > { %v3728_v61 = vrot.slane %v3697_v60, 1  ;;  %5289 = vmatmul.mubr.msk.f32.vlgmr.msra.gmra.mxu1 %vm2267_vm5, %v3697_v60  ;;  %v3888_v8 = vrot.slane %v3697_v60, 2 }
 0x6db   : > { %5342 = vmatprep.mubr.msk.f32.mxu1 %vm5510_vm11, %v5508_v16  ;;  %5323 = vmatpush3.msra.mxu1 %v4942_v18 }
 0x6dc   : > { %5258 = vmatmul.mubr.msk.f32.vlgmr.msra.gmra.mxu0 %vm2267_vm5, %v3728_v61  ;;  %5324 = vmatprep.subr.mxu1 %v5508_v16 }
 0x6dd   : > { %5292 = vmatpush3.msra.mxu0 %v4930_v62  ;;  %5319 = vmatprep.mubr.msk.f32.mxu0 %vm5510_vm11, %v5508_v16 }
 0x6de   : > { %5293 = vmatprep.subr.mxu0 %v5508_v16  ;;  %5325 = vmatpush3.msra.mxu1 %v4941_v20 }
 0x6df   : > { %5294 = vmatpush3.msra.mxu0 %v4929_v2  ;;  %5326 = vmatprep.subr.mxu1 %v5508_v16  ;;  %v4956_v2 = vld [vmem:[%s8431_s14] ss:$0 sm:$0xff] }
 0x6e0   : > { %5295 = vmatprep.subr.mxu0 %v5508_v16  ;;  %5327 = vmatpush3.msra.mxu1 %v4940_v56 }
 0x6e1   : > { %5296 = vmatpush3.msra.mxu0 %v4928_v4  ;;  %5328 = vmatprep.subr.mxu1 %v5508_v16 }
 0x6e2   : > { %5297 = vmatprep.subr.mxu0 %v5508_v16  ;;  %5329 = vmatpush3.msra.mxu1 %v4939_v45 }
 0x6e3   : > { %5298 = vmatpush3.msra.mxu0 %v4927_v1  ;;  %5330 = vmatprep.subr.mxu1 %v5508_v16 }
 0x6e4   : > { %5299 = vmatprep.subr.mxu0 %v5508_v16  ;;  %5331 = vmatpush3.msra.mxu1 %v4938_v25 }
 0x6e5   : > { %5300 = vmatpush3.msra.mxu0 %v4926_v5  ;;  %5332 = vmatprep.subr.mxu1 %v5508_v16  ;;  %v4250_v5 = vld [vmem:[%s8432_s15 + $0x8] sm:$0xff] }
 0x6e6   : > { %5301 = vmatprep.subr.mxu0 %v5508_v16  ;;  %5333 = vmatpush3.msra.mxu1 %v4937_v17 }
 0x6e7   : > { %5302 = vmatpush3.msra.mxu0 %v4925_v29  ;;  %5334 = vmatprep.subr.mxu1 %v5508_v16 }
 0x6e8   : > { %5303 = vmatprep.subr.mxu0 %v5508_v16  ;;  %5335 = vmatpush3.msra.mxu1 %v4936_v10 }
 0x6e9   : > { %5304 = vmatpush3.msra.mxu0 %v4924_v7  ;;  %5336 = vmatprep.subr.mxu1 %v5508_v16  ;;  %v4249_v7 = vld [vmem:[%s8432_s15] sm:$0xff] }
 0x6ea   : > { %5305 = vmatprep.subr.mxu0 %v5508_v16  ;;  %5337 = vmatpush3.msra.mxu1 %v4935_v28 }
 0x6eb   : > { %5306 = vmatpush3.msra.mxu0 %v4923_v9  ;;  %5338 = vmatprep.subr.mxu1 %v5508_v16 }
 0x6ec   : > { %5307 = vmatprep.subr.mxu0 %v5508_v16  ;;  %5339 = vmatpush3.msra.mxu1 %v4934_v32 }
 0x6ed   : > { %5308 = vmatpush3.msra.mxu0 %v4922_v11  ;;  %5340 = vmatprep.subr.mxu1 %v5508_v16 }
 0x6ee   : > { %5309 = vmatprep.subr.mxu0 %v5508_v16  ;;  %5341 = vmatpush3.msra.mxu1 %v4933_v37 }
 0x6ef   : > { %5310 = vmatpush3.msra.mxu0 %v4921_v6  ;;  %5368 = vmatprep.subr.mxu1 %v5508_v16 }
 0x6f0   : > { %5311 = vmatprep.subr.mxu0 %v5508_v16 }
 0x6f1   : > { %5312 = vmatpush3.msra.mxu0 %v4920_v12 }
 0x6f2   : > { %5313 = vmatprep.subr.mxu0 %v5508_v16 }
 0x6f3   : > { %5314 = vmatpush3.msra.mxu0 %v4919_v13 }
 0x6f4   : > { %5315 = vmatprep.subr.mxu0 %v5508_v16 }
 0x6f5   : > { %5316 = vmatpush3.msra.mxu0 %v4918_v14 }
 0x6f6   : > { %5317 = vmatprep.subr.mxu0 %v5508_v16 }
 0x6f7   : > { %5318 = vmatpush3.msra.mxu0 %v4917_v21 }
 0x6f8   : > { %5320 = vmatmul.mubr.msk.f32.vlgmr.msra.gmra.mxu0 %vm2267_vm5, %v3888_v8  ;;  %5345 = vmatprep.subr.mxu0 %v5508_v16 }
 0x6f9   : > { %5365 = vmatprep.mubr.msk.f32.mxu0 %vm5510_vm11, %v5508_v16  ;;  %5346 = vmatpush3.msra.mxu0 %v3980_v40 }
 0x6fa   : > { %5347 = vmatprep.subr.mxu0 %v5508_v16 }
 0x6fb   : > { %5348 = vmatpush3.msra.mxu0 %v3979_v22 }
 0x6fc   : > { %5349 = vmatprep.subr.mxu0 %v5508_v16 }
 0x6fd   : > { %5350 = vmatpush3.msra.mxu0 %v3978_v26 }
 0x6fe   : > { %5351 = vmatprep.subr.mxu0 %v5508_v16 }
 0x6ff   : > { %5352 = vmatpush3.msra.mxu0 %v3977_v44 }
 0x700   : > { %5353 = vmatprep.subr.mxu0 %v5508_v16 }
 0x701   : > { %5354 = vmatpush3.msra.mxu0 %v3976_v15 }
 0x702   : > { %5355 = vmatprep.subr.mxu0 %v5508_v16 }
 0x703   : > { %5356 = vmatpush3.msra.mxu0 %v3975_v41 }
 0x704   : > { %5357 = vmatprep.subr.mxu0 %v5508_v16 }
 0x705   : > { %5358 = vmatpush3.msra.mxu0 %v3974_v27 }
 0x706   : > { %5359 = vmatprep.subr.mxu0 %v5508_v16 }
 0x707   : > { %5360 = vmatpush3.msra.mxu0 %v3973_v23 }
 0x708   : > { %5361 = vmatprep.subr.mxu0 %v5508_v16 }
 0x709   : > { %5362 = vmatpush3.msra.mxu0 %v3972_v30 }
 0x70a   : > { %5363 = vmatprep.subr.mxu0 %v5508_v16 }
 0x70b   : > { %5364 = vmatpush3.msra.mxu0 %v3971_v0 }
 0x70c   : > { %5391 = vmatprep.subr.mxu0 %v5508_v16 }
 0x79a   : > { %v3869_v38 = vpop.f32.mrf.mxu1 }
 0x79c   : > { %v3797_v39 = vpop.f32.mrf.mxu0  ;;  %v5290_v19 = vpop.f32.mrf.mxu1 }
 0x79d   : > { %v3870_v43 = vadd.f32 %v3869_v38, %v3797_v39 }
 0x79e   : > { %v5259_v63 = vpop.f32.mrf.mxu0 }
 0x7b8   : > { %v3957_v33 = vpop.f32.mrf.mxu0 }
 0x7b9   : > { %v3961_v47 = vadd.f32 %v3957_v33, %v3870_v43 }
 0x7ba   : > { %v5321_v50 = vpop.f32.mrf.mxu0 }
 0x7bb   : > { %v3969_v24 = vadd.f32 %v4932_v3, %v3961_v47 }
 0x7bd   : > { %v3970_v48 = vmax.f32 %v3969_v24, 0.0 }
 0x7bf   : > { %v3993_v34 = vrot.slane %v3970_v48, 1  ;;  %5366 = vmatmul.mubr.msk.f32.vlgmr.msra.gmra.mxu0 %vm2941_vm6, %v3970_v48  ;;  %v4149_v55 = vrot.slane %v3970_v48, 2 }
 0x7c0   : > { %5395 = vmatprep.mubr.msk.f32.mxu0 %vm5510_vm11, %v5508_v16  ;;  %5392 = vmatpush3.msra.mxu0 %v4250_v5 }
 0x7c1   : > { %5343 = vmatmul.mubr.msk.f32.vlgmr.msra.gmra.mxu1 %vm2941_vm6, %v3993_v34  ;;  %5393 = vmatprep.subr.mxu0 %v5508_v16 }
 0x7c2   : > { %5369 = vmatpush3.msra.mxu1 %v4954_v31  ;;  %5388 = vmatprep.mubr.msk.f32.mxu1 %vm5510_vm11, %v5508_v16 }
 0x7c3   : > { %5370 = vmatprep.subr.mxu1 %v5508_v16  ;;  %5394 = vmatpush3.msra.mxu0 %v4249_v7 }
 0x7c4   : > { %5371 = vmatpush3.msra.mxu1 %v4953_v42 }
 0x7c5   : > { %5372 = vmatprep.subr.mxu1 %v5508_v16 }
 0x7c6   : > { %5373 = vmatpush3.msra.mxu1 %v4952_v35 }
 0x7c7   : > { %5374 = vmatprep.subr.mxu1 %v5508_v16 }
 0x7c8   : > { %5375 = vmatpush3.msra.mxu1 %v4951_v46 }
 0x7c9   : > { %5376 = vmatprep.subr.mxu1 %v5508_v16 }
 0x7ca   : > { %5377 = vmatpush3.msra.mxu1 %v4950_v49 }
 0x7cb   : > { %5378 = vmatprep.subr.mxu1 %v5508_v16 }
 0x7cc   : > { %5379 = vmatpush3.msra.mxu1 %v4949_v36 }
 0x7cd   : > { %5380 = vmatprep.subr.mxu1 %v5508_v16 }
 0x7ce   : > { %5381 = vmatpush3.msra.mxu1 %v4948_v51 }
 0x7cf   : > { %5382 = vmatprep.subr.mxu1 %v5508_v16 }
 0x7d0   : > { %5383 = vmatpush3.msra.mxu1 %v4947_v53 }
 0x7d1   : > { %5384 = vmatprep.subr.mxu1 %v5508_v16 }
 0x7d2   : > { %5385 = vmatpush3.msra.mxu1 %v4946_v52 }
 0x7d3   : > { %5386 = vmatprep.subr.mxu1 %v5508_v16 }
 0x7d4   : > { %5387 = vmatpush3.msra.mxu1 %v4945_v54 }
 0x7d5   : > { %5389 = vmatmul.mubr.msk.f32.vlgmr.msra.gmra.mxu1 %vm2941_vm6, %v4149_v55 }
 0x87f   : > { %v4134_v57 = vpop.f32.mrf.mxu0 }
 0x881   : > { %v4062_v58 = vpop.f32.mrf.mxu1  ;;  %v5367_v59 = vpop.f32.mrf.mxu0 }
 0x882   : > { %v4135_v61 = vadd.f32 %v4134_v57, %v4062_v58 }
 0x883   : > { %v5344_v60 = vpop.f32.mrf.mxu1 }
 0x895   : > { %v4218_v62 = vpop.f32.mrf.mxu1 }
 0x896   : > { %v4222_v4 = vadd.f32 %v4218_v62, %v4135_v61 }
 0x897   : > { %v5390_v1 = vpop.f32.mrf.mxu1 }
 0x898   : > { %v4230_v29 = vadd.f32 %v4956_v2, %v4222_v4 }
 0x89a   : > { %v4231_v9 = vmax.f32 %v4230_v29, 0.0 }
 0x89c   : > { %v4233_v11 = vrot.slane %v4231_v9, 1  ;;  %v4236_v12 = vrot.slane %v4231_v9, 2 }
 0x89e   : > { %v4235_v6 = vadd.f32 %v4233_v11, %v4231_v9 }
 0x8a0   : > { %v4238_v13 = vadd.f32 %v4236_v12, %v4235_v6 }
 0x8a2   : > { %4244 = vrot.lane.b32.xlu1 %v4238_v13, %s5511_s1  ;;  %4240 = vrot.lane.b32.xlu0 %v4238_v13, %s5512_s24  ;;  %s5513_s1 = smov [#allocation2]  }
 0x8a3   : > { %s5450_s24 = sshll.u32 %s5513_s1, 4  ;;  %s5451_s24 = int_to_ptr.vmem [resolvable:$false] %s5450_s24 }
 0x8a4   : > { %s5452_s28 = scalar_lea.vmem %s5451_s24, 32  ;;  %p5453_p0 = scmp.lt.s32.totalorder %s4353_s29, %s5451_s24 }
 0x8a5   : > { %p5454_p1 = scmp.lt.s32.totalorder %s5452_s28, %s5446_s27 }
 0x8a7   : > { %p5455_p2 = por %p5454_p1, %p5453_p0 }
 0x8a9   : > { %p5456_p3 = pnand %p5455_p2, %p5449_p13 }
 0x914   : > { %v4241_v14 = vpop.permute.xlu0 %4240  ;;  %v4245_v8 = vpop.permute.xlu1 %4244 }
 0x915   : > { %v4243_v21 = vadd.f32 %v4241_v14, %v4238_v13 }
 0x917   : > { %v4247_v40 = vadd.f32 %v4245_v8, %v4243_v21 }
 0x919   : > { %v4248_v16 = vmul.f32 0.11111111, %v4247_v40 }
 0x91b   : > { %5396 = vmatmul.mubr.msk.f32.vlgmr.msra.gmra.mxu0 %vm4251_vm13, %v4248_v16 }
 0x9db   : > { %v4321_v18 = vpop.f32.mrf.mxu0 }
 0x9dc   : > { %v4326_v22 = vsel %vm4325_vm14, %v4321_v18, -inf }
 0x9dd   : > { %4327 = vmax.xlane.f32.xlu0 %v4326_v22  ;;  %v5397_v20 = vpop.f32.mrf.mxu0 }
 0xa66   : > { %v4328_v26 = vpop.xlane.xlu0 %4327 }
 0xa67   : > { %v4329_v56 = vsub.f32 %v4321_v18, %v4328_v26 }
 0xa69   : > { %v4330_v44 = vmul.f32 1.442695, %v4329_v56 }
 0xa6b   : > { %5442 = vpow2.f32 %v4330_v44 }
 0xa78   : > { %v5443_v45 = vpop.eup %5442 }
 0xa79   : > { %v4332_v15 = vsel %vm4325_vm14, %v5443_v45, 0.0 }
 0xa7a   : > { %4333 = vadd.xlane.f32.xlu1 %v4332_v15 }
 0xb03   : > { %v4334_v25 = vpop.xlane.xlu1 %4333 }
 0xb04   : > { %5444 = vlog2.f32 %v4334_v25 }
 0xb11   : > { %v5445_v41 = vpop.eup %5444 }
 0xb12   : > { %v4336_v17 = vmul.f32 0.6931472, %v5445_v41 }
 0xb14   : > { %v4337_v27 = vsub.f32 %v4329_v56, %v4336_v17 }
 0xb16   : > { %4338 = vst.msk [vmem:[%s540_s19] sm:$0x1] %vm4325_vm14, %v4337_v27 }
 0xb17   : > { %5459 = shalt.err (!%p5456_p3)
}
 0xb18   : > { %s5460_s26 = scalar_lea.hbm %s4350_s30, 16  ;;  %s5464_s19 = scalar_lea.hbm %s8462_s20, 32 }
 0xb19   : > { %p5461_p4 = scmp.ne.s32.totalorder %s4350_s30, %s5460_s26  ;;  %p5465_p9 = scmp.lt.s32.totalorder %s4350_s30, %s8462_s20 }
 0xb1a   : > { %p5466_p10 = scmp.lt.s32.totalorder %s5464_s19, %s5460_s26 }
 0xb1b   : > { %p5462_p7 = pnand %p5461_p4, %p5642_p5 }
 0xb1c   : > { %p5467_p11 = por %p5466_p10, %p5465_p9 }
 0xb1d   : > { %p5463_p8 = pneg %p5462_p7 }
 0xb1f   : > { %p5468_p12 = pnand %p5467_p11, %p5463_p8 }
 0xb21   : > { %5471 = shalt.err (!%p5468_p12)
}
 0xb22   : > { %5398 = dma.vmem_to_hbm [thread:$0]  (%p5642_p5), %s4353_s29, 16, %s4350_s30, %s4340_s18  }
 0xb23 PF: > { %s8463_s27 = sld [smem:[#allocation7_spill]] }
 0xb24   : > { %s8464_s1 = sld [smem:[#allocation5_spill]] }
 0xb29   : > { %p5404_p13 = scmp.ge.s32.totalorder %s8463_s27, 2 }
 0xb2a   : > { %s4364_s28 = sand.u32 1, %s8464_s1  }
 0xb2b   : > { %p5401_p0 = pnand %p5404_p13, %p5646_p6  ;;  %s4365_s17 = scalar_lea.sflag [#allocation3], %s4364_s28 }
 0xb2d   : > { %p5402_p1 = pneg %p5401_p0 }
 0xb2f   : > { %5489 = dma.done.wait (%p5402_p1), %s4365_s17, 16  }
 0xb30   : > { %5491 = vsyncadd (%p5402_p1), %s4365_s17, 4294967280  ;;  %s8466_s27 = sld [smem:[#allocation8_spill]]  ;;  %s8469_s24 = smov %s5498_s25 }
 0xb31   : > { %s8467_s2 = sld [smem:[#allocation6_spill]] }
 0xb32   : > { %s8468_s26 = sld [smem:[#allocation9_spill]] }
 0xb36   : > { %p27_p2 = scmp.ge.s32.totalorder %s8466_s27, 4  }
 0xb37   : > { %s8470_s25 = smov %s8467_s2 }
 0xb38   :  { %29 = sbr.rel (!%p27_p2) target bundleno = 8 (0x8), region = 137 }
 0xb3d   :  { %4369 = vsyncpa [#allocation3], 1 }
 0xb3e   :  { %4371 = vsyncpa [#allocation3 + $0x1], 1 }

</bundles_post_ra>
